<compile_context>
chip_gen: v7x
topology: tpu7x:2x2x1
jax: 0.10.0
libtpu: 0.0.40
codegen_flags: <defaults>
</compile_context>

<pallas_src>
import functools

import jax
import jax.numpy as jnp
from jax.experimental import pallas as pl
from jax.experimental.pallas import tpu as pltpu


def _round_up(n, m):
    return ((n + m - 1) // m) * m


def _is_v5e():
    # v5e has no bf16 VPU/EUP -> keep GELU math in f32 there.
    try:
        kind = jax.devices()[0].device_kind.lower()
    except Exception:
        return False
    return ("v5 lite" in kind) or ("v5e" in kind) or ("v5lite" in kind)


def _vmem_capacity_bytes():
    try:
        return int(pltpu.get_tpu_info().vmem_capacity_bytes)
    except Exception:
        return 64 * 1024 * 1024  # conservative fallback (v7x per-TC capacity)


def _erf_poly(x):
    # Abramowitz & Stegun 7.1.26 (|abs err| <= 1.5e-7).  Uses only exp/mul/add/
    # select, so no reliance on an erf lowering rule in Mosaic.  Python scalar
    # constants are weak-typed -> computation stays in x's dtype (f32 or bf16).
    p = 0.3275911
    a1, a2, a3, a4, a5 = (0.254829592, -0.284496736, 1.421413741,
                          -1.453152027, 1.061405429)
    z = jnp.abs(x)
    t = 1.0 / (1.0 + p * z)
    poly = ((((a5 * t + a4) * t + a3) * t + a2) * t + a1) * t
    y = 1.0 - poly * jnp.exp(-(z * z))
    return jnp.where(x < 0, -y, y)


def _gelu(x, approximate):
    if approximate:
        return jax.nn.gelu(x, approximate=True)       # tanh formula (EUP tanh)
    return 0.5 * x * (1.0 + _erf_poly(x * 0.7071067811865476))  # exact erf GELU


def _mlp_kernel(x_ref, w1_ref, b1_ref, w2_ref, b2_ref, o_ref, *,
                approximate_gelu, gelu_in_bf16):
    # x_ref:  (tm, C_in)        token tile, native dtype (bf16 fast path)
    # w1_ref: (C_in, C_hid)     fc1 weight, resident in VMEM (single copy)
    # b1_ref: (1, C_hid)
    # w2_ref: (C_hid, C_out)    fc2 weight, resident in VMEM (single copy)
    # b2_ref: (1, C_out)
    # Native-dtype MXU operands, f32 accumulation.
    h = jnp.dot(x_ref[...], w1_ref[...], preferred_element_type=jnp.float32)
    h = h + b1_ref[...].astype(jnp.float32)
    if gelu_in_bf16:
        # v6e/v7x: bf16 VPU/EUP -> halves VALU-slot work and vreg footprint; fc2
        # consumes bf16 anyway.
        h = h.astype(jnp.bfloat16)
    h = _gelu(h, approximate_gelu)
    h = h.astype(w2_ref.dtype)
    out = jnp.dot(h, w2_ref[...], preferred_element_type=jnp.float32)
    out = out + b2_ref[...].astype(jnp.float32)
    o_ref[...] = out.astype(o_ref.dtype)


@functools.partial(jax.jit,
                   static_argnames=("tm", "approximate_gelu", "gelu_in_bf16"))
def _mlp_pallas(x_tokens, w1, b1_2d, w2, b2_2d, *, tm, approximate_gelu,
                gelu_in_bf16):
    M, c_in = x_tokens.shape
    c_hid = w1.shape[1]
    c_out = w2.shape[1]
    out_dtype = x_tokens.dtype

    # Token tiling: no M padding (Pallas masks the ragged last block).
    #  - M > tm      : full tiles of tm rows.
    #  - 32 <= M <= tm: split into two tiles (16-row aligned for the bf16 sublane
    #                   pack) so the "parallel" grid axis keeps both v7x TCs busy.
    #  - tiny M      : one full-extent block (block dims == array dims is legal).
    if M > tm:
        tm_eff = tm
    elif M >= 32:
        tm_eff = _round_up((M + 1) // 2, 16)
    else:
        tm_eff = M
    grid_m = pl.cdiv(M, tm_eff)

    def _nbytes(shape, dtype):
        n = 1
        for s in shape:
            n *= s
        return n * jnp.dtype(dtype).itemsize

    # VMEM budget: double-buffered x/out tiles + single-buffered resident weights
    # and biases + the f32 hidden activation; 2x headroom, capped at ~85% of the
    # generation's per-core VMEM (leaves Mosaic scratch/semaphore headroom).
    vmem_needed = (
        2 * _nbytes((tm_eff, c_in), x_tokens.dtype)
        + 2 * _nbytes((tm_eff, c_out), out_dtype)
        + _nbytes((c_in, c_hid), w1.dtype)
        + _nbytes((c_hid, c_out), w2.dtype)
        + _nbytes((1, c_hid), b1_2d.dtype)
        + _nbytes((1, c_out), b2_2d.dtype)
        + _nbytes((tm_eff, c_hid), jnp.float32)
    )
    vmem_ceiling = int(_vmem_capacity_bytes() * 0.85)
    vmem_limit = int(min(max(2 * vmem_needed, 32 * 1024 * 1024), vmem_ceiling))

    cost = pl.CostEstimate(
        flops=2 * M * (c_in * c_hid + c_hid * c_out),
        transcendentals=M * c_hid,
        bytes_accessed=(_nbytes((M, c_in), x_tokens.dtype)
                        + _nbytes((c_in, c_hid), w1.dtype)
                        + _nbytes((c_hid, c_out), w2.dtype)
                        + _nbytes((1, c_hid), b1_2d.dtype)
                        + _nbytes((1, c_out), b2_2d.dtype)
                        + _nbytes((M, c_out), out_dtype)),
    )

    kernel = functools.partial(_mlp_kernel,
                               approximate_gelu=approximate_gelu,
                               gelu_in_bf16=gelu_in_bf16)

    return pl.pallas_call(
        kernel,
        out_shape=jax.ShapeDtypeStruct((M, c_out), out_dtype),
        grid=(grid_m,),
        in_specs=[
            pl.BlockSpec((tm_eff, c_in), lambda i: (i, 0)),           # x tile
            pl.BlockSpec(memory_space=pltpu.MemorySpace.VMEM),        # fc1 weight
            pl.BlockSpec(memory_space=pltpu.MemorySpace.VMEM),        # fc1 bias
            pl.BlockSpec(memory_space=pltpu.MemorySpace.VMEM),        # fc2 weight
            pl.BlockSpec(memory_space=pltpu.MemorySpace.VMEM),        # fc2 bias
        ],
        out_specs=pl.BlockSpec((tm_eff, c_out), lambda i: (i, 0)),
        compiler_params=pltpu.CompilerParams(
            dimension_semantics=("parallel",),
            vmem_limit_bytes=vmem_limit,
        ),
        cost_estimate=cost,
    )(x_tokens, w1, b1_2d, w2, b2_2d)


def mlp_forward(x, w1, b1, w2, b2, *, tm=512, approximate_gelu=False):
    """Mlp.forward: fc1 -> GELU -> dropout(p=0) -> fc2 -> dropout(p=0).

    x: (..., C_in) channels-last (nn.Linear acts on the last axis).
    w1: (C_in, C_hid) == fc1.weight.T, b1: (C_hid,),
    w2: (C_hid, C_out) == fc2.weight.T, b2: (C_out,).
    approximate_gelu=False matches PyTorch nn.GELU() (exact erf).
    """
    lead = x.shape[:-1]
    c_in = x.shape[-1]
    c_out = w2.shape[1]
    # bf16 GELU only where the VPU/EUP support it (not v5e) and fc2 is bf16 anyway.
    gelu_in_bf16 = (not _is_v5e()) and (w2.dtype == jnp.bfloat16)
    x_tokens = x.reshape(-1, c_in)
    y = _mlp_pallas(x_tokens, w1, b1.reshape(1, -1), w2, b2.reshape(1, -1),
                    tm=tm, approximate_gelu=approximate_gelu,
                    gelu_in_bf16=gelu_in_bf16)
    return y.reshape(*lead, c_out)


def _reference(x, w1, b1, w2, b2, *, approximate_gelu=False):
    xf = x.astype(jnp.float32)
    h = jax.nn.gelu(xf @ w1.astype(jnp.float32) + b1.astype(jnp.float32),
                    approximate=approximate_gelu)
    return h @ w2.astype(jnp.float32) + b2.astype(jnp.float32)


if __name__ == "__main__":
    key = jax.random.PRNGKey(0)
    k_x, k_w1, k_b1, k_w2, k_b2, k_x2 = jax.random.split(key, 6)

    # ConvNeXt Mlp shapes: in=96, hidden=4*96=384, out=96. Channels-last input.
    B, H, W = 2, 16, 16                      # M = 512 tokens -> 2 parallel tiles
    C_in, C_hid, C_out = 96, 384, 96

    # bf16 activations/weights (MXU fast path); f32 biases.
    x = jax.random.normal(k_x, (B, H, W, C_in), dtype=jnp.float32).astype(jnp.bfloat16)
    w1 = (jax.random.normal(k_w1, (C_in, C_hid), dtype=jnp.float32) * 0.05).astype(jnp.bfloat16)
    b1 = jax.random.normal(k_b1, (C_hid,), dtype=jnp.float32) * 0.05
    w2 = (jax.random.normal(k_w2, (C_hid, C_out), dtype=jnp.float32) * 0.05).astype(jnp.bfloat16)
    b2 = jax.random.normal(k_b2, (C_out,), dtype=jnp.float32) * 0.05

    # Main case: divisible token count.
    out = mlp_forward(x, w1, b1, w2, b2)
    out = jax.block_until_ready(out)
    ref = _reference(x, w1, b1, w2, b2, approximate_gelu=False)
    assert out.shape == (B, H, W, C_out)
    max_err = jnp.max(jnp.abs(out.astype(jnp.float32) - ref))
    assert float(max_err) < 2e-2, f"mismatch vs reference (max abs err {max_err})"

    # Ragged case: M = 77 tokens (not divisible by the tile) exercises the
    # masked last block (replaces the old pad-M + slice-output path).
    x2 = jax.random.normal(k_x2, (1, 7, 11, C_in), dtype=jnp.float32).astype(jnp.bfloat16)
    out2 = jax.block_until_ready(mlp_forward(x2, w1, b1, w2, b2))
    ref2 = _reference(x2, w1, b1, w2, b2, approximate_gelu=False)
    assert out2.shape == (1, 7, 11, C_out)
    max_err2 = jnp.max(jnp.abs(out2.astype(jnp.float32) - ref2))
    assert float(max_err2) < 2e-2, f"ragged-block mismatch (max abs err {max_err2})"

    print("KERNEL_OK")
</pallas_src>

<mosaic_0001>
module attributes {stable_mosaic.version = 11 : i64} {
  func.func @_mlp_kernel(%arg0: i32, %arg1: memref<256x96xbf16, #tpu.memory_space<vmem>>, %arg2: memref<96x384xbf16, #tpu.memory_space<vmem>>, %arg3: memref<1x384xf32, #tpu.memory_space<vmem>>, %arg4: memref<384x96xbf16, #tpu.memory_space<vmem>>, %arg5: memref<1x96xf32, #tpu.memory_space<vmem>>, %arg6: memref<256x96xbf16, #tpu.memory_space<vmem>>) attributes {dimension_semantics = [#tpu.dimension_semantics<parallel>], iteration_bounds = array<i64: 2>, scalar_prefetch = 0 : i64, scratch_operands = 0 : i64, tpu.core_type = #tpu.core_type<tc>, window_params = [{transform_indices = @transform_0, window_bounds = array<i64: 256, 96>}, {pipeline_mode = #tpu.pipeline_mode<synchronous>, transform_indices = @transform_1, window_bounds = array<i64: 96, 384>}, {pipeline_mode = #tpu.pipeline_mode<synchronous>, transform_indices = @transform_2, window_bounds = array<i64: 1, 384>}, {pipeline_mode = #tpu.pipeline_mode<synchronous>, transform_indices = @transform_3, window_bounds = array<i64: 384, 96>}, {pipeline_mode = #tpu.pipeline_mode<synchronous>, transform_indices = @transform_4, window_bounds = array<i64: 1, 96>}, {transform_indices = @transform_5, window_bounds = array<i64: 256, 96>}]} {
    %c0 = arith.constant 0 : index
    %c0_0 = arith.constant 0 : index
    %0 = vector.load %arg1[%c0, %c0_0] : memref<256x96xbf16, #tpu.memory_space<vmem>>, vector<256x96xbf16>
    %c0_1 = arith.constant 0 : index
    %c0_2 = arith.constant 0 : index
    %1 = vector.load %arg2[%c0_1, %c0_2] : memref<96x384xbf16, #tpu.memory_space<vmem>>, vector<96x384xbf16>
    %cst = arith.constant dense<0.000000e+00> : vector<256x384xf32>
    %2 = tpu.matmul %0, %1, %cst {dimension_numbers = #tpu.dot_dimension_numbers<[1], [0], [0], [1], [0, 0, 1, 1], [], []>} : vector<256x96xbf16>, vector<96x384xbf16>, vector<256x384xf32> -> vector<256x384xf32>
    %c0_3 = arith.constant 0 : index
    %c0_4 = arith.constant 0 : index
    %3 = vector.load %arg3[%c0_3, %c0_4] : memref<1x384xf32, #tpu.memory_space<vmem>>, vector<1x384xf32>
    %4 = vector.broadcast %3 : vector<1x384xf32> to vector<256x384xf32>
    %5 = arith.addf %2, %4 : vector<256x384xf32>
    %6 = arith.truncf %5 : vector<256x384xf32> to vector<256x384xbf16>
    %cst_5 = arith.constant 5.000000e-01 : bf16
    %7 = vector.broadcast %cst_5 : bf16 to vector<256x384xbf16>
    %8 = arith.mulf %7, %6 : vector<256x384xbf16>
    %cst_6 = arith.constant 7.070310e-01 : bf16
    %9 = vector.broadcast %cst_6 : bf16 to vector<256x384xbf16>
    %10 = arith.mulf %6, %9 : vector<256x384xbf16>
    %11 = math.absf %10 : vector<256x384xbf16>
    %cst_7 = arith.constant 3.281250e-01 : bf16
    %12 = vector.broadcast %cst_7 : bf16 to vector<256x384xbf16>
    %13 = arith.mulf %12, %11 : vector<256x384xbf16>
    %cst_8 = arith.constant 1.000000e+00 : bf16
    %14 = vector.broadcast %cst_8 : bf16 to vector<256x384xbf16>
    %15 = arith.addf %14, %13 : vector<256x384xbf16>
    %cst_9 = arith.constant 1.000000e+00 : bf16
    %16 = vector.broadcast %cst_9 : bf16 to vector<256x384xbf16>
    %17 = arith.divf %16, %15 : vector<256x384xbf16>
    %cst_10 = arith.constant 1.062500e+00 : bf16
    %18 = vector.broadcast %cst_10 : bf16 to vector<256x384xbf16>
    %19 = arith.mulf %18, %17 : vector<256x384xbf16>
    %cst_11 = arith.constant -1.453130e+00 : bf16
    %20 = vector.broadcast %cst_11 : bf16 to vector<256x384xbf16>
    %21 = arith.addf %19, %20 : vector<256x384xbf16>
    %22 = arith.mulf %21, %17 : vector<256x384xbf16>
    %cst_12 = arith.constant 1.421880e+00 : bf16
    %23 = vector.broadcast %cst_12 : bf16 to vector<256x384xbf16>
    %24 = arith.addf %22, %23 : vector<256x384xbf16>
    %25 = arith.mulf %24, %17 : vector<256x384xbf16>
    %cst_13 = arith.constant -2.851560e-01 : bf16
    %26 = vector.broadcast %cst_13 : bf16 to vector<256x384xbf16>
    %27 = arith.addf %25, %26 : vector<256x384xbf16>
    %28 = arith.mulf %27, %17 : vector<256x384xbf16>
    %cst_14 = arith.constant 2.539060e-01 : bf16
    %29 = vector.broadcast %cst_14 : bf16 to vector<256x384xbf16>
    %30 = arith.addf %28, %29 : vector<256x384xbf16>
    %31 = arith.mulf %30, %17 : vector<256x384xbf16>
    %32 = arith.mulf %11, %11 : vector<256x384xbf16>
    %cst_15 = arith.constant 0.000000e+00 : bf16
    %33 = vector.broadcast %cst_15 : bf16 to vector<256x384xbf16>
    %34 = arith.subf %33, %32 : vector<256x384xbf16>
    %35 = math.exp %34 : vector<256x384xbf16>
    %36 = arith.mulf %31, %35 : vector<256x384xbf16>
    %cst_16 = arith.constant 1.000000e+00 : bf16
    %37 = vector.broadcast %cst_16 : bf16 to vector<256x384xbf16>
    %38 = arith.subf %37, %36 : vector<256x384xbf16>
    %cst_17 = arith.constant 0.000000e+00 : bf16
    %39 = vector.broadcast %cst_17 : bf16 to vector<256x384xbf16>
    %40 = arith.cmpf olt, %10, %39 : vector<256x384xbf16>
    %cst_18 = arith.constant 0.000000e+00 : bf16
    %41 = vector.broadcast %cst_18 : bf16 to vector<256x384xbf16>
    %42 = arith.subf %41, %38 : vector<256x384xbf16>
    %43 = arith.select %40, %42, %38 : vector<256x384xi1>, vector<256x384xbf16>
    %cst_19 = arith.constant 1.000000e+00 : bf16
    %44 = vector.broadcast %cst_19 : bf16 to vector<256x384xbf16>
    %45 = arith.addf %44, %43 : vector<256x384xbf16>
    %46 = arith.mulf %8, %45 : vector<256x384xbf16>
    %c0_20 = arith.constant 0 : index
    %c0_21 = arith.constant 0 : index
    %47 = vector.load %arg4[%c0_20, %c0_21] : memref<384x96xbf16, #tpu.memory_space<vmem>>, vector<384x96xbf16>
    %cst_22 = arith.constant dense<0.000000e+00> : vector<256x96xf32>
    %48 = tpu.matmul %46, %47, %cst_22 {dimension_numbers = #tpu.dot_dimension_numbers<[1], [0], [0], [1], [0, 0, 1, 1], [], []>} : vector<256x384xbf16>, vector<384x96xbf16>, vector<256x96xf32> -> vector<256x96xf32>
    %c0_23 = arith.constant 0 : index
    %c0_24 = arith.constant 0 : index
    %49 = vector.load %arg5[%c0_23, %c0_24] : memref<1x96xf32, #tpu.memory_space<vmem>>, vector<1x96xf32>
    %50 = vector.broadcast %49 : vector<1x96xf32> to vector<256x96xf32>
    %51 = arith.addf %48, %50 : vector<256x96xf32>
    %52 = arith.truncf %51 : vector<256x96xf32> to vector<256x96xbf16>
    %c0_25 = arith.constant 0 : index
    %c0_26 = arith.constant 0 : index
    %53 = vector.load %arg6[%c0_25, %c0_26] : memref<256x96xbf16, #tpu.memory_space<vmem>>, vector<256x96xbf16>
    tpu.vector_store %arg6[%c0_25, %c0_26], %52 {strides = array<i32>} : memref<256x96xbf16, #tpu.memory_space<vmem>>, vector<256x96xbf16>,
    return
  }
  func.func @transform_0(%arg0: i32) -> (i32, i32) {
    %c0_i32 = arith.constant 0 : i32
    %c0_i32_0 = arith.constant 0 : i32
    return %arg0, %c0_i32 : i32, i32
  }
  func.func @transform_1(%arg0: i32) -> (i32, i32) {
    %c0_i32 = arith.constant 0 : i32
    %c0_i32_0 = arith.constant 0 : i32
    %c0_i32_1 = arith.constant 0 : i32
    return %c0_i32, %c0_i32_0 : i32, i32
  }
  func.func @transform_2(%arg0: i32) -> (i32, i32) {
    %c0_i32 = arith.constant 0 : i32
    %c0_i32_0 = arith.constant 0 : i32
    %c0_i32_1 = arith.constant 0 : i32
    return %c0_i32, %c0_i32_0 : i32, i32
  }
  func.func @transform_3(%arg0: i32) -> (i32, i32) {
    %c0_i32 = arith.constant 0 : i32
    %c0_i32_0 = arith.constant 0 : i32
    %c0_i32_1 = arith.constant 0 : i32
    return %c0_i32, %c0_i32_0 : i32, i32
  }
  func.func @transform_4(%arg0: i32) -> (i32, i32) {
    %c0_i32 = arith.constant 0 : i32
    %c0_i32_0 = arith.constant 0 : i32
    %c0_i32_1 = arith.constant 0 : i32
    return %c0_i32, %c0_i32_0 : i32, i32
  }
  func.func @transform_5(%arg0: i32) -> (i32, i32) {
    %c0_i32 = arith.constant 0 : i32
    %c0_i32_0 = arith.constant 0 : i32
    return %arg0, %c0_i32 : i32, i32
  }
}

</mosaic_0001>

<bundles_post_ra>
// kernel: _mlp_pallas.1
= control target key start
LH: loop header
LB: loop body
LE: loop exit
PB: predicated region body
PF: predicated region fallthrough
CT: control target
= control target key end

     0   :  { %s3740_s18 = smov 0   ;;  %s5902_s0 = inlined_call_operand.vmem [shape: bf16[512,96], index: 0, kind: input, shape index: {}]   ;;  %s5903_s1 = inlined_call_operand.vmem [shape: bf16[96,384], index: 1, kind: input, shape index: {}]   ;;  %s5904_s2 = inlined_call_operand.vmem [shape: f32[1,384], index: 2, kind: input, shape index: {}]   ;;  %s5905_s3 = inlined_call_operand.vmem [shape: bf16[384,96], index: 3, kind: input, shape index: {}]   ;;  %s5906_s4 = inlined_call_operand.vmem [shape: f32[1,96], index: 4, kind: input, shape index: {}]   ;;  %s5907_s5 = inlined_call_operand.vmem [shape: bf16[512,96], index: 5, kind: output, shape index: {}]  }
   0x1 LB: > { %s3020_s19 = sadd.s32 4294967295, %s3707_s18   ;;  %p3024_p0 = scmp.ge.s32.totalorder %s3707_s18, 1  ;;  %s3707_s18 = sphi %s3740_s18, %s15_s18  }
   0x2   : > { %p188_p1 = scmp.lt.s32.totalorder %s3707_s18, 3 }
   0x4   : > { %p189_p2 = pnand %p3024_p0, %p188_p1 }
   0x6   : > { %192 = sbr.rel (%p189_p2) target bundleno = 883 (0x373), region = 40 }
   0xd   : > { %v3445_v0 = vld [vmem:[%s5903_s1 + $0x4] ss:$12 sps:$4 sm:$0xff]   ;;  %s3025_s22 = sshll.u32 %s3020_s19, 5  ;;  %v3447_v1 = vld [vmem:[%s5903_s1] ss:$12 sps:$4 sm:$0xff]   ;;  %v3709_v2 = vmov 0   ;;  %v296_v58 = vlaneseq }
   0xe   : > { %568 = vmatprep.mubr.bf16.mxu0 %v3709_v2  ;;  %p217_p3 = scmp.lt.s32.totalorder %s3025_s22, 63  ;;  %536 = vmatprep.subr.bf16.mxu0 %v3445_v0  ;;  %v3448_v3 = vld [vmem:[%s5903_s1 + $0x1c] ss:$12 sps:$4 sm:$0xff]   ;;  %v3451_v5 = vld [vmem:[%s5903_s1 + $0x18] ss:$12 sps:$4 sm:$0xff]   ;;  %vm487_vm0 = vcmask 785408  }
   0xf   : > { %537 = vmatpush1.bf16.msra.mxu0 %v3447_v1  ;;  %v3450_v4 = vld [vmem:[%s5903_s1 + $0x8] ss:$12 sps:$4 sm:$0xff]   ;;  %v3454_v7 = vld [vmem:[%s5903_s1 + $0x20] ss:$12 sps:$4 sm:$0xff]   ;;  %v3455_v8 = vld [vmem:[%s5903_s1 + $0x30] ss:$12 sps:$4 sm:$0xff]  }
  0x10   : > { %538 = vmatprep.subr.bf16.mxu0 %v3448_v3  ;;  %v3452_v6 = vld [vmem:[%s5903_s1 + $0x34] ss:$12 sps:$4 sm:$0xff]   ;;  %s6468_s22 = smov (!%p217_p3, %s3025_s22), 63  ;;  %3344 = vmatprep.subr.bf16.mxu1 %v3450_v4  ;;  %v3458_v9 = vld [vmem:[%s5903_s1 + $0x38] ss:$12 sps:$4 sm:$0xff]   ;;  %v3488_v38 = vld [vmem:[%s5905_s3 + $0x48] sm:$0xff]  }
  0x11   : > { %3345 = vmatpush3.bf16.msra.mxu1 %v3450_v4  ;;  %v3456_v10 = vld [vmem:[%s5903_s1 + $0x4c] ss:$12 sps:$4 sm:$0xff]   ;;  %s3026_s16 = sshll.u32 %s6468_s22, 2  ;;  %v3459_v11 = vld [vmem:[%s5903_s1 + $0x48] ss:$12 sps:$4 sm:$0xff]   ;;  %v3485_v22 = vld [vmem:[%s5905_s3 + $0x40] sm:$0xff]  }
  0x12   : > { %3346 = vmatprep.subr.bf16.mxu1 %v3454_v7  ;;  %v3462_v12 = vld [vmem:[%s5903_s1 + $0x50] ss:$12 sps:$4 sm:$0xff]   ;;  %s3793_s25 = scalar_lea.vmem %s5902_s0, %s3026_s16  ;;  %v3463_v14 = vld [vmem:[%s5903_s1 + $0x60] ss:$12 sps:$4 sm:$0xff]   ;;  %v3466_v16 = vld [vmem:[%s5903_s1 + $0x68] ss:$12 sps:$4 sm:$0xff]   ;;  %s5743_s26 = scalar_lea.vmem %s5907_s5, %s3026_s16 }
  0x13   : > { %539 = vmatpush1.bf16.msra.mxu0 %v3451_v5  ;;  %v3460_v13 = vld [vmem:[%s5903_s1 + $0x64] ss:$12 sps:$4 sm:$0xff]   ;;  %v3464_v17 = vld [vmem:[%s5903_s1 + $0x7c] ss:$12 sps:$4 sm:$0xff]   ;;  %v3469_v19 = vld [vmem:[%s5903_s1 + $0x80] ss:$12 sps:$4 sm:$0xff]  }
  0x14   : > { %540 = vmatprep.subr.bf16.mxu0 %v3452_v6  ;;  %v3468_v15 = vld [vmem:[%s3793_s25] sm:$0xff]   ;;  %v3470_v20 = vld [vmem:[%s3793_s25 + $0x8] sm:$0xff]   ;;  %v3471_v21 = vld [vmem:[%s3793_s25 + $0x10] sm:$0xff]   ;;  %v297_v59 = vshrl.u32 %v296_v58, 7 }
  0x15   : > { %3347 = vmatpush3.bf16.msra.mxu1 %v3454_v7  ;;  %3356 = vmatprep.mubr.msk.bf16.mxu1 %vm487_vm0, %v3468_v15  ;;  %v3467_v18 = vld [vmem:[%s5903_s1 + $0x78] ss:$12 sps:$4 sm:$0xff]   ;;  %v3474_v27 = vld [vmem:[%s3793_s25 + $0x28] sm:$0xff]   ;;  %v3475_v28 = vld [vmem:[%s3793_s25 + $0x30] sm:$0xff]  }
  0x16   : > { %3348 = vmatprep.subr.bf16.mxu1 %v3458_v9  ;;  %v3472_v23 = vld [vmem:[%s3793_s25 + $0x18] sm:$0xff]   ;;  %v3486_v24 = vld [vmem:[%s5905_s3] sm:$0xff]   ;;  %v3478_v31 = vld [vmem:[%s3793_s25 + $0x48] sm:$0xff]   ;;  %v298_v60 = vsub.s32 0, %v297_v59  ;;  %v302_v62 = vsub.s32 1, %v297_v59  ;;  %v306_v63 = vsub.s32 2, %v297_v59 }
  0x17   : > { %541 = vmatpush1.bf16.msra.mxu0 %v3455_v8  ;;  %v3487_v25 = vld [vmem:[%s5905_s3 + $0x80] sm:$0xff]   ;;  %v3476_v29 = vld [vmem:[%s3793_s25 + $0x38] sm:$0xff]   ;;  %v3479_v32 = vld [vmem:[%s3793_s25 + $0x50] sm:$0xff]  }
  0x18   : > { %542 = vmatprep.subr.bf16.mxu0 %v3456_v10  ;;  %v3473_v26 = vld [vmem:[%s3793_s25 + $0x20] sm:$0xff]   ;;  %v3480_v33 = vld [vmem:[%s3793_s25 + $0x58] sm:$0xff]   ;;  %v3482_v35 = vld [vmem:[%s3793_s25 + $0x68] sm:$0xff]  }
  0x19   : > { %3349 = vmatpush3.bf16.msra.mxu1 %v3458_v9  ;;  %v3477_v30 = vld [vmem:[%s3793_s25 + $0x40] sm:$0xff]   ;;  %v3483_v36 = vld [vmem:[%s3793_s25 + $0x70] sm:$0xff]   ;;  %v3484_v37 = vld [vmem:[%s3793_s25 + $0x78] sm:$0xff]  }
  0x1a   : > { %3350 = vmatprep.subr.bf16.mxu1 %v3462_v12  ;;  %v3481_v34 = vld [vmem:[%s3793_s25 + $0x60] sm:$0xff]   ;;  %v3489_v39 = vld [vmem:[%s5905_s3 + $0x8] sm:$0xff]   ;;  %v3490_v40 = vld [vmem:[%s5905_s3 + $0x50] sm:$0xff]  }
  0x1b   : > { %543 = vmatpush1.bf16.msra.mxu0 %v3459_v11  ;;  %v3492_v41 = vld [vmem:[%s5905_s3 + $0x88] sm:$0xff]   ;;  %v3491_v42 = vld [vmem:[%s5905_s3 + $0x10] sm:$0xff]   ;;  %v3493_v43 = vld [vmem:[%s5905_s3 + $0x58] sm:$0xff]  }
  0x1c   : > { %544 = vmatprep.subr.bf16.mxu0 %v3460_v13  ;;  %v3494_v44 = vld [vmem:[%s5905_s3 + $0x18] sm:$0xff]   ;;  %v3497_v45 = vld [vmem:[%s5905_s3 + $0x90] sm:$0xff]   ;;  %v3495_v46 = vld [vmem:[%s5905_s3 + $0x60] sm:$0xff]  }
  0x1d   : > { %3351 = vmatpush3.bf16.msra.mxu1 %v3462_v12  ;;  %v3496_v47 = vld [vmem:[%s5905_s3 + $0x20] sm:$0xff]   ;;  %v3498_v48 = vld [vmem:[%s5905_s3 + $0x68] sm:$0xff]   ;;  %v3502_v50 = vld [vmem:[%s5905_s3 + $0x98] sm:$0xff]  }
  0x1e   : > { %3352 = vmatprep.subr.bf16.mxu1 %v3466_v16  ;;  %v3499_v49 = vld [vmem:[%s5905_s3 + $0x28] sm:$0xff]   ;;  %v3503_v51 = vld [vmem:[%s5905_s3 + $0xa0] sm:$0xff]   ;;  %v3500_v52 = vld [vmem:[%s5905_s3 + $0x70] sm:$0xff]  }
  0x1f   : > { %545 = vmatpush1.bf16.msra.mxu0 %v3463_v14  ;;  %v3501_v53 = vld [vmem:[%s5905_s3 + $0x30] sm:$0xff]   ;;  %v3506_v54 = vld [vmem:[%s5905_s3 + $0xa8] sm:$0xff]   ;;  %v3504_v55 = vld [vmem:[%s5905_s3 + $0x78] sm:$0xff]  }
  0x20   : > { %546 = vmatprep.subr.bf16.mxu0 %v3464_v17  ;;  %v3507_v56 = vld [vmem:[%s5905_s3 + $0xb0] sm:$0xff]   ;;  %v3505_v57 = vld [vmem:[%s5905_s3 + $0x38] sm:$0xff]   ;;  %v294_v61 = vld [vmem:[%s5904_s2] sm:$0x7] }
  0x21   : > { %3353 = vmatpush3.bf16.msra.mxu1 %v3466_v16  ;;  %v3948_v0 = vrot.slane %v294_v61, %v298_v60  ;;  %v3952_v3 = vrot.slane %v294_v61, %v306_v63 }
  0x22   : > { %3354 = vmatprep.subr.bf16.mxu1 %v3469_v19 }
  0x23   : > { %547 = vmatpush1.bf16.msra.mxu0 %v3467_v18 }
  0x24   : > { %3388 = vmatprep.subr.bf16.mxu0 %v3487_v25 }
  0x25   : > { %3355 = vmatpush3.bf16.msra.mxu1 %v3469_v19 }
  0x26   : > { %3063 = vmatmul.mubr.msk.bf16.vlgmr.msra.gmra.mrb[0].mxu0 %vm487_vm0, %v3468_v15  ;;  %3208 = vmatprep.subr.bf16.mxu1 %v3485_v22 }
  0x27   : > { %578 = vmatprep.mubr.bf16.mxu0 %v3709_v2  ;;  %3389 = vmatpush3.bf16.msra.mxu0 %v3487_v25 }
  0x28   : > { %3357 = vmatmul.mubr.msk.bf16.vlgmr.msra.gmra.mrb[0].mxu1 %vm487_vm0, %v3470_v20  ;;  %3390 = vmatprep.subr.bf16.mxu0 %v3492_v41 }
  0x29   : > { %3360 = vmatprep.mubr.msk.bf16.mxu1 %vm487_vm0, %v3471_v21  ;;  %3209 = vmatpush3.bf16.msra.mxu1 %v3486_v24 }
  0x2a   : > { %3210 = vmatprep.subr.bf16.mxu1 %v3488_v38  ;;  %v3508_v38 = vld [vmem:[%s5905_s3 + $0xb8] sm:$0xff]  }
  0x2b   : > { %3391 = vmatpush3.bf16.msra.mxu0 %v3492_v41 }
  0x2c   : > { %3392 = vmatprep.subr.bf16.mxu0 %v3497_v45 }
  0x2d   : > { %3211 = vmatpush3.bf16.msra.mxu1 %v3489_v39 }
  0x2e   : > { %3064 = vmatmul.mubr.msk.bf16.gmra.mrb[4].mxu0 %vm487_vm0, %v3470_v20  ;;  %3212 = vmatprep.subr.bf16.mxu1 %v3490_v40 }
  0x2f   : > { %588 = vmatprep.mubr.bf16.mxu0 %v3709_v2  ;;  %3393 = vmatpush3.bf16.msra.mxu0 %v3497_v45 }
  0x30   : > { %3361 = vmatmul.mubr.msk.bf16.gmra.mrb[4].mxu1 %vm487_vm0, %v3472_v23  ;;  %3394 = vmatprep.subr.bf16.mxu0 %v3502_v50 }
  0x31   : > { %3364 = vmatprep.mubr.msk.bf16.mxu1 %vm487_vm0, %v3473_v26  ;;  %3213 = vmatpush3.bf16.msra.mxu1 %v3491_v42 }
  0x32   : > { %3214 = vmatprep.subr.bf16.mxu1 %v3493_v43 }
  0x33   : > { %3395 = vmatpush3.bf16.msra.mxu0 %v3502_v50 }
  0x34   : > { %3396 = vmatprep.subr.bf16.mxu0 %v3503_v51 }
  0x35   : > { %3215 = vmatpush3.bf16.msra.mxu1 %v3494_v44 }
  0x36   : > { %3065 = vmatmul.mubr.msk.bf16.gmra.mrb[8].mxu0 %vm487_vm0, %v3471_v21  ;;  %3216 = vmatprep.subr.bf16.mxu1 %v3495_v46 }
  0x37   : > { %598 = vmatprep.mubr.bf16.mxu0 %v3709_v2  ;;  %3397 = vmatpush3.bf16.msra.mxu0 %v3503_v51 }
  0x38   : > { %3365 = vmatmul.mubr.msk.bf16.gmra.mrb[8].mxu1 %vm487_vm0, %v3474_v27  ;;  %3398 = vmatprep.subr.bf16.mxu0 %v3506_v54 }
  0x39   : > { %3368 = vmatprep.mubr.msk.bf16.mxu1 %vm487_vm0, %v3475_v28  ;;  %3217 = vmatpush3.bf16.msra.mxu1 %v3496_v47 }
  0x3a   : > { %3218 = vmatprep.subr.bf16.mxu1 %v3498_v48 }
  0x3b   : > { %3399 = vmatpush3.bf16.msra.mxu0 %v3506_v54 }
  0x3c   : > { %3400 = vmatprep.subr.bf16.mxu0 %v3507_v56 }
  0x3d   : > { %3219 = vmatpush3.bf16.msra.mxu1 %v3499_v49 }
  0x3e   : > { %3066 = vmatmul.mubr.msk.bf16.gmra.mrb[12].mxu0 %vm487_vm0, %v3472_v23  ;;  %3220 = vmatprep.subr.bf16.mxu1 %v3500_v52 }
  0x3f   : > { %608 = vmatprep.mubr.bf16.mxu0 %v3709_v2  ;;  %3401 = vmatpush3.bf16.msra.mxu0 %v3507_v56 }
  0x40   : > { %3369 = vmatmul.mubr.msk.bf16.gmra.mrb[12].mxu1 %vm487_vm0, %v3476_v29  ;;  %3402 = vmatprep.subr.bf16.mxu0 %v3508_v38 }
  0x41   : > { %3372 = vmatprep.mubr.msk.bf16.mxu1 %vm487_vm0, %v3477_v30  ;;  %3221 = vmatpush3.bf16.msra.mxu1 %v3501_v53 }
  0x42   : > { %3222 = vmatprep.subr.bf16.mxu1 %v3504_v55 }
  0x43   : > { %3403 = vmatpush3.bf16.msra.mxu0 %v3508_v38 }
  0x45   : > { %3223 = vmatpush3.bf16.msra.mxu1 %v3505_v57 }
  0x46   : > { %3067 = vmatmul.mubr.msk.bf16.gmra.mrb[16].mxu0 %vm487_vm0, %v3473_v26 }
  0x47   : > { %618 = vmatprep.mubr.bf16.mxu0 %v3709_v2 }
  0x48   : > { %3373 = vmatmul.mubr.msk.bf16.gmra.mrb[16].mxu1 %vm487_vm0, %v3478_v31 }
  0x49   : > { %3376 = vmatprep.mubr.msk.bf16.mxu1 %vm487_vm0, %v3479_v32 }
  0x4e   : > { %3068 = vmatmul.mubr.msk.bf16.gmra.mrb[20].mxu0 %vm487_vm0, %v3474_v27 }
  0x4f   : > { %628 = vmatprep.mubr.bf16.mxu0 %v3709_v2 }
  0x50   : > { %3377 = vmatmul.mubr.msk.bf16.gmra.mrb[20].mxu1 %vm487_vm0, %v3480_v33 }
  0x51   : > { %3380 = vmatprep.mubr.msk.bf16.mxu1 %vm487_vm0, %v3481_v34 }
  0x56   : > { %3069 = vmatmul.mubr.msk.bf16.gmra.mrb[24].mxu0 %vm487_vm0, %v3475_v28 }
  0x57   : > { %638 = vmatprep.mubr.bf16.mxu0 %v3709_v2 }
  0x58   : > { %3381 = vmatmul.mubr.msk.bf16.gmra.mrb[24].mxu1 %vm487_vm0, %v3482_v35 }
  0x59   : > { %3384 = vmatprep.mubr.msk.bf16.mxu1 %vm487_vm0, %v3483_v36 }
  0x5e   : > { %3070 = vmatmul.mubr.msk.bf16.gmra.mrb[28].mxu0 %vm487_vm0, %v3476_v29 }
  0x5f   : > { %648 = vmatprep.mubr.bf16.mxu0 %v3709_v2 }
  0x60   : > { %3385 = vmatmul.mubr.msk.bf16.gmra.mrb[28].mxu1 %vm487_vm0, %v3484_v37 }
  0x66   : > { %3071 = vmatmul.mubr.msk.bf16.gmra.mrb[32].mxu0 %vm487_vm0, %v3477_v30 }
  0x67   : > { %658 = vmatprep.mubr.bf16.mxu0 %v3709_v2 }
  0x6e   : > { %3072 = vmatmul.mubr.msk.bf16.gmra.mrb[36].mxu0 %vm487_vm0, %v3478_v31 }
  0x6f   : > { %668 = vmatprep.mubr.bf16.mxu0 %v3709_v2 }
  0x76   : > { %3073 = vmatmul.mubr.msk.bf16.gmra.mrb[40].mxu0 %vm487_vm0, %v3479_v32 }
  0x77   : > { %678 = vmatprep.mubr.bf16.mxu0 %v3709_v2 }
  0x7e   : > { %3074 = vmatmul.mubr.msk.bf16.gmra.mrb[44].mxu0 %vm487_vm0, %v3480_v33 }
  0x7f   : > { %688 = vmatprep.mubr.bf16.mxu0 %v3709_v2 }
  0x86   : > { %3075 = vmatmul.mubr.msk.bf16.gmra.mrb[48].mxu0 %vm487_vm0, %v3481_v34 }
  0x87   : > { %698 = vmatprep.mubr.bf16.mxu0 %v3709_v2 }
  0x8e   : > { %3076 = vmatmul.mubr.msk.bf16.gmra.mrb[52].mxu0 %vm487_vm0, %v3482_v35 }
  0x8f   : > { %708 = vmatprep.mubr.bf16.mxu0 %v3709_v2 }
  0x96   : > { %3077 = vmatmul.mubr.msk.bf16.gmra.mrb[56].mxu0 %vm487_vm0, %v3483_v36 }
  0x97   : > { %718 = vmatprep.mubr.bf16.mxu0 %v3709_v2  ;;  %v3950_v2 = vrot.slane %v294_v61, %v302_v62 }
  0x9e   : > { %3078 = vmatmul.mubr.msk.bf16.gmra.mrb[60].mxu0 %vm487_vm0, %v3484_v37 }
  0xf9   : > { %v570_v1 = vpop.f32.mrb[0].mxu0 }
  0xfa   : > { %v572_v4 = vpop.f32.mrb[1].mxu0  ;;  %v571_v6 = vadd.f32 %v570_v1, %v3948_v0 }
  0xfb   : > { %v574_v5 = vpop.f32.mrb[2].mxu0  ;;  %v3358_v9 = vpop.f32.mrb[0].mxu1  ;;  %v573_v10 = vadd.f32 %v572_v4, %v3950_v2 }
  0xfc   : > { %v575_v7 = vadd.f32 %v574_v5, %v3948_v0  ;;  %v576_v8 = vpop.f32.mrb[3].mxu0  ;;  %v772_v12 = vadd.f32 %v3358_v9, %v3952_v3  ;;  %v763_v13 = vpop.f32.mrb[1].mxu1 }
  0xfd   : > { %v577_v11 = vadd.f32 %v576_v8, %v3950_v2  ;;  %v764_v15 = vadd.f32 %v763_v13, %v3952_v3  ;;  %v3359_v16 = vpop.f32.mrb[2].mxu1 }
  0xfe   : > { %v3959_v14 = vpack.c.bf16 %v575_v7, %v571_v6  ;;  %v775_v18 = vadd.f32 %v3359_v16, %v3952_v3  ;;  %v766_v19 = vpop.f32.mrb[3].mxu1 }
  0xff   : > { %v3962_v17 = vpack.c.bf16 %v577_v11, %v573_v10  ;;  %v767_v21 = vadd.f32 %v766_v19, %v3952_v3 }
 0x100   : > { %6042 = vst [vmem:[#allocation2_spill] sm:$0xff] %v3959_v14  ;;  %v5917_v20 = vmul.bf16 1060454197, %v3959_v14  ;;  %v3967_v22 = vpack.c.bf16 %v775_v18, %v772_v12 }
 0x101   : > { %6043 = vst [vmem:[#allocation3_spill] sm:$0xff] %v3962_v17  ;;  %v580_v23 = vpop.f32.mrb[4].mxu0  ;;  %v3971_v25 = vpack.c.bf16 %v767_v21, %v764_v15  ;;  %v5914_v39 = vmul.bf16 1060454197, %v3962_v17 }
 0x102   : > { %v1034_v24 = vand.u32 2147450879, %v5917_v20  ;;  %v582_v26 = vpop.f32.mrb[5].mxu0  ;;  %v5915_v29 = vmul.bf16 1060454197, %v3967_v22  ;;  %v581_v36 = vadd.f32 %v580_v23, %v3948_v0 }
 0x103   : > { %6044 = vst [vmem:[#allocation4_spill] sm:$0xff] %v3971_v25  ;;  %v584_v27 = vpop.f32.mrb[6].mxu0  ;;  %v3362_v31 = vpop.f32.mrb[4].mxu1  ;;  %v5913_v46 = vmul.bf16 1060454197, %v3971_v25  ;;  %v583_v47 = vadd.f32 %v582_v26, %v3950_v2 }
 0x104   : > { %v1082_v28 = vmul.bf16 1051213480, %v1034_v24  ;;  %v586_v30 = vpop.f32.mrb[7].mxu0  ;;  %v1039_v33 = vand.u32 2147450879, %v5915_v29  ;;  %v585_v34 = vadd.f32 %v584_v27, %v3948_v0  ;;  %v3978_v37 = vpop.f32.mrb[5].mxu1  ;;  %v1706_v54 = vmul.bf16 %v1034_v24, %v1034_v24 }
 0x105   : > { %v3363_v41 = vpop.f32.mrb[6].mxu1  ;;  %v587_v48 = vadd.f32 %v586_v30, %v3950_v2  ;;  %v1035_v50 = vand.u32 2147450879, %v5914_v39  ;;  %v1036_v56 = vand.u32 2147450879, %v5913_v46  ;;  %v788_v16 = vadd.f32 %v3362_v31, %v3952_v3 }
 0x106   : > { %v1130_v32 = vadd.bf16 1065369472, %v1082_v28  ;;  %v1087_v35 = vmul.bf16 1051213480, %v1039_v33  ;;  %v3984_v43 = vpack.c.bf16 %v585_v34, %v581_v36  ;;  %v782_v45 = vpop.f32.mrb[7].mxu1  ;;  %v1754_v7 = vsub.bf16 0, %v1706_v54 }
 0x107   : > { %v3991_v51 = vpack.c.bf16 %v587_v48, %v583_v47  ;;  %v1083_v4 = vmul.bf16 1051213480, %v1035_v50  ;;  %v1707_v9 = vmul.bf16 %v1035_v50, %v1035_v50  ;;  %v1711_v13 = vmul.bf16 %v1039_v33, %v1039_v33 }
 0x108   : > { %3509 = vrcp.bf16 %v1130_v32  ;;  %v1135_v42 = vadd.bf16 1065369472, %v1087_v35  ;;  %6045 = vst [vmem:[#allocation5_spill] sm:$0xff] %v3984_v43  ;;  %v5912_v60 = vmul.bf16 1060454197, %v3984_v43  ;;  %v791_v18 = vadd.f32 %v3363_v41, %v3952_v3 }
 0x109   : > { %v590_v40 = vpop.f32.mrb[8].mxu0  ;;  %6046 = vst [vmem:[#allocation6_spill] sm:$0xff] %v3991_v51  ;;  %v1084_v15 = vmul.bf16 1051213480, %v1036_v56  ;;  %v1131_v24 = vadd.bf16 1065369472, %v1083_v4  ;;  %v1708_v35 = vmul.bf16 %v1036_v56, %v1036_v56  ;;  %v780_v54 = vadd.f32 %v3978_v37, %v3952_v3 }
 0x10a   : > { %v592_v44 = vpop.f32.mrb[9].mxu0  ;;  %3511 = vrcp.bf16 %v1135_v42  ;;  %v591_v57 = vadd.f32 %v590_v40, %v3948_v0  ;;  %v4025_v23 = vand.u32 2147450879, %v5912_v60  ;;  %v5911_v27 = vmul.bf16 1060454197, %v3991_v51 }
 0x10b   : > { %v594_v49 = vpop.f32.mrb[10].mxu0  ;;  %v3993_v53 = vpop.f32.mrb[8].mxu1  ;;  %v593_v61 = vadd.f32 %v592_v44, %v3950_v2  ;;  %v1803_v30 = vmul.bf16 1069105081, %v1754_v7  ;;  %v4030_v32 = vsub.bf16 0, %v1707_v9  ;;  %v1759_v33 = vsub.bf16 0, %v1711_v13 }
 0x10c   : > { %v596_v52 = vpop.f32.mrb[11].mxu0  ;;  %v3995_v55 = vpop.f32.mrb[9].mxu1  ;;  %v595_v58 = vadd.f32 %v594_v49, %v3948_v0  ;;  %v1132_v34 = vadd.bf16 1065369472, %v1084_v15  ;;  %v4032_v36 = vpack.c.bf16 %v791_v18, %v788_v16  ;;  %v1085_v44 = vmul.bf16 1051213480, %v4025_v23 }
 0x10d   : > { %v4001_v59 = vpop.f32.mrb[10].mxu1  ;;  %v597_v62 = vadd.f32 %v596_v52, %v3950_v2  ;;  %v1038_v47 = vand.u32 2147450879, %v5911_v27  ;;  %v783_v56 = vadd.f32 %v782_v45, %v3952_v3  ;;  %3513 = vrcp.bf16 %v1131_v24 }
 0x10e   : > { %v4006_v63 = vpop.f32.mrb[11].mxu1  ;;  %v4009_v5 = vpack.c.bf16 %v595_v58, %v591_v57  ;;  %6049 = vst [vmem:[#allocation9_spill] sm:$0xff] %v4032_v36  ;;  %v1818_v9 = vmul.bf16 1069105081, %v1759_v33  ;;  %3515 = vrcp.bf16 %v1132_v34  ;;  %v5910_v16 = vmul.bf16 1060454197, %v4032_v36 }
 0x10f   : > { %v4014_v10 = vpack.c.bf16 %v597_v62, %v593_v61  ;;  %v4050_v61 = vsub.bf16 0, %v1708_v35  ;;  %v1086_v13 = vmul.bf16 1051213480, %v1038_v47  ;;  %v4060_v18 = vpack.c.bf16 %v783_v56, %v780_v54 }
 0x110   : > { %6047 = vst [vmem:[#allocation7_spill] sm:$0xff] %v4009_v5  ;;  %v5908_v48 = vmul.bf16 1060454197, %v4009_v5  ;;  %3517 = vpow.bf16 %v1803_v30  ;;  %v1710_v54 = vmul.bf16 %v1038_v47, %v1038_v47  ;;  %v799_v5 = vadd.f32 %v4006_v63, %v3952_v3 }
 0x111   : > { %v4011_v6 = vpop.f32.mrb[12].mxu0  ;;  %6048 = vst [vmem:[#allocation8_spill] sm:$0xff] %v4014_v10  ;;  %v5909_v62 = vmul.bf16 1060454197, %v4014_v10  ;;  %6050 = vst [vmem:[#allocation10_spill] sm:$0xff] %v4060_v18  ;;  %3519 = vpow.bf16 %v1818_v9 }
 0x112   : > { %v4016_v11 = vpop.f32.mrb[13].mxu0  ;;  %v4055_v37 = vand.u32 2147450879, %v5908_v48  ;;  %v1134_v30 = vadd.bf16 1065369472, %v1086_v13  ;;  %v601_v13 = vadd.f32 %v4011_v6, %v3948_v0  ;;  %v4103_v60 = vsub.bf16 0, %v1710_v54 }
 0x113   : > { %v3510_v12 = vpop.eup %3509  ;;  %v604_v38 = vpop.f32.mrb[14].mxu0  ;;  %v4069_v33 = vand.u32 2147450879, %v5909_v62  ;;  %v603_v26 = vadd.f32 %v4016_v11, %v3950_v2 }
 0x114   : > { %v4020_v19 = vmul.bf16 1065369472, %v3510_v12  ;;  %v4034_v40 = vpop.f32.mrb[12].mxu1  ;;  %v606_v49 = vpop.f32.mrb[15].mxu0  ;;  %v1133_v12 = vadd.bf16 1065369472, %v1085_v44  ;;  %v1712_v11 = vmul.bf16 %v4055_v37, %v4055_v37 }
 0x115   : > { %v3512_v31 = vpop.eup %3511  ;;  %v1088_v48 = vmul.bf16 1051213480, %v4055_v37  ;;  %v1089_v47 = vmul.bf16 1051213480, %v4069_v33  ;;  %v607_v27 = vadd.f32 %v606_v49, %v3950_v2 }
 0x116   : > { %v1274_v28 = vmul.bf16 1065893768, %v4020_v19  ;;  %v4036_v42 = vmul.bf16 1065369472, %v3512_v31  ;;  %3521 = vrcp.bf16 %v1133_v12  ;;  %v5916_v12 = vmul.bf16 1060454197, %v4060_v18 }
 0x117   : > { %3523 = vrcp.bf16 %v1134_v30  ;;  %v4124_v46 = vpack.c.bf16 %v607_v27, %v603_v26 }
 0x118   : > { %v1322_v41 = vadd.bf16 3216687034, %v1274_v28  ;;  %v1279_v52 = vmul.bf16 1065893768, %v4036_v42  ;;  %v4064_v28 = vpop.f32.mrb[13].mxu1  ;;  %v3514_v21 = vpop.eup %3513 }
 0x119   : > { %v4047_v57 = vpop.f32.mrb[16].mxu0  ;;  %v4073_v35 = vpop.f32.mrb[14].mxu1  ;;  %6052 = vst [vmem:[#allocation12_spill] sm:$0xff] %v4124_v46  ;;  %v4131_v29 = vmul.bf16 1065369472, %v3514_v21  ;;  %v4144_v21 = vsub.bf16 0, %v1712_v11 }
 0x11a   : > { %v1370_v50 = vmul.bf16 %v1322_v41, %v4020_v19  ;;  %v1327_v7 = vadd.bf16 3216687034, %v1279_v52  ;;  %v4062_v24 = vpop.f32.mrb[17].mxu0  ;;  %v611_v63 = vadd.f32 %v4047_v57, %v3948_v0 }
 0x11b   : > { %v4071_v34 = vpop.f32.mrb[18].mxu0  ;;  %6053 = vst [vmem:[#allocation13_spill] sm:$0xff] %v4131_v29  ;;  %v613_v57 = vadd.f32 %v4062_v24, %v3950_v2 }
 0x11c   : > { %v1418_v4 = vadd.bf16 1068908470, %v1370_v50  ;;  %v1375_v15 = vmul.bf16 %v1327_v7, %v4036_v42  ;;  %v1709_v50 = vmul.bf16 %v4025_v23, %v4025_v23  ;;  %v4078_v56 = vpop.f32.mrb[19].mxu0  ;;  %v4089_v23 = vpop.f32.mrb[15].mxu1  ;;  %v615_v18 = vadd.f32 %v4071_v34, %v3948_v0 }
 0x11e   : > { %v1466_v45 = vmul.bf16 %v1418_v4, %v4020_v19  ;;  %v1423_v44 = vadd.bf16 1068908470, %v1375_v15  ;;  %v605_v15 = vadd.f32 %v604_v38, %v3948_v0  ;;  %v4100_v31 = vsub.bf16 0, %v1709_v50 }
 0x11f   : > { %v1136_v50 = vadd.bf16 1065369472, %v1088_v48 }
 0x120   : > { %v1514_v41 = vadd.bf16 3197288082, %v1466_v45  ;;  %v1471_v7 = vmul.bf16 %v1423_v44, %v4036_v42  ;;  %v4085_v45 = vand.u32 2147450879, %v5910_v16  ;;  %v4098_v44 = vpop.f32.mrb[16].mxu1  ;;  %v4108_v6 = vpack.c.bf16 %v605_v15, %v601_v13 }
 0x121   : > { %v4087_v9 = vpop.f32.mrb[20].mxu0  ;;  %v4112_v8 = vpop.f32.mrb[17].mxu1  ;;  %v1137_v13 = vadd.bf16 1065369472, %v1089_v47  ;;  %v1713_v15 = vmul.bf16 %v4069_v33, %v4069_v33  ;;  %v4136_v47 = vand.u32 2147450879, %v5916_v12  ;;  %3525 = vrcp.bf16 %v1136_v50 }
 0x122   : > { %v1562_v4 = vmul.bf16 %v1514_v41, %v4020_v19  ;;  %v4096_v41 = vpop.f32.mrb[21].mxu0  ;;  %v1519_v16 = vadd.bf16 3197288082, %v1471_v7  ;;  %6051 = vst [vmem:[#allocation11_spill] sm:$0xff] %v4108_v6  ;;  %v1093_v49 = vmul.bf16 1051213480, %v4085_v45  ;;  %v1717_v39 = vmul.bf16 %v4085_v45, %v4085_v45 }
 0x123   : > { %v4110_v38 = vpop.f32.mrb[22].mxu0  ;;  %v4118_v7 = vpop.f32.mrb[18].mxu1  ;;  %3527 = vrcp.bf16 %v1137_v13  ;;  %v4146_v52 = vsub.bf16 0, %v1713_v15  ;;  %v1090_v13 = vmul.bf16 1051213480, %v4136_v47  ;;  %v804_v45 = vadd.f32 %v3993_v53, %v3952_v3 }
 0x124   : > { %v1610_v62 = vadd.bf16 1048723074, %v1562_v4  ;;  %v1567_v4 = vmul.bf16 %v1519_v16, %v4036_v42  ;;  %v4116_v54 = vpop.f32.mrb[23].mxu0  ;;  %v4126_v1 = vpop.f32.mrb[19].mxu1  ;;  %v1141_v27 = vadd.bf16 1065369472, %v1093_v49  ;;  %v807_v53 = vadd.f32 %v4001_v59, %v3952_v3 }
 0x125   : > { %v3516_v16 = vpop.eup %3515  ;;  %v1138_v36 = vadd.bf16 1065369472, %v1090_v13  ;;  %v6059_v59 = vmul.bf16 1060454197, %v4124_v46 }
 0x126   : > { %v1658_v48 = vmul.bf16 %v1610_v62, %v4020_v19  ;;  %v1615_v30 = vadd.bf16 1048723074, %v1567_v4  ;;  %v3518_v26 = vpop.eup %3517  ;;  %v4141_v19 = vpop.f32.mrb[20].mxu1  ;;  %v4151_v49 = vmul.bf16 1065369472, %v3516_v16  ;;  %3529 = vrcp.bf16 %v1141_v27 }
 0x127   : > { %v3520_v62 = vpop.eup %3519  ;;  %v4157_v33 = vpop.f32.mrb[21].mxu1  ;;  %v796_v27 = vadd.f32 %v3995_v55, %v3952_v3  ;;  %3531 = vrcp.bf16 %v1138_v36 }
 0x128   : > { %v3522_v37 = vpop.eup %3521  ;;  %v4148_v12 = vmul.bf16 %v3518_v26, %v1658_v48  ;;  %v1663_v50 = vmul.bf16 %v1615_v30, %v4036_v42  ;;  %6054 = vst [vmem:[#allocation14_spill] sm:$0xff] %v4151_v49  ;;  %v4163_v4 = vpop.f32.mrb[22].mxu1  ;;  %v6055_v42 = vmul.bf16 1060454197, %v4108_v6  ;;  %v4185_v48 = vsub.bf16 0, %v1717_v39 }
 0x129   : > { %v4139_v58 = vpop.f32.mrb[24].mxu0  ;;  %v4174_v26 = vpop.f32.mrb[23].mxu1  ;;  %v4176_v11 = vmul.bf16 1065369472, %v3522_v37  ;;  %v1714_v39 = vmul.bf16 %v4136_v47, %v4136_v47  ;;  %v4211_v43 = vpack.c.bf16 %v799_v5, %v796_v27  ;;  %v617_v47 = vadd.f32 %v4078_v56, %v3950_v2 }
 0x12a   : > { %v4155_v20 = vpop.f32.mrb[25].mxu0  ;;  %v4167_v16 = vand.u32 2147450879, %v6055_v42  ;;  %v1994_v42 = vsub.bf16 1065369472, %v4148_v12  ;;  %v4183_v10 = vmul.bf16 %v3520_v62, %v1663_v50  ;;  %v3524_v37 = vpop.eup %3523  ;;  %v4203_v50 = vpack.c.bf16 %v807_v53, %v804_v45 }
 0x12b   : > { %v4161_v15 = vpop.f32.mrb[26].mxu0  ;;  %6056 = vst [vmem:[#allocation15_spill] sm:$0xff] %v4176_v11  ;;  %v4189_v51 = vpop.f32.mrb[24].mxu1  ;;  %v1044_v62 = vand.u32 2147450879, %v6059_v59  ;;  %6062 = vst [vmem:[#allocation20_spill] sm:$0xff] %v4211_v43  ;;  %v4242_v24 = vpack.c.bf16 %v617_v47, %v613_v57 }
 0x12c   : > { %v4172_v30 = vpop.f32.mrb[27].mxu0  ;;  %6057 = vst [vmem:[#allocation16_spill] sm:$0xff] %v4189_v51  ;;  %v4196_v55 = vpop.f32.mrb[25].mxu1  ;;  %v1091_v12 = vmul.bf16 1051213480, %v4167_v16  ;;  %6060 = vst [vmem:[#allocation18_spill] sm:$0xff] %v4203_v50 }
 0x12d   : > { %6058 = vst [vmem:[#allocation17_spill] sm:$0xff] %v4196_v55  ;;  %v4207_v13 = vpop.f32.mrb[26].mxu1  ;;  %v6064_v45 = vmul.bf16 1060454197, %v3959_v14  ;;  %v1999_v5 = vsub.bf16 1065369472, %v4183_v10  ;;  %v3526_v56 = vpop.eup %3525  ;;  %v4238_v14 = vpack.c.bf16 %v615_v18, %v611_v63  ;;  %v1716_v29 = vmul.bf16 %v1044_v62, %v1044_v62 }
 0x12e   : > { %6061 = vst [vmem:[#allocation19_spill] sm:$0xff] %v4207_v13  ;;  %v4219_v59 = vpop.f32.mrb[27].mxu1  ;;  %v2090_v13 = vsub.bf16 0, %v1994_v42  ;;  %v4234_v55 = vmul.bf16 1065369472, %v3524_v37  ;;  %v3528_v51 = vpop.eup %3527  ;;  %6070 = vst [vmem:[#allocation25_spill] sm:$0xff] %v4242_v24 }
 0x12f   : > { %6063 = vst [vmem:[#allocation21_spill] sm:$0xff] %v4219_v59  ;;  %vm4223_vm1 = vcmp.lt.bf16.partialorder %v6064_v45, 0  ;;  %v1715_v45 = vmul.bf16 %v4167_v16, %v4167_v16  ;;  %6069 = vst [vmem:[#allocation24_spill] sm:$0xff] %v4238_v14  ;;  %v1139_v10 = vadd.bf16 1065369472, %v1091_v12  ;;  %v4249_v37 = vsub.bf16 0, %v1714_v39 }
 0x130   : > { %v1092_v49 = vmul.bf16 1051213480, %v1044_v62  ;;  %v4256_v12 = vsel %vm4223_vm1, %v2090_v13, %v1994_v42  ;;  %v2095_v62 = vsub.bf16 0, %v1999_v5  ;;  %v4258_v63 = vmul.bf16 1065369472, %v3526_v56 }
 0x131   : > { %v4194_v11 = vpop.f32.mrb[28].mxu0  ;;  %v3530_v57 = vpop.eup %3529  ;;  %v6074_v39 = vmul.bf16 1069105081, %v4050_v61  ;;  %v4270_v42 = vsub.bf16 0, %v1715_v45  ;;  %v4272_v53 = vsub.bf16 0, %v1716_v29 }
 0x132   : > { %v4205_v25 = vpop.f32.mrb[29].mxu0  ;;  %6072 = vst [vmem:[#allocation26_spill] sm:$0xff] %v4258_v63  ;;  %v1140_v13 = vadd.bf16 1065369472, %v1092_v49  ;;  %v6078_v49 = vmul.bf16 1060454197, %v4203_v50  ;;  %v3532_v47 = vpop.eup %3531 }
 0x133   : > { %v4217_v17 = vpop.f32.mrb[30].mxu0  ;;  %v4232_v27 = vpop.f32.mrb[28].mxu1  ;;  %v6079_v18 = vmul.bf16 1069105081, %v4103_v60  ;;  %v6082_v60 = vmul.bf16 1060454197, %v4242_v24 }
 0x134   : > { %v4230_v34 = vpop.f32.mrb[31].mxu0  ;;  %6068 = vst [vmem:[#allocation23_spill] sm:$0xff] %v4232_v27  ;;  %v4240_v59 = vpop.f32.mrb[29].mxu1  ;;  %v6071_v27 = vmul.bf16 1069105081, %v4030_v32 }
 0x135   : > { %6067 = vst [vmem:[#allocation22_spill] sm:$0xff] %v4230_v34  ;;  %v4244_v34 = vpop.f32.mrb[30].mxu1  ;;  %v6073_v32 = vmul.bf16 1060454197, %v3967_v22  ;;  %v1051_v29 = vand.u32 2147450879, %v6078_v49 }
 0x136   : > { %3533 = vpow.bf16 %v6071_v27  ;;  %v4252_v16 = vpop.f32.mrb[31].mxu1  ;;  %v4265_v27 = vmul.bf16 1065369472, %v3528_v51  ;;  %v820_v51 = vadd.f32 %v4034_v40, %v3952_v3  ;;  %v823_v40 = vadd.f32 %v4073_v35, %v3952_v3 }
 0x137   : > { %vm2047_vm2 = vcmp.lt.bf16.partialorder %v6073_v32, 0  ;;  %3535 = vpow.bf16 %v6074_v39  ;;  %v5942_v32 = vmul.bf16 1060454197, %v4211_v43  ;;  %v6076_v39 = vmul.bf16 1069105081, %v4100_v31 }
 0x138   : > { %6075 = vst [vmem:[#allocation27_spill] sm:$0xff] %v4265_v27  ;;  %3537 = vrcp.bf16 %v1139_v10  ;;  %v4279_v61 = vsel %vm2047_vm2, %v2095_v62, %v1999_v5  ;;  %v4283_v10 = vmul.bf16 1065369472, %v3530_v57  ;;  %v1830_v31 = vmul.bf16 1069105081, %v4270_v42 }
 0x139   : > { %v4268_v36 = vpop.f32.mrb[32].mxu0  ;;  %3539 = vpow.bf16 %v6076_v39  ;;  %v812_v57 = vadd.f32 %v4064_v28, %v3952_v3  ;;  %v1048_v49 = vand.u32 2147450879, %v5942_v32  ;;  %v4307_v35 = vpack.c.bf16 %v823_v40, %v820_v51 }
 0x13a   : > { %6077 = vst [vmem:[#allocation28_spill] sm:$0xff] %v4283_v10  ;;  %v4287_v45 = vpop.f32.mrb[33].mxu0  ;;  %3541 = vpow.bf16 %v6079_v18  ;;  %v1099_v56 = vmul.bf16 1051213480, %v1051_v29  ;;  %v1723_v42 = vmul.bf16 %v1051_v29, %v1051_v29  ;;  %v815_v62 = vadd.f32 %v4089_v23, %v3952_v3 }
 0x13b   : > { %v4295_v5 = vpop.f32.mrb[34].mxu0  ;;  %3543 = vrcp.bf16 %v1140_v13  ;;  %6080 = vst [vmem:[#allocation29_spill] sm:$0xff] %v4307_v35  ;;  %v6081_v28 = vmul.bf16 1060454197, %v4238_v14  ;;  %v4316_v46 = vand.u32 2147450879, %v6082_v60  ;;  %v621_v18 = vadd.f32 %v4087_v9, %v3948_v0 }
 0x13c   : > { %v4301_v39 = vpop.f32.mrb[35].mxu0  ;;  %v625_v51 = vadd.f32 %v4110_v38, %v3948_v0  ;;  %v623_v23 = vadd.f32 %v4096_v41, %v3950_v2  ;;  %v627_v60 = vadd.f32 %v4116_v54, %v3950_v2  ;;  %v6085_v9 = vmul.bf16 1069105081, %v4144_v21 }
 0x13d   : > { %v1046_v6 = vand.u32 2147450879, %v6081_v28  ;;  %v4329_v28 = vpack.c.bf16 %v815_v62, %v812_v57  ;;  %v4337_v38 = vmul.bf16 1065369472, %v3532_v47  ;;  %v1096_v50 = vmul.bf16 1051213480, %v1048_v49 }
 0x13e   : > { %3545 = vpow.bf16 %v6085_v9  ;;  %v4339_v43 = vpack.c.bf16 %v625_v51, %v621_v18  ;;  %v4345_v41 = vsub.bf16 0, %v1723_v42  ;;  %v1720_v62 = vmul.bf16 %v1048_v49, %v1048_v49 }
 0x13f   : > { %6083 = vst [vmem:[#allocation30_spill] sm:$0xff] %v4329_v28  ;;  %6086 = vst [vmem:[#allocation32_spill] sm:$0xff] %v4337_v38  ;;  %v6088_v57 = vmul.bf16 1060454197, %v4307_v35  ;;  %v4351_v63 = vpack.c.bf16 %v627_v60, %v623_v23  ;;  %v6090_v9 = vmul.bf16 1069105081, %v4146_v52 }
 0x140   : > { %6087 = vst [vmem:[#allocation33_spill] sm:$0xff] %v4339_v43  ;;  %v1094_v51 = vmul.bf16 1051213480, %v1046_v6  ;;  %v6091_v42 = vmul.bf16 1069105081, %v4185_v48 }
 0x141   : > { %v4322_v40 = vpop.f32.mrb[36].mxu0  ;;  %v4324_v29 = vpop.eup %3533  ;;  %v4349_v54 = vand.u32 2147450879, %v6088_v57  ;;  %6089 = vst [vmem:[#allocation34_spill] sm:$0xff] %v4351_v63  ;;  %3547 = vpow.bf16 %v6090_v9  ;;  %v1147_v49 = vadd.bf16 1065369472, %v1099_v56 }
 0x142   : > { %v4333_v32 = vpop.f32.mrb[37].mxu0  ;;  %v4343_v13 = vpop.eup %3535  ;;  %3549 = vpow.bf16 %v6091_v42  ;;  %v1095_v57 = vmul.bf16 1051213480, %v4316_v46  ;;  %v1144_v27 = vadd.bf16 1065369472, %v1096_v50  ;;  %v4374_v42 = vsub.bf16 0, %v1720_v62 }
 0x143   : > { %6084 = vst [vmem:[#allocation31_spill] sm:$0xff] %v4333_v32  ;;  %v4341_v10 = vpop.f32.mrb[38].mxu0  ;;  %v3538_v47 = vpop.eup %3537  ;;  %v1718_v32 = vmul.bf16 %v1046_v6, %v1046_v6  ;;  %v1105_v9 = vmul.bf16 1051213480, %v4349_v54  ;;  %v6092_v38 = vmul.bf16 1069105081, %v4249_v37 }
 0x144   : > { %v4353_v21 = vpop.f32.mrb[39].mxu0  ;;  %v4363_v60 = vpop.eup %3539  ;;  %v4371_v48 = vmul.bf16 1065369472, %v3538_v47  ;;  %v1142_v14 = vadd.bf16 1065369472, %v1094_v51 }
 0x145   : > { %v4367_v18 = vpop.eup %3541  ;;  %3551 = vpow.bf16 %v6092_v38  ;;  %v6094_v6 = vmul.bf16 1060454197, %v4329_v28  ;;  %v1143_v24 = vadd.bf16 1065369472, %v1095_v57  ;;  %v6095_v37 = vmul.bf16 1060454197, %v4339_v43 }
 0x146   : > { %6093 = vst [vmem:[#allocation35_spill] sm:$0xff] %v4371_v48  ;;  %v3544_v23 = vpop.eup %3543  ;;  %3553 = vpow.bf16 %v1830_v31  ;;  %v4387_v62 = vsub.bf16 0, %v1718_v32  ;;  %v1719_v31 = vmul.bf16 %v4316_v46, %v4316_v46  ;;  %v1153_v51 = vadd.bf16 1065369472, %v1105_v9 }
 0x147   : > { %v4378_v50 = vand.u32 2147450879, %v6094_v6  ;;  %3555 = vrcp.bf16 %v1147_v49  ;;  %v4383_v38 = vand.u32 2147450879, %v6095_v37  ;;  %v4393_v6 = vmul.bf16 1065369472, %v3544_v23 }
 0x148   : > { %3557 = vrcp.bf16 %v1144_v27  ;;  %v6097_v49 = vmul.bf16 1069105081, %v4272_v53  ;;  %v836_v37 = vadd.f32 %v4098_v44, %v3952_v3  ;;  %v6098_v46 = vmul.bf16 1060454197, %v4351_v63 }
 0x149   : > { %v4385_v47 = vpop.f32.mrb[40].mxu0  ;;  %6096 = vst [vmem:[#allocation36_spill] sm:$0xff] %v4393_v6  ;;  %v1102_v27 = vmul.bf16 1051213480, %v4378_v50  ;;  %v4407_v23 = vpop.eup %3545  ;;  %v1097_v53 = vmul.bf16 1051213480, %v4383_v38  ;;  %v839_v44 = vadd.f32 %v4118_v7, %v3952_v3  ;;  %v635_v7 = vadd.f32 %v4161_v15, %v3948_v0 }
 0x14a   : > { %v4391_v56 = vpop.f32.mrb[41].mxu0  ;;  %3559 = vpow.bf16 %v6097_v49  ;;  %v1050_v32 = vand.u32 2147450879, %v6098_v46  ;;  %6099 = vst [vmem:[#allocation37_spill] sm:$0xff] %v4407_v23  ;;  %v828_v49 = vadd.f32 %v4112_v8, %v3952_v3  ;;  %v4415_v57 = vsub.bf16 0, %v1719_v31 }
 0x14b   : > { %v4400_v52 = vpop.f32.mrb[42].mxu0  ;;  %3561 = vrcp.bf16 %v1142_v14  ;;  %v1839_v14 = vmul.bf16 1069105081, %v4387_v62  ;;  %v1729_v46 = vmul.bf16 %v4349_v54, %v4349_v54  ;;  %v4423_v6 = vpack.c.bf16 %v839_v44, %v836_v37 }
 0x14c   : > { %v4405_v9 = vpop.f32.mrb[43].mxu0  ;;  %3563 = vrcp.bf16 %v1143_v24  ;;  %v4419_v48 = vpop.eup %3547  ;;  %v631_v24 = vadd.f32 %v4139_v58, %v3948_v0  ;;  %v831_v8 = vadd.f32 %v4126_v1, %v3952_v3  ;;  %v1150_v31 = vadd.bf16 1065369472, %v1102_v27 }
 0x14d   : > { %3565 = vrcp.bf16 %v1153_v51  ;;  %6100 = vst [vmem:[#allocation38_spill] sm:$0xff] %v4419_v48  ;;  %6101 = vst [vmem:[#allocation39_spill] sm:$0xff] %v4423_v6  ;;  %v4429_v62 = vpop.eup %3549  ;;  %v1098_v51 = vmul.bf16 1051213480, %v1050_v32  ;;  %v633_v54 = vadd.f32 %v4155_v20, %v3950_v2  ;;  %v637_v23 = vadd.f32 %v4172_v30, %v3950_v2 }
 0x14e   : > { %6102 = vst [vmem:[#allocation40_spill] sm:$0xff] %v4429_v62  ;;  %v1145_v58 = vadd.bf16 1065369472, %v1097_v53  ;;  %v5959_v37 = vmul.bf16 1060454197, %v4423_v6  ;;  %v4438_v44 = vpack.c.bf16 %v831_v8, %v828_v49  ;;  %v4440_v1 = vpack.c.bf16 %v635_v7, %v631_v24 }
 0x14f   : > { %v1726_v20 = vmul.bf16 %v4378_v50, %v4378_v50  ;;  %v1721_v30 = vmul.bf16 %v4383_v38, %v4383_v38  ;;  %v1722_v24 = vmul.bf16 %v1050_v32, %v1050_v32  ;;  %v852_v7 = vadd.f32 %v4141_v19, %v3952_v3 }
 0x150   : > { %6104 = vst [vmem:[#allocation42_spill] sm:$0xff] %v4438_v44  ;;  %6105 = vst [vmem:[#allocation43_spill] sm:$0xff] %v4440_v1  ;;  %v4444_v62 = vpop.eup %3551  ;;  %v4459_v8 = vand.u32 2147450879, %v5959_v37  ;;  %v855_v50 = vadd.f32 %v4163_v4, %v3952_v3  ;;  %3567 = vrcp.bf16 %v1150_v31  ;;  %v5962_v35 = vmul.bf16 1060454197, %v4438_v44 }
 0x151   : > { %v4435_v48 = vpop.f32.mrb[44].mxu0  ;;  %v4455_v49 = vpop.eup %3553  ;;  %3569 = vrcp.bf16 %v1145_v58  ;;  %v6111_v4 = vmul.bf16 1069105081, %v4345_v41  ;;  %v4487_v37 = vsub.bf16 0, %v1722_v24 }
 0x152   : > { %6103 = vst [vmem:[#allocation41_spill] sm:$0xff] %v4435_v48  ;;  %v4442_v15 = vpop.f32.mrb[45].mxu0  ;;  %v4451_v48 = vpack.c.bf16 %v637_v23, %v633_v54  ;;  %6108 = vst [vmem:[#allocation46_spill] sm:$0xff] %v4455_v49  ;;  %v3556_v38 = vpop.eup %3555  ;;  %v1842_v23 = vmul.bf16 1069105081, %v4415_v57  ;;  %v4469_v49 = vsub.bf16 0, %v1729_v46  ;;  %v4489_v28 = vpack.c.bf16 %v855_v50, %v852_v7 }
 0x153   : > { %6106 = vst [vmem:[#allocation44_spill] sm:$0xff] %v4442_v15  ;;  %v4453_v53 = vpop.f32.mrb[46].mxu0  ;;  %v1146_v54 = vadd.bf16 1065369472, %v1098_v51  ;;  %v3558_v32 = vpop.eup %3557  ;;  %v1111_v19 = vmul.bf16 1051213480, %v4459_v8  ;;  %3571 = vpow.bf16 %v6111_v4 }
 0x154   : > { %6107 = vst [vmem:[#allocation45_spill] sm:$0xff] %v4451_v48  ;;  %v4465_v27 = vpop.f32.mrb[47].mxu0  ;;  %v4482_v31 = vand.u32 2147450879, %v5962_v35  ;;  %v4484_v51 = vsub.bf16 0, %v1721_v30  ;;  %6112 = vst [vmem:[#allocation49_spill] sm:$0xff] %v4489_v28 }
 0x155   : > { %6109 = vst [vmem:[#allocation47_spill] sm:$0xff] %v4465_v27  ;;  %v4473_v15 = vpop.eup %3559  ;;  %v4477_v27 = vsub.bf16 0, %v1726_v20  ;;  %v4491_v41 = vmul.bf16 1065369472, %v3556_v38  ;;  %v4493_v20 = vmul.bf16 1065369472, %v3558_v32  ;;  %3573 = vrcp.bf16 %v1146_v54 }
 0x156   : > { %6110 = vst [vmem:[#allocation48_spill] sm:$0xff] %v4473_v15  ;;  %v3562_v46 = vpop.eup %3561  ;;  %v5965_v4 = vmul.bf16 1060454197, %v4440_v1  ;;  %v6113_v35 = vmul.bf16 1069105081, %v4374_v42  ;;  %v844_v32 = vadd.f32 %v4157_v33, %v3952_v3  ;;  %v847_v33 = vadd.f32 %v4174_v26, %v3952_v3 }
 0x157   : > { %v3564_v15 = vpop.eup %3563  ;;  %v1872_v30 = vmul.bf16 1069105081, %v4469_v49  ;;  %v1159_v43 = vadd.bf16 1065369472, %v1111_v19  ;;  %v1108_v24 = vmul.bf16 1051213480, %v4482_v31 }
 0x158   : > { %v3566_v57 = vpop.eup %3565  ;;  %3575 = vpow.bf16 %v6113_v35  ;;  %v4500_v58 = vmul.bf16 1065369472, %v3562_v46  ;;  %v1863_v7 = vmul.bf16 1069105081, %v4477_v27  ;;  %v5966_v50 = vmul.bf16 1060454197, %v4451_v48 }
 0x159   : > { %3577 = vpow.bf16 %v1839_v14  ;;  %v4504_v38 = vmul.bf16 1065369472, %v3564_v15  ;;  %v1848_v54 = vmul.bf16 1069105081, %v4484_v51  ;;  %v1851_v42 = vmul.bf16 1069105081, %v4487_v37 }
 0x15a   : > { %6114 = vst [vmem:[#allocation50_spill] sm:$0xff] %v4500_v58  ;;  %3579 = vpow.bf16 %v1842_v23  ;;  %v1052_v49 = vand.u32 2147450879, %v5965_v4  ;;  %v5975_v14 = vmul.bf16 1060454197, %v4489_v28  ;;  %v1735_v15 = vmul.bf16 %v4459_v8, %v4459_v8 }
 0x15b   : > { %3581 = vrcp.bf16 %v1159_v43  ;;  %v1156_v27 = vadd.bf16 1065369472, %v1108_v24  ;;  %v641_v23 = vadd.f32 %v4194_v11, %v3948_v0  ;;  %v1053_v46 = vand.u32 2147450879, %v5966_v50  ;;  %v3568_v51 = vpop.eup %3567  ;;  %v4532_v24 = vpop.f32.mrb[48].mxu0 }
 0x15c   : > { %v4524_v4 = vmul.bf16 1065369472, %v3566_v57  ;;  %v1732_v43 = vmul.bf16 %v4482_v31, %v4482_v31  ;;  %v643_v8 = vadd.f32 %v4205_v25, %v3950_v2  ;;  %v645_v11 = vadd.f32 %v4217_v17, %v3948_v0  ;;  %6116 = vst [vmem:[#allocation52_spill] sm:$0xff] %v4532_v24  ;;  %v3570_v19 = vpop.eup %3569  ;;  %v6118_v57 = vld [vmem:[#allocation22_spill] sm:$0xff]  ;;  %v4540_v1 = vpop.f32.mrb[49].mxu0 }
 0x15d   : > { %v1100_v35 = vmul.bf16 1051213480, %v1052_v49  ;;  %v1069_v50 = vand.u32 2147450879, %v5975_v14  ;;  %v4536_v26 = vpack.c.bf16 %v847_v33, %v844_v32  ;;  %v647_v37 = vadd.f32 %v6118_v57, %v3950_v2  ;;  %6119 = vst [vmem:[#allocation22_spill] sm:$0xff] %v4540_v1  ;;  %v6124_v1 = vld [vmem:[#allocation13_spill] sm:$0xff] }
 0x15e   : > { %6115 = vst [vmem:[#allocation51_spill] sm:$0xff] %v4524_v4  ;;  %v4542_v31 = vpop.eup %3571  ;;  %v1783_v25 = vsub.bf16 0, %v1735_v15  ;;  %3583 = vrcp.bf16 %v1156_v27  ;;  %v1724_v6 = vmul.bf16 %v1052_v49, %v1052_v49  ;;  %v4544_v17 = vpack.c.bf16 %v645_v11, %v641_v23 }
 0x15f   : > { %6117 = vst [vmem:[#allocation53_spill] sm:$0xff] %v4536_v26  ;;  %6120 = vst [vmem:[#allocation54_spill] sm:$0xff] %v4542_v31  ;;  %v4546_v44 = vmul.bf16 1065369472, %v3568_v51  ;;  %v1725_v24 = vmul.bf16 %v1053_v46, %v1053_v46  ;;  %v4549_v14 = vpack.c.bf16 %v647_v37, %v643_v8  ;;  %v4551_v33 = vmul.bf16 1065369472, %v3570_v19 }
 0x160   : > { %6121 = vst [vmem:[#allocation55_spill] sm:$0xff] %v4544_v17  ;;  %v3574_v32 = vpop.eup %3573  ;;  %v1101_v57 = vmul.bf16 1051213480, %v1053_v46  ;;  %v1741_v4 = vmul.bf16 %v1069_v50, %v1069_v50  ;;  %v1275_v58 = vmul.bf16 1065893768, %v6124_v1  ;;  %3585 = vpow.bf16 %v1872_v30 }
 0x161   : > { %6122 = vst [vmem:[#allocation56_spill] sm:$0xff] %v4549_v14  ;;  %6123 = vst [vmem:[#allocation57_spill] sm:$0xff] %v4551_v33  ;;  %v4556_v49 = vsub.bf16 0, %v1732_v43  ;;  %v1148_v15 = vadd.bf16 1065369472, %v1100_v35  ;;  %3587 = vpow.bf16 %v1863_v7  ;;  %v4560_v37 = vsub.bf16 0, %v1724_v6 }
 0x162   : > { %v1117_v27 = vmul.bf16 1051213480, %v1069_v50  ;;  %v1890_v51 = vmul.bf16 1069105081, %v1783_v25  ;;  %v5978_v19 = vmul.bf16 1060454197, %v4536_v26  ;;  %3589 = vpow.bf16 %v1848_v54 }
 0x163   : > { %v4554_v31 = vpop.eup %3575  ;;  %v4565_v46 = vmul.bf16 1065369472, %v3574_v32  ;;  %v4567_v11 = vsub.bf16 0, %v1725_v24  ;;  %v4570_v43 = vpop.f32.mrb[50].mxu0  ;;  %3591 = vpow.bf16 %v1851_v42  ;;  %v1149_v50 = vadd.bf16 1065369472, %v1101_v57 }
 0x164   : > { %v4558_v23 = vpop.eup %3577  ;;  %6128 = vst [vmem:[#allocation60_spill] sm:$0xff] %v4570_v43  ;;  %v4572_v35 = vsub.bf16 0, %v1741_v4  ;;  %v1323_v7 = vadd.bf16 3216687034, %v1275_v58  ;;  %v4574_v6 = vpop.f32.mrb[51].mxu0  ;;  %3593 = vrcp.bf16 %v1148_v15  ;;  %v6131_v4 = vld [vmem:[#allocation14_spill] sm:$0xff] }
 0x165   : > { %6125 = vst [vmem:[#allocation13_spill] sm:$0xff] %v4558_v23  ;;  %v4563_v8 = vpop.eup %3579  ;;  %6127 = vst [vmem:[#allocation59_spill] sm:$0xff] %v4565_v46  ;;  %v1881_v63 = vmul.bf16 1069105081, %v4556_v49  ;;  %v1165_v54 = vadd.bf16 1065369472, %v1117_v27  ;;  %3595 = vpow.bf16 %v1890_v51 }
 0x166   : > { %6126 = vst [vmem:[#allocation58_spill] sm:$0xff] %v4563_v8  ;;  %6129 = vst [vmem:[#allocation61_spill] sm:$0xff] %v4574_v6  ;;  %v3582_v25 = vpop.eup %3581  ;;  %v5987_v32 = vmul.bf16 1060454197, %v4544_v17  ;;  %v1066_v30 = vand.u32 2147450879, %v5978_v19  ;;  %v1371_v49 = vmul.bf16 %v1323_v7, %v6124_v1  ;;  %3597 = vrcp.bf16 %v1149_v50 }
 0x167   : > { %v4586_v15 = vmul.bf16 1065369472, %v3582_v25  ;;  %3599 = vrcp.bf16 %v1165_v54  ;;  %v1276_v28 = vmul.bf16 1065893768, %v6131_v4  ;;  %v6132_v57 = vmul.bf16 1060454197, %v4549_v14 }
 0x168   : > { %v1055_v19 = vand.u32 2147450879, %v5987_v32  ;;  %v1419_v42 = vadd.bf16 1068908470, %v1371_v49  ;;  %v1114_v58 = vmul.bf16 1051213480, %v1066_v30  ;;  %v1738_v48 = vmul.bf16 %v1066_v30, %v1066_v30 }
 0x169   : > { %6130 = vst [vmem:[#allocation62_spill] sm:$0xff] %v4586_v15  ;;  %v3584_v24 = vpop.eup %3583  ;;  %v1056_v26 = vand.u32 2147450879, %v6132_v57  ;;  %v6133_v7 = vld [vmem:[#allocation16_spill] sm:$0xff]  ;;  %v6134_v50 = vld [vmem:[#allocation17_spill] sm:$0xff]  ;;  %v6135_v17 = vld [vmem:[#allocation19_spill] sm:$0xff]  ;;  %v651_v57 = vadd.f32 %v4268_v36, %v3948_v0  ;;  %3601 = vpow.bf16 %v1881_v63 }
 0x16a   : > { %v868_v25 = vadd.f32 %v6133_v7, %v3952_v3  ;;  %v860_v27 = vadd.f32 %v6134_v50, %v3952_v3  ;;  %v1467_v51 = vmul.bf16 %v1419_v42, %v6124_v1  ;;  %v1324_v54 = vadd.bf16 3216687034, %v1276_v28  ;;  %v6138_v14 = vld [vmem:[#allocation21_spill] sm:$0xff]  ;;  %v6166_v6 = vld [vmem:[#allocation15_spill] sm:$0xff] }
 0x16b   : > { %v871_v32 = vadd.f32 %v6135_v17, %v3952_v3  ;;  %v4602_v49 = vpop.eup %3585  ;;  %v4604_v15 = vmul.bf16 1065369472, %v3584_v24  ;;  %v863_v7 = vadd.f32 %v6138_v14, %v3952_v3  ;;  %v655_v50 = vadd.f32 %v4295_v5, %v3948_v0 }
 0x16c   : > { %6136 = vst [vmem:[#allocation14_spill] sm:$0xff] %v4602_v49  ;;  %v4612_v30 = vpop.eup %3587  ;;  %v1727_v42 = vmul.bf16 %v1055_v19, %v1055_v19  ;;  %v1515_v28 = vadd.bf16 3197288082, %v1467_v51  ;;  %v1372_v33 = vmul.bf16 %v1324_v54, %v6131_v4  ;;  %v653_v17 = vadd.f32 %v4287_v45, %v3950_v2 }
 0x16d   : > { %6137 = vst [vmem:[#allocation16_spill] sm:$0xff] %v4604_v15  ;;  %6139 = vst [vmem:[#allocation17_spill] sm:$0xff] %v4612_v30  ;;  %v4617_v24 = vpop.eup %3589  ;;  %v4619_v15 = vpack.c.bf16 %v871_v32, %v868_v25  ;;  %v4621_v36 = vpack.c.bf16 %v863_v7, %v860_v27  ;;  %v4623_v49 = vpack.c.bf16 %v655_v50, %v651_v57  ;;  %v1103_v30 = vmul.bf16 1051213480, %v1055_v19  ;;  %v6147_v50 = vld [vmem:[#allocation3_spill] sm:$0xff] }
 0x16e   : > { %6140 = vst [vmem:[#allocation19_spill] sm:$0xff] %v4617_v24  ;;  %v657_v5 = vadd.f32 %v4301_v39, %v3950_v2  ;;  %v4627_v14 = vpop.eup %3591  ;;  %v1104_v51 = vmul.bf16 1051213480, %v1056_v26  ;;  %v1563_v54 = vmul.bf16 %v1515_v28, %v6124_v1  ;;  %v1420_v23 = vadd.bf16 1068908470, %v1372_v33  ;;  %v6171_v33 = vld [vmem:[#allocation23_spill] sm:$0xff] }
 0x16f   : > { %6141 = vst [vmem:[#allocation21_spill] sm:$0xff] %v4619_v15  ;;  %6142 = vst [vmem:[#allocation63_spill] sm:$0xff] %v4621_v36  ;;  %v3594_v46 = vpop.eup %3593  ;;  %v4630_v45 = vsub.bf16 0, %v1738_v48  ;;  %v1728_v24 = vmul.bf16 %v1056_v26, %v1056_v26  ;;  %v5994_v32 = vmul.bf16 1060454197, %v4619_v15  ;;  %v4637_v57 = vsub.bf16 0, %v1727_v42 }
 0x170   : > { %6143 = vst [vmem:[#allocation64_spill] sm:$0xff] %v4623_v49  ;;  %6144 = vst [vmem:[#allocation65_spill] sm:$0xff] %v4627_v14  ;;  %v4633_v27 = vpack.c.bf16 %v657_v5, %v653_v17  ;;  %v4635_v25 = vpop.eup %3595  ;;  %v1611_v39 = vadd.bf16 1048723074, %v1563_v54  ;;  %v1468_v7 = vmul.bf16 %v1420_v23, %v6131_v4  ;;  %v6148_v28 = vmul.bf16 1060454197, %v6147_v50 }
 0x171   : > { %6146 = vst [vmem:[#allocation67_spill] sm:$0xff] %v4635_v25  ;;  %v1162_v48 = vadd.bf16 1065369472, %v1114_v58  ;;  %v1075_v26 = vand.u32 2147450879, %v5994_v32  ;;  %v3598_v42 = vpop.eup %3597  ;;  %v4655_v8 = vsub.bf16 0, %v1728_v24 }
 0x172   : > { %6145 = vst [vmem:[#allocation66_spill] sm:$0xff] %v4633_v27  ;;  %vm4643_vm3 = vcmp.lt.bf16.partialorder %v6148_v28, 0  ;;  %v4650_v5 = vmul.bf16 1065369472, %v3594_v46  ;;  %v1151_v54 = vadd.bf16 1065369472, %v1103_v30  ;;  %v1659_v23 = vmul.bf16 %v1611_v39, %v6124_v1  ;;  %v3600_v25 = vpop.eup %3599 }
 0x173   : > { %v1516_v19 = vadd.bf16 3197288082, %v1468_v7  ;;  %v6152_v28 = vmul.bf16 1069105081, %v4560_v37  ;;  %v1152_v14 = vadd.bf16 1065369472, %v1104_v51 }
 0x174   : > { %6151 = vst [vmem:[#allocation3_spill] sm:$0xff] %v4650_v5  ;;  %v6153_v63 = vmul.bf16 1060454197, %v4621_v36  ;;  %v1947_v30 = vmul.bf16 %v4324_v29, %v1659_v23  ;;  %v4665_v39 = vpop.f32.mrb[52].mxu0  ;;  %v6155_v7 = vld [vmem:[#allocation2_spill] sm:$0xff] }
 0x175   : > { %3603 = vpow.bf16 %v6152_v28  ;;  %v1564_v1 = vmul.bf16 %v1516_v19, %v6131_v4  ;;  %6154 = vst [vmem:[#allocation68_spill] sm:$0xff] %v4665_v39  ;;  %v6156_v37 = vmul.bf16 1056980736, %v6155_v7  ;;  %v6157_v51 = vadd.bf16 1065369472, %v4256_v12  ;;  %v6158_v28 = vld [vmem:[#allocation4_spill] sm:$0xff] }
 0x176   : > { %v4659_v58 = vand.u32 2147450879, %v6153_v63  ;;  %v6159_v17 = vmul.bf16 1060454197, %v6158_v28  ;;  %3605 = vrcp.bf16 %v1162_v48  ;;  %v1123_v32 = vmul.bf16 1051213480, %v1075_v26 }
 0x177   : > { %v2234_v24 = vmul.bf16 %v6157_v51, %v6156_v37  ;;  %v6162_v46 = vmul.bf16 1060454197, %v4623_v49  ;;  %v4681_v19 = vpop.f32.mrb[53].mxu0  ;;  %v4683_v23 = vmul.bf16 1065369472, %v3598_v42  ;;  %v1747_v12 = vmul.bf16 %v1075_v26, %v1075_v26 }
 0x178   : > { %vm4673_vm4 = vcmp.lt.bf16.partialorder %v6159_v17, 0  ;;  %6163 = vst [vmem:[#allocation2_spill] sm:$0xff] %v4681_v19  ;;  %v1995_v7 = vsub.bf16 1065369472, %v1947_v30  ;;  %v1612_v5 = vadd.bf16 1048723074, %v1564_v1  ;;  %3607 = vrcp.bf16 %v1151_v54 }
 0x179   : > { %v4679_v29 = vand.u32 2147450879, %v6162_v46  ;;  %6164 = vst [vmem:[#allocation4_spill] sm:$0xff] %v4683_v23  ;;  %v4685_v37 = vmul.bf16 1065369472, %v3600_v25  ;;  %v4692_v19 = vpop.f32.mrb[54].mxu0  ;;  %3609 = vrcp.bf16 %v1152_v14  ;;  %v665_v63 = vadd.f32 %v4341_v10, %v3948_v0 }
 0x17a   : > { %v1120_v51 = vmul.bf16 1051213480, %v4659_v58  ;;  %v2091_v48 = vsub.bf16 0, %v1995_v7  ;;  %v1660_v39 = vmul.bf16 %v1612_v5, %v6131_v4  ;;  %v1278_v46 = vmul.bf16 1065893768, %v4234_v55  ;;  %v4699_v1 = vpop.f32.mrb[55].mxu0 }
 0x17b   : > { %6165 = vst [vmem:[#allocation69_spill] sm:$0xff] %v4685_v37  ;;  %v1277_v43 = vmul.bf16 1065893768, %v6166_v6  ;;  %v6167_v42 = vmul.bf16 1056980736, %v3967_v22  ;;  %6169 = vst [vmem:[#allocation15_spill] sm:$0xff] %v4699_v1 }
 0x17c   : > { %v6168_v26 = vadd.bf16 1065369472, %v4279_v61  ;;  %v1171_v54 = vadd.bf16 1065369472, %v1123_v32  ;;  %v1106_v30 = vmul.bf16 1051213480, %v4679_v29  ;;  %v2139_v4 = vsel %vm4643_vm3, %v2091_v48, %v1995_v7  ;;  %v4710_v32 = vpop.eup %3601 }
 0x17d   : > { %v1948_v5 = vmul.bf16 %v4343_v13, %v1660_v39  ;;  %v4705_v37 = vsub.bf16 0, %v1747_v12  ;;  %v6170_v22 = vmul.bf16 1069105081, %v4567_v11  ;;  %v2187_v61 = vadd.bf16 1065369472, %v2139_v4 }
 0x17e   : > { %v2239_v25 = vmul.bf16 %v6168_v26, %v6167_v42  ;;  %v1168_v42 = vadd.bf16 1065369472, %v1120_v51  ;;  %v6000_v14 = vmul.bf16 1060454197, %v4633_v27  ;;  %v1326_v23 = vadd.bf16 3216687034, %v1278_v46 }
 0x17f   : > { %3611 = vpow.bf16 %v6170_v22  ;;  %v1996_v26 = vsub.bf16 1065369472, %v1948_v5  ;;  %v1325_v1 = vadd.bf16 3216687034, %v1277_v43  ;;  %v884_v7 = vadd.f32 %v6171_v33, %v3952_v3 }
 0x180   : > { %v6172_v13 = vmul.bf16 1056980736, %v6147_v50  ;;  %3613 = vrcp.bf16 %v1171_v54  ;;  %v1744_v11 = vmul.bf16 %v4659_v58, %v4659_v58  ;;  %v1154_v12 = vadd.bf16 1065369472, %v1106_v30  ;;  %v4718_v48 = vpop.eup %3603 }
 0x181   : > { %v2092_v51 = vsub.bf16 0, %v1996_v26  ;;  %v1374_v4 = vmul.bf16 %v1326_v23, %v4234_v55  ;;  %v1373_v5 = vmul.bf16 %v1325_v1, %v6166_v6  ;;  %v876_v43 = vadd.f32 %v4240_v59, %v3952_v3  ;;  %v3606_v54 = vpop.eup %3605 }
 0x182   : > { %v2235_v39 = vmul.bf16 %v2187_v61, %v6172_v13  ;;  %3615 = vrcp.bf16 %v1168_v42  ;;  %v1730_v50 = vmul.bf16 %v4679_v29, %v4679_v29  ;;  %v1059_v46 = vand.u32 2147450879, %v6000_v14 }
 0x183   : > { %v887_v58 = vadd.f32 %v4244_v34, %v3952_v3  ;;  %v2140_v23 = vsel %vm4673_vm4, %v2092_v51, %v1996_v26  ;;  %v1422_v30 = vadd.bf16 1068908470, %v1374_v4  ;;  %v1421_v1 = vadd.bf16 1068908470, %v1373_v5  ;;  %v3608_v42 = vpop.eup %3607 }
 0x184   : > { %2513 = vmatprep.mubr.bf16.mxu1 %v2235_v39  ;;  %v879_v59 = vadd.f32 %v4252_v16, %v3952_v3  ;;  %v2188_v22 = vadd.bf16 1065369472, %v2140_v23  ;;  %3617 = vrcp.bf16 %v1154_v12  ;;  %v661_v29 = vadd.f32 %v4322_v40, %v3948_v0  ;;  %v6193_v40 = vld [vmem:[#allocation27_spill] sm:$0xff] }
 0x185   : > { %2514 = vmatmul.mubr.bf16.vlgmr.msra.gmra.mrb[32].mxu1 %v2234_v24  ;;  %v4736_v61 = vpack.c.bf16 %v887_v58, %v884_v7  ;;  %v1470_v34 = vmul.bf16 %v1422_v30, %v4234_v55  ;;  %v1469_v24 = vmul.bf16 %v1421_v1, %v6166_v6  ;;  %v6175_v26 = vmul.bf16 1056980736, %v6158_v28  ;;  %v3610_v7 = vpop.eup %3609 }
 0x186   : > { %v4740_v33 = vpack.c.bf16 %v879_v59, %v876_v43  ;;  %v1792_v13 = vsub.bf16 0, %v1744_v11  ;;  %v1731_v39 = vmul.bf16 %v1059_v46, %v1059_v46  ;;  %v4748_v4 = vpack.c.bf16 %v665_v63, %v661_v29 }
 0x187   : > { %6173 = vst [vmem:[#allocation23_spill] sm:$0xff] %v4736_v61  ;;  %v2236_v3 = vmul.bf16 %v2188_v22, %v6175_v26  ;;  %v1518_v12 = vadd.bf16 3197288082, %v1470_v34  ;;  %v1517_v51 = vadd.bf16 3197288082, %v1469_v24  ;;  %v1778_v28 = vsub.bf16 0, %v1730_v50 }
 0x188   : > { %6174 = vst [vmem:[#allocation70_spill] sm:$0xff] %v4740_v33  ;;  %6176 = vst [vmem:[#allocation71_spill] sm:$0xff] %v4748_v4  ;;  %v6177_v5 = vmul.bf16 1069105081, %v4572_v35  ;;  %v4752_v43 = vmul.bf16 1065369472, %v3606_v54  ;;  %v671_v63 = vadd.f32 %v4385_v47, %v3948_v0 }
 0x189   : > { %v4754_v10 = vmul.bf16 1065369472, %v3608_v42  ;;  %3404 = vmatprep.mubr.bf16.mxu0 %v2236_v3  ;;  %v1926_v11 = vmul.bf16 1069105081, %v4705_v37  ;;  %v1566_v23 = vmul.bf16 %v1518_v12, %v4234_v55  ;;  %v1565_v30 = vmul.bf16 %v1517_v51, %v6166_v6  ;;  %v6180_v34 = vld [vmem:[#allocation5_spill] sm:$0xff]  ;;  %v6184_v26 = vld [vmem:[#allocation6_spill] sm:$0xff] }
 0x18a   : > { %3619 = vpow.bf16 %v6177_v5  ;;  %v4756_v58 = vpop.eup %3611  ;;  %3405 = vmatmul.mubr.bf16.vlgmr.msra.gmra.mrb[64].mxu0 %v2239_v25  ;;  %v5998_v1 = vmul.bf16 1060454197, %v4736_v61  ;;  %v6178_v35 = vmul.bf16 1069105081, %v4630_v45  ;;  %v4764_v54 = vmul.bf16 1065369472, %v3610_v7 }
 0x18b   : > { %v1917_v59 = vmul.bf16 1069105081, %v1792_v13  ;;  %v1107_v22 = vmul.bf16 1051213480, %v1059_v46  ;;  %v3614_v29 = vpop.eup %3613  ;;  %v6179_v50 = vmul.bf16 1069105081, %v4637_v57 }
 0x18c   : > { %3621 = vpow.bf16 %v6178_v35  ;;  %v1779_v42 = vsub.bf16 0, %v1731_v39  ;;  %v1614_v37 = vadd.bf16 1048723074, %v1566_v23  ;;  %v1613_v25 = vadd.bf16 1048723074, %v1565_v30  ;;  %v4783_v7 = vpop.f32.mrb[56].mxu0 }
 0x18d   : > { %3623 = vpow.bf16 %v6179_v50  ;;  %v6181_v24 = vmul.bf16 1060454197, %v6180_v34  ;;  %v6185_v45 = vmul.bf16 1060454197, %v6184_v26  ;;  %v6188_v46 = vmul.bf16 1069105081, %v4655_v8  ;;  %v3616_v39 = vpop.eup %3615 }
 0x18e   : > { %v1875_v57 = vmul.bf16 1069105081, %v1778_v28  ;;  %v5999_v13 = vmul.bf16 1060454197, %v4740_v33  ;;  %v1662_v12 = vmul.bf16 %v1614_v37, %v4234_v55  ;;  %v1661_v51 = vmul.bf16 %v1613_v25, %v6166_v6  ;;  %v4789_v23 = vpop.f32.mrb[57].mxu0  ;;  %v6203_v47 = vld [vmem:[#allocation28_spill] sm:$0xff] }
 0x18f   : > { %vm4770_vm5 = vcmp.lt.bf16.partialorder %v6181_v24, 0  ;;  %vm4776_vm6 = vcmp.lt.bf16.partialorder %v6185_v45, 0  ;;  %3625 = vpow.bf16 %v6188_v46  ;;  %v1081_v5 = vand.u32 2147450879, %v5998_v1  ;;  %v3618_v35 = vpop.eup %3617  ;;  %v4798_v6 = vpop.f32.mrb[58].mxu0 }
 0x190   : > { %3627 = vpow.bf16 %v1926_v11  ;;  %v4791_v30 = vmul.bf16 1065369472, %v3614_v29  ;;  %v1155_v28 = vadd.bf16 1065369472, %v1107_v22  ;;  %v1878_v50 = vmul.bf16 1069105081, %v1779_v42 }
 0x191   : > { %3629 = vpow.bf16 %v1917_v59  ;;  %v1950_v24 = vmul.bf16 %v4367_v18, %v1662_v12  ;;  %v1949_v11 = vmul.bf16 %v4363_v60, %v1661_v51  ;;  %v667_v55 = vadd.f32 %v4353_v21, %v3950_v2  ;;  %v6190_v18 = vld [vmem:[#allocation31_spill] sm:$0xff] }
 0x192   : > { %6189 = vst [vmem:[#allocation5_spill] sm:$0xff] %v4791_v30  ;;  %v4800_v37 = vmul.bf16 1065369472, %v3616_v39  ;;  %3631 = vpow.bf16 %v1875_v57  ;;  %v1078_v59 = vand.u32 2147450879, %v5999_v13  ;;  %v663_v45 = vadd.f32 %v6190_v18, %v3950_v2  ;;  %v4810_v39 = vpop.f32.mrb[59].mxu0 }
 0x193   : > { %v1998_v22 = vsub.bf16 1065369472, %v1950_v24  ;;  %v1997_v25 = vsub.bf16 1065369472, %v1949_v11  ;;  %v1129_v42 = vmul.bf16 1051213480, %v1081_v5  ;;  %3633 = vrcp.bf16 %v1155_v28 }
 0x194   : > { %v4807_v60 = vmul.bf16 1065369472, %v3618_v35  ;;  %v1753_v21 = vmul.bf16 %v1081_v5, %v1081_v5  ;;  %v4815_v24 = vpack.c.bf16 %v667_v55, %v663_v45  ;;  %3635 = vpow.bf16 %v1878_v50  ;;  %v6194_v35 = vld [vmem:[#allocation26_spill] sm:$0xff]  ;;  %v6232_v30 = vld [vmem:[#allocation35_spill] sm:$0xff] }
 0x195   : > { %v4812_v57 = vpop.eup %3619  ;;  %v2094_v12 = vsub.bf16 0, %v1998_v22  ;;  %v2093_v51 = vsub.bf16 0, %v1997_v25  ;;  %v1126_v11 = vmul.bf16 1051213480, %v1078_v59  ;;  %v1281_v18 = vmul.bf16 1065893768, %v6193_v40 }
 0x196   : > { %6191 = vst [vmem:[#allocation6_spill] sm:$0xff] %v4807_v60  ;;  %6192 = vst [vmem:[#allocation31_spill] sm:$0xff] %v4815_v24  ;;  %v1280_v8 = vmul.bf16 1065893768, %v6194_v35  ;;  %v1177_v1 = vadd.bf16 1065369472, %v1129_v42  ;;  %v1750_v45 = vmul.bf16 %v1078_v59, %v1078_v59 }
 0x197   : > { %v4819_v28 = vpop.eup %3621  ;;  %v2142_v5 = vsel %vm4776_vm6, %v2094_v12, %v1998_v22  ;;  %v2141_v46 = vsel %vm4770_vm5, %v2093_v51, %v1997_v25  ;;  %v1329_v14 = vadd.bf16 3216687034, %v1281_v18  ;;  %v1801_v29 = vsub.bf16 0, %v1753_v21  ;;  %v6200_v59 = vld [vmem:[#allocation32_spill] sm:$0xff] }
 0x198   : > { %v4826_v17 = vpop.eup %3623  ;;  %v2190_v55 = vadd.bf16 1065369472, %v2142_v5  ;;  %v2189_v50 = vadd.bf16 1065369472, %v2141_v46  ;;  %v6197_v61 = vmul.bf16 1060454197, %v4748_v4  ;;  %3637 = vrcp.bf16 %v1177_v1 }
 0x199   : > { %6195 = vst [vmem:[#allocation27_spill] sm:$0xff] %v4826_v17  ;;  %v1328_v3 = vadd.bf16 3216687034, %v1280_v8  ;;  %v6199_v25 = vmul.bf16 1056980736, %v6184_v26  ;;  %v1377_v46 = vmul.bf16 %v1329_v14, %v6193_v40  ;;  %v1798_v4 = vsub.bf16 0, %v1750_v45 }
 0x19a   : > { %v4828_v16 = vpop.eup %3625  ;;  %v1061_v49 = vand.u32 2147450879, %v6197_v61  ;;  %v1174_v12 = vadd.bf16 1065369472, %v1126_v11  ;;  %v1282_v51 = vmul.bf16 1065893768, %v6200_v59  ;;  %v675_v14 = vadd.f32 %v4400_v52, %v3948_v0 }
 0x19b   : > { %6196 = vst [vmem:[#allocation26_spill] sm:$0xff] %v4828_v16  ;;  %v4834_v22 = vpop.eup %3627  ;;  %v2238_v42 = vmul.bf16 %v2190_v55, %v6199_v25  ;;  %v6202_v21 = vmul.bf16 1056980736, %v6180_v34  ;;  %v6009_v61 = vmul.bf16 1060454197, %v4815_v24  ;;  %v1376_v8 = vmul.bf16 %v1328_v3, %v6194_v35 }
 0x19c   : > { %6198 = vst [vmem:[#allocation72_spill] sm:$0xff] %v4834_v22  ;;  %v4840_v18 = vpop.eup %3629  ;;  %v1285_v13 = vmul.bf16 1065893768, %v6203_v47  ;;  %v1425_v26 = vadd.bf16 1068908470, %v1377_v46  ;;  %v673_v1 = vadd.f32 %v4391_v56, %v3950_v2  ;;  %3639 = vrcp.bf16 %v1174_v12 }
 0x19d   : > { %6201 = vst [vmem:[#allocation32_spill] sm:$0xff] %v4840_v18  ;;  %v2237_v5 = vmul.bf16 %v2189_v50, %v6202_v21  ;;  %2521 = vmatprep.mubr.bf16.mxu1 %v2238_v42  ;;  %v1330_v55 = vadd.bf16 3216687034, %v1282_v51  ;;  %v4849_v11 = vpop.eup %3631  ;;  %v1944_v25 = vmul.bf16 1069105081, %v1801_v29  ;;  %v677_v50 = vadd.f32 %v4405_v9, %v3950_v2  ;;  %v6222_v18 = vld [vmem:[#allocation9_spill] sm:$0xff] }
 0x19e   : > { %6204 = vst [vmem:[#allocation28_spill] sm:$0xff] %v4849_v11  ;;  %v1424_v34 = vadd.bf16 1068908470, %v1376_v8  ;;  %v1109_v21 = vmul.bf16 1051213480, %v1061_v49  ;;  %v1473_v3 = vmul.bf16 %v1425_v26, %v6193_v40  ;;  %v3634_v46 = vpop.eup %3633  ;;  %v1733_v51 = vmul.bf16 %v1061_v49, %v1061_v49 }
 0x19f   : > { %2522 = vmatmul.mubr.bf16.gmra.mrb[36].mxu1 %v2237_v5  ;;  %v1378_v42 = vmul.bf16 %v1330_v55, %v6200_v59  ;;  %v1333_v45 = vadd.bf16 3216687034, %v1285_v13  ;;  %v1062_v52 = vand.u32 2147450879, %v6009_v61  ;;  %v4861_v8 = vpack.c.bf16 %v675_v14, %v671_v63  ;;  %v4863_v26 = vpop.eup %3635 }
 0x1a0   : > { %v1472_v11 = vmul.bf16 %v1424_v34, %v6194_v35  ;;  %v1521_v29 = vadd.bf16 3197288082, %v1473_v3  ;;  %6206 = vst [vmem:[#allocation74_spill] sm:$0xff] %v4863_v26  ;;  %v1935_v13 = vmul.bf16 1069105081, %v1798_v4  ;;  %v4865_v49 = vpack.c.bf16 %v677_v50, %v673_v1  ;;  %v4871_v3 = vpop.f32.mrb[60].mxu0 }
 0x1a1   : > { %v1426_v5 = vadd.bf16 1068908470, %v1378_v42  ;;  %v1381_v9 = vmul.bf16 %v1333_v45, %v6203_v47  ;;  %6205 = vst [vmem:[#allocation73_spill] sm:$0xff] %v4861_v8  ;;  %v4867_v33 = vmul.bf16 1065369472, %v3634_v46  ;;  %v1734_v12 = vmul.bf16 %v1062_v52, %v1062_v52  ;;  %v6209_v46 = vld [vmem:[#allocation8_spill] sm:$0xff] }
 0x1a2   : > { %v1520_v55 = vadd.bf16 3197288082, %v1472_v11  ;;  %6207 = vst [vmem:[#allocation75_spill] sm:$0xff] %v4865_v49  ;;  %v1569_v34 = vmul.bf16 %v1521_v29, %v6193_v40  ;;  %v1157_v42 = vadd.bf16 1065369472, %v1109_v21  ;;  %3641 = vpow.bf16 %v1944_v25 }
 0x1a3   : > { %6208 = vst [vmem:[#allocation76_spill] sm:$0xff] %v4867_v33  ;;  %v1474_v61 = vmul.bf16 %v1426_v5, %v6200_v59  ;;  %v1429_v56 = vadd.bf16 1068908470, %v1381_v9  ;;  %v1110_v45 = vmul.bf16 1051213480, %v1062_v52  ;;  %v4882_v5 = vsub.bf16 0, %v1733_v51  ;;  %v4906_v22 = vpop.eup %3637 }
 0x1a4   : > { %v1568_v63 = vmul.bf16 %v1520_v55, %v6194_v35  ;;  %v6010_v14 = vmul.bf16 1060454197, %v4861_v8  ;;  %v1617_v4 = vadd.bf16 1048723074, %v1569_v34  ;;  %v6210_v1 = vmul.bf16 1060454197, %v6209_v46 }
 0x1a5   : > { %v1522_v11 = vadd.bf16 3197288082, %v1474_v61  ;;  %v1477_v50 = vmul.bf16 %v1429_v56, %v6203_v47  ;;  %v4888_v55 = vpop.f32.mrb[61].mxu0  ;;  %v6213_v52 = vld [vmem:[#allocation7_spill] sm:$0xff]  ;;  %3643 = vpow.bf16 %v1935_v13  ;;  %v4908_v13 = vsub.bf16 0, %v1734_v12 }
 0x1a6   : > { %vm4878_vm7 = vcmp.lt.bf16.partialorder %v6210_v1, 0  ;;  %v1616_v21 = vadd.bf16 1048723074, %v1568_v63  ;;  %v4886_v9 = vand.u32 2147450879, %v6010_v14  ;;  %v1665_v56 = vmul.bf16 %v1617_v4, %v6193_v40  ;;  %v6217_v1 = vld [vmem:[#allocation10_spill] sm:$0xff] }
 0x1a7   : > { %v6214_v61 = vmul.bf16 1060454197, %v6213_v52  ;;  %v1570_v25 = vmul.bf16 %v1522_v11, %v6200_v59  ;;  %v1525_v51 = vadd.bf16 3197288082, %v1477_v50  ;;  %v6218_v63 = vmul.bf16 1060454197, %v6217_v1 }
 0x1a8   : > { %3645 = vrcp.bf16 %v1157_v42  ;;  %v1158_v14 = vadd.bf16 1065369472, %v1110_v45  ;;  %v1664_v27 = vmul.bf16 %v1616_v21, %v6194_v35  ;;  %v6221_v40 = vld [vmem:[#allocation38_spill] sm:$0xff]  ;;  %v6226_v35 = vld [vmem:[#allocation37_spill] sm:$0xff]  ;;  %v1112_v21 = vmul.bf16 1051213480, %v4886_v9 }
 0x1a9   : > { %vm4892_vm8 = vcmp.lt.bf16.partialorder %v6214_v61, 0  ;;  %vm4900_vm9 = vcmp.lt.bf16.partialorder %v6218_v63, 0  ;;  %v1953_v4 = vmul.bf16 %v6221_v40, %v1665_v56  ;;  %v1618_v11 = vadd.bf16 1048723074, %v1570_v25  ;;  %v6227_v61 = vld [vmem:[#allocation36_spill] sm:$0xff]  ;;  %v6229_v42 = vld [vmem:[#allocation41_spill] sm:$0xff] }
 0x1aa   : > { %v1573_v50 = vmul.bf16 %v1525_v51, %v6203_v47  ;;  %v6223_v63 = vmul.bf16 1060454197, %v6222_v18  ;;  %v1952_v45 = vmul.bf16 %v6226_v35, %v1664_v27  ;;  %v1284_v12 = vmul.bf16 1065893768, %v6227_v61  ;;  %v4930_v27 = vpop.eup %3639  ;;  %v6231_v35 = vld [vmem:[#allocation40_spill] sm:$0xff] }
 0x1ab   : > { %v2001_v56 = vsub.bf16 1065369472, %v1953_v4  ;;  %v1666_v25 = vmul.bf16 %v1618_v11, %v6200_v59  ;;  %3647 = vrcp.bf16 %v1158_v14  ;;  %v681_v33 = vadd.f32 %v6229_v42, %v3948_v0  ;;  %v4935_v59 = vpop.f32.mrb[62].mxu0 }
 0x1ac   : > { %vm4914_vm10 = vcmp.lt.bf16.partialorder %v6223_v63, 0  ;;  %v1621_v51 = vadd.bf16 1048723074, %v1573_v50  ;;  %v2000_v40 = vsub.bf16 1065369472, %v1952_v45  ;;  %v1736_v50 = vmul.bf16 %v4886_v9, %v4886_v9 }
 0x1ad   : > { %v6228_v63 = vmul.bf16 1060454197, %v4865_v49  ;;  %v2097_v17 = vsub.bf16 0, %v2001_v56  ;;  %v1954_v15 = vmul.bf16 %v4444_v62, %v1666_v25  ;;  %v1160_v11 = vadd.bf16 1065369472, %v1112_v21 }
 0x1ae   : > { %v1669_v4 = vmul.bf16 %v1621_v51, %v6203_v47  ;;  %v2096_v14 = vsub.bf16 0, %v2000_v40  ;;  %v1332_v45 = vadd.bf16 3216687034, %v1284_v12  ;;  %v1283_v62 = vmul.bf16 1065893768, %v6232_v30  ;;  %v4950_v12 = vpop.eup %3641 }
 0x1af   : > { %v4926_v36 = vand.u32 2147450879, %v6228_v63  ;;  %v4939_v63 = vpop.f32.mrb[63].mxu0  ;;  %v2145_v42 = vsel %vm4878_vm7, %v2097_v17, %v2001_v56  ;;  %v2002_v24 = vsub.bf16 1065369472, %v1954_v15  ;;  %6233 = vst [vmem:[#allocation7_spill] sm:$0xff] %v4950_v12  ;;  %v685_v15 = vadd.f32 %v4453_v53, %v3948_v0 }
 0x1b0   : > { %6230 = vst [vmem:[#allocation8_spill] sm:$0xff] %v4939_v63  ;;  %v1957_v16 = vmul.bf16 %v6231_v35, %v1669_v4  ;;  %v2193_v25 = vadd.bf16 1065369472, %v2145_v42  ;;  %v2144_v47 = vsel %vm4892_vm8, %v2096_v14, %v2000_v40  ;;  %v1380_v9 = vmul.bf16 %v1332_v45, %v6227_v61  ;;  %v4954_v17 = vpop.eup %3643 }
 0x1b1   : > { %v1737_v21 = vmul.bf16 %v4926_v36, %v4926_v36  ;;  %v2192_v51 = vadd.bf16 1065369472, %v2144_v47  ;;  %v2098_v63 = vsub.bf16 0, %v2002_v24  ;;  %6234 = vst [vmem:[#allocation10_spill] sm:$0xff] %v4954_v17  ;;  %v6235_v56 = vmul.bf16 1056980736, %v6209_v46 }
 0x1b2   : > { %v2005_v29 = vsub.bf16 1065369472, %v1957_v16  ;;  %3649 = vrcp.bf16 %v1160_v11  ;;  %v1428_v34 = vadd.bf16 1068908470, %v1380_v9  ;;  %v1331_v40 = vadd.bf16 3216687034, %v1283_v62 }
 0x1b3   : > { %v2241_v35 = vmul.bf16 %v2193_v25, %v6235_v56  ;;  %v3646_v4 = vpop.eup %3645  ;;  %v6236_v14 = vmul.bf16 1056980736, %v6213_v52  ;;  %v2146_v42 = vsel %vm4900_vm9, %v2098_v63, %v2002_v24  ;;  %v1288_v16 = vmul.bf16 1065893768, %v4493_v20  ;;  %v6238_v24 = vld [vmem:[#allocation47_spill] sm:$0xff] }
 0x1b4   : > { %v2101_v47 = vsub.bf16 0, %v2005_v29  ;;  %v2194_v53 = vadd.bf16 1065369472, %v2146_v42  ;;  %v1476_v12 = vmul.bf16 %v1428_v34, %v6227_v61  ;;  %v1379_v46 = vmul.bf16 %v1331_v40, %v6232_v30 }
 0x1b5   : > { %v2240_v45 = vmul.bf16 %v2192_v51, %v6236_v14  ;;  %2529 = vmatprep.mubr.bf16.mxu1 %v2241_v35  ;;  %v4965_v25 = vpack.c.bf16 %v685_v15, %v681_v33  ;;  %v1336_v52 = vadd.bf16 3216687034, %v1288_v16  ;;  %v1291_v62 = vmul.bf16 1065893768, %v4491_v41  ;;  %v6240_v15 = vld [vmem:[#allocation44_spill] sm:$0xff] }
 0x1b6   : > { %v2149_v11 = vsel %vm4914_vm10, %v2101_v47, %v2005_v29  ;;  %v687_v26 = vadd.f32 %v6238_v24, %v3950_v2  ;;  %v6239_v63 = vmul.bf16 1056980736, %v6217_v1  ;;  %v1524_v56 = vadd.bf16 3197288082, %v1476_v12  ;;  %v3648_v34 = vpop.eup %3647 }
 0x1b7   : > { %6237 = vst [vmem:[#allocation38_spill] sm:$0xff] %v4965_v25  ;;  %2530 = vmatmul.mubr.bf16.gmra.mrb[40].mxu1 %v2240_v45  ;;  %v2197_v51 = vadd.bf16 1065369472, %v2149_v11  ;;  %v1427_v35 = vadd.bf16 1068908470, %v1379_v46  ;;  %v683_v40 = vadd.f32 %v6240_v15, %v3950_v2  ;;  %v1384_v60 = vmul.bf16 %v1336_v52, %v4493_v20 }
 0x1b8   : > { %v2242_v9 = vmul.bf16 %v2194_v53, %v6239_v63  ;;  %v1113_v33 = vmul.bf16 1051213480, %v4926_v36  ;;  %v1339_v29 = vadd.bf16 3216687034, %v1291_v62  ;;  %v6241_v14 = vmul.bf16 1056980736, %v6222_v18 }
 0x1b9   : > { %v1784_v42 = vsub.bf16 0, %v1736_v50  ;;  %v1572_v1 = vmul.bf16 %v1524_v56, %v6227_v61  ;;  %v1475_v47 = vmul.bf16 %v1427_v35, %v6232_v30  ;;  %v6242_v12 = vmul.bf16 1069105081, %v4882_v5  ;;  %v6243_v50 = vld [vmem:[#allocation12_spill] sm:$0xff] }
 0x1ba   : > { %3408 = vmatprep.mubr.bf16.mxu0 %v2242_v9  ;;  %v2245_v45 = vmul.bf16 %v2197_v51, %v6241_v14  ;;  %v1785_v16 = vsub.bf16 0, %v1737_v21  ;;  %v1432_v36 = vadd.bf16 1068908470, %v1384_v60  ;;  %v1387_v53 = vmul.bf16 %v1339_v29, %v4491_v41  ;;  %v6248_v29 = vld [vmem:[#allocation48_spill] sm:$0xff] }
 0x1bb   : > { %3651 = vpow.bf16 %v6242_v12  ;;  %v4986_v46 = vmul.bf16 1065369472, %v4906_v22  ;;  %v1620_v11 = vadd.bf16 1048723074, %v1572_v1  ;;  %v1523_v52 = vadd.bf16 3197288082, %v1475_v47 }
 0x1bc   : > { %3409 = vmatmul.mubr.bf16.gmra.mrb[68].mxu0 %v2245_v45  ;;  %v4988_v18 = vpack.c.bf16 %v687_v26, %v683_v40  ;;  %v6244_v62 = vmul.bf16 1060454197, %v6243_v50  ;;  %v4997_v5 = vmul.bf16 1065369472, %v4930_v27  ;;  %v1161_v21 = vadd.bf16 1065369472, %v1113_v33 }
 0x1bd   : > { %v1480_v63 = vmul.bf16 %v1432_v36, %v4493_v20  ;;  %v1435_v9 = vadd.bf16 1068908470, %v1387_v53  ;;  %v6247_v22 = vmul.bf16 1069105081, %v4908_v13  ;;  %v1893_v51 = vmul.bf16 1069105081, %v1784_v42  ;;  %v3650_v35 = vpop.eup %3649 }
 0x1be   : > { %vm4992_vm11 = vcmp.lt.bf16.partialorder %v6244_v62, 0  ;;  %v1668_v26 = vmul.bf16 %v1620_v11, %v6227_v61  ;;  %v1571_v56 = vmul.bf16 %v1523_v52, %v6232_v30  ;;  %v5004_v15 = vmul.bf16 1065369472, %v3646_v4  ;;  %v6249_v1 = vld [vmem:[#allocation11_spill] sm:$0xff]  ;;  %v6268_v61 = vld [vmem:[#allocation60_spill] sm:$0xff] }
 0x1bf   : > { %3653 = vpow.bf16 %v6247_v22  ;;  %v1896_v40 = vmul.bf16 1069105081, %v1785_v16  ;;  %v1528_v60 = vadd.bf16 3197288082, %v1480_v63  ;;  %v1483_v27 = vmul.bf16 %v1435_v9, %v4491_v41  ;;  %v6253_v16 = vld [vmem:[#allocation20_spill] sm:$0xff]  ;;  %v6257_v22 = vld [vmem:[#allocation18_spill] sm:$0xff] }
 0x1c0   : > { %v1956_v14 = vmul.bf16 %v6248_v29, %v1668_v26  ;;  %v1619_v45 = vadd.bf16 1048723074, %v1571_v56  ;;  %v6022_v13 = vmul.bf16 1060454197, %v4965_v25  ;;  %v6250_v42 = vmul.bf16 1060454197, %v6249_v1 }
 0x1c1   : > { %3655 = vrcp.bf16 %v1161_v21  ;;  %v1576_v47 = vmul.bf16 %v1528_v60, %v4493_v20  ;;  %v1531_v12 = vadd.bf16 3197288082, %v1483_v27  ;;  %v6254_v36 = vmul.bf16 1060454197, %v6253_v16  ;;  %v6261_v27 = vld [vmem:[#allocation46_spill] sm:$0xff] }
 0x1c2   : > { %vm5012_vm12 = vcmp.lt.bf16.partialorder %v6250_v42, 0  ;;  %v5024_v11 = vmul.bf16 1065369472, %v3648_v34  ;;  %3657 = vpow.bf16 %v1893_v51  ;;  %v2004_v52 = vsub.bf16 1065369472, %v1956_v14 }
 0x1c3   : > { %vm5020_vm13 = vcmp.lt.bf16.partialorder %v6254_v36, 0  ;;  %v1667_v62 = vmul.bf16 %v1619_v45, %v6232_v30  ;;  %3659 = vpow.bf16 %v1896_v40  ;;  %v1624_v63 = vadd.bf16 1048723074, %v1576_v47  ;;  %v6262_v45 = vld [vmem:[#allocation50_spill] sm:$0xff] }
 0x1c4   : > { %v1579_v9 = vmul.bf16 %v1531_v12, %v4491_v41  ;;  %v1287_v21 = vmul.bf16 1065893768, %v4504_v38  ;;  %v6258_v26 = vmul.bf16 1060454197, %v6257_v22  ;;  %v2100_v60 = vsub.bf16 0, %v2004_v52 }
 0x1c5   : > { %v1955_v34 = vmul.bf16 %v6261_v27, %v1667_v62  ;;  %v5039_v30 = vand.u32 2147450879, %v6022_v13  ;;  %v1672_v40 = vmul.bf16 %v1624_v63, %v4493_v20  ;;  %v1286_v42 = vmul.bf16 1065893768, %v6262_v45 }
 0x1c6   : > { %vm5031_vm14 = vcmp.lt.bf16.partialorder %v6258_v26, 0  ;;  %v1627_v29 = vadd.bf16 1048723074, %v1579_v9  ;;  %v1335_v14 = vadd.bf16 3216687034, %v1287_v21  ;;  %v5043_v47 = vpop.eup %3651  ;;  %v2148_v36 = vsel %vm4992_vm11, %v2100_v60, %v2004_v52 }
 0x1c7   : > { %6263 = vst [vmem:[#allocation9_spill] sm:$0xff] %v5043_v47  ;;  %v5045_v12 = vmul.bf16 1065369472, %v3650_v35  ;;  %v2003_v62 = vsub.bf16 1065369472, %v1955_v34  ;;  %v1960_v51 = vmul.bf16 %v4554_v31, %v1672_v40  ;;  %v1739_v35 = vmul.bf16 %v5039_v30, %v5039_v30  ;;  %v6267_v34 = vld [vmem:[#allocation54_spill] sm:$0xff] }
 0x1c8   : > { %v6023_v26 = vmul.bf16 1060454197, %v4988_v18  ;;  %v2196_v27 = vadd.bf16 1065369472, %v2148_v36  ;;  %v1675_v13 = vmul.bf16 %v1627_v29, %v4491_v41  ;;  %v1383_v20 = vmul.bf16 %v1335_v14, %v4504_v38 }
 0x1c9   : > { %6264 = vst [vmem:[#allocation37_spill] sm:$0xff] %v5045_v12  ;;  %v2099_v63 = vsub.bf16 0, %v2003_v62  ;;  %v1115_v9 = vmul.bf16 1051213480, %v5039_v30  ;;  %v1334_v21 = vadd.bf16 3216687034, %v1286_v42 }
 0x1ca   : > { %v5056_v33 = vpop.eup %3653  ;;  %v6266_v24 = vmul.bf16 1056980736, %v6243_v50  ;;  %v2008_v60 = vsub.bf16 1065369472, %v1960_v51  ;;  %v1963_v36 = vmul.bf16 %v6267_v34, %v1675_v13  ;;  %v1431_v31 = vadd.bf16 1068908470, %v1383_v20 }
 0x1cb   : > { %6265 = vst [vmem:[#allocation36_spill] sm:$0xff] %v5056_v33  ;;  %v2147_v41 = vsel %vm5012_vm12, %v2099_v63, %v2003_v62  ;;  %v5065_v40 = vand.u32 2147450879, %v6023_v26  ;;  %v1382_v29 = vmul.bf16 %v1334_v21, %v6262_v45  ;;  %v1294_v30 = vmul.bf16 1065893768, %v4546_v44  ;;  %v6269_v63 = vld [vmem:[#allocation51_spill] sm:$0xff] }
 0x1cc   : > { %v2244_v52 = vmul.bf16 %v2196_v27, %v6266_v24  ;;  %v2195_v14 = vadd.bf16 1065369472, %v2147_v41  ;;  %v2104_v42 = vsub.bf16 0, %v2008_v60  ;;  %v2011_v50 = vsub.bf16 1065369472, %v1963_v36  ;;  %v3656_v27 = vpop.eup %3655  ;;  %v6272_v36 = vld [vmem:[#allocation52_spill] sm:$0xff] }
 0x1cd   : > { %v1479_v51 = vmul.bf16 %v1431_v31, %v4504_v38  ;;  %v1430_v13 = vadd.bf16 1068908470, %v1382_v29  ;;  %v1342_v20 = vadd.bf16 3216687034, %v1294_v30  ;;  %v695_v62 = vadd.f32 %v6268_v61, %v3948_v0  ;;  %v5073_v34 = vpop.eup %3657  ;;  %v6297_v33 = vld [vmem:[#allocation17_spill] sm:$0xff] }
 0x1ce   : > { %2537 = vmatprep.mubr.bf16.mxu1 %v2244_v52  ;;  %v1297_v24 = vmul.bf16 1065893768, %v6269_v63  ;;  %6270 = vst [vmem:[#allocation41_spill] sm:$0xff] %v5073_v34  ;;  %v6271_v21 = vmul.bf16 1056980736, %v6249_v1  ;;  %v2152_v52 = vsel %vm5020_vm13, %v2104_v42, %v2008_v60  ;;  %v2107_v41 = vsub.bf16 0, %v2011_v50  ;;  %v5081_v4 = vpop.eup %3659 }
 0x1cf   : > { %v691_v31 = vadd.f32 %v6272_v36, %v3948_v0  ;;  %6273 = vst [vmem:[#allocation40_spill] sm:$0xff] %v5081_v4  ;;  %v2200_v29 = vadd.bf16 1065369472, %v2152_v52  ;;  %v1527_v30 = vadd.bf16 3197288082, %v1479_v51  ;;  %v1478_v61 = vmul.bf16 %v1430_v13, %v6262_v45  ;;  %v6274_v60 = vld [vmem:[#allocation61_spill] sm:$0xff] }
 0x1d0   : > { %v2243_v26 = vmul.bf16 %v2195_v14, %v6271_v21  ;;  %v1390_v25 = vmul.bf16 %v1342_v20, %v4546_v44  ;;  %v2155_v1 = vsel %vm5031_vm14, %v2107_v41, %v2011_v50  ;;  %v1345_v53 = vadd.bf16 3216687034, %v1297_v24 }
 0x1d1   : > { %v5087_v14 = vpack.c.bf16 %v695_v62, %v691_v31  ;;  %v697_v42 = vadd.f32 %v6274_v60, %v3950_v2  ;;  %v6275_v21 = vmul.bf16 1056980736, %v6253_v16  ;;  %v2203_v34 = vadd.bf16 1065369472, %v2155_v1  ;;  %v6277_v16 = vld [vmem:[#allocation22_spill] sm:$0xff]  ;;  %v6278_v31 = vld [vmem:[#allocation25_spill] sm:$0xff] }
 0x1d2   : > { %2538 = vmatmul.mubr.bf16.gmra.mrb[44].mxu1 %v2243_v26  ;;  %v1575_v51 = vmul.bf16 %v1527_v30, %v4504_v38  ;;  %v1526_v52 = vadd.bf16 3197288082, %v1478_v61  ;;  %v1163_v13 = vadd.bf16 1065369472, %v1115_v9  ;;  %v1438_v4 = vadd.bf16 1068908470, %v1390_v25 }
 0x1d3   : > { %v2248_v36 = vmul.bf16 %v2200_v29, %v6275_v21  ;;  %v6026_v26 = vmul.bf16 1060454197, %v5087_v14  ;;  %v1393_v56 = vmul.bf16 %v1345_v53, %v6269_v63  ;;  %v6276_v50 = vmul.bf16 1056980736, %v6257_v22  ;;  %v6282_v21 = vld [vmem:[#allocation24_spill] sm:$0xff] }
 0x1d4   : > { %v1623_v62 = vadd.bf16 1048723074, %v1575_v51  ;;  %v1574_v24 = vmul.bf16 %v1526_v52, %v6262_v45  ;;  %v693_v41 = vadd.f32 %v6277_v16, %v3950_v2  ;;  %v6279_v29 = vmul.bf16 1060454197, %v6278_v31 }
 0x1d5   : > { %3412 = vmatprep.mubr.bf16.mxu0 %v2248_v36  ;;  %v2251_v20 = vmul.bf16 %v2203_v34, %v6276_v50  ;;  %v5107_v25 = vmul.bf16 1065369472, %v3656_v27  ;;  %v1486_v9 = vmul.bf16 %v1438_v4, %v4546_v44  ;;  %v1070_v22 = vand.u32 2147450879, %v6026_v26  ;;  %v6286_v50 = vld [vmem:[#allocation58_spill] sm:$0xff]  ;;  %v6293_v26 = vld [vmem:[#allocation29_spill] sm:$0xff] }
 0x1d6   : > { %vm5103_vm15 = vcmp.lt.bf16.partialorder %v6279_v29, 0  ;;  %v1441_v34 = vadd.bf16 1068908470, %v1393_v56  ;;  %v1116_v61 = vmul.bf16 1051213480, %v5065_v40  ;;  %v1671_v1 = vmul.bf16 %v1623_v62, %v4504_v38  ;;  %v6288_v29 = vld [vmem:[#allocation30_spill] sm:$0xff] }
 0x1d7   : > { %3413 = vmatmul.mubr.bf16.gmra.mrb[72].mxu0 %v2251_v20  ;;  %v1622_v53 = vadd.bf16 1048723074, %v1574_v24  ;;  %v5114_v60 = vpack.c.bf16 %v697_v42, %v693_v41  ;;  %v6283_v36 = vmul.bf16 1060454197, %v6282_v21  ;;  %v5122_v27 = vsub.bf16 0, %v1739_v35  ;;  %v6287_v41 = vld [vmem:[#allocation59_spill] sm:$0xff] }
 0x1d8   : > { %v1534_v4 = vadd.bf16 3197288082, %v1486_v9  ;;  %v1118_v52 = vmul.bf16 1051213480, %v1070_v22  ;;  %v1489_v56 = vmul.bf16 %v1441_v34, %v6269_v63  ;;  %3661 = vrcp.bf16 %v1163_v13 }
 0x1d9   : > { %vm5118_vm0 = vcmp.lt.bf16.partialorder %v6283_v36, 0  ;;  %v1959_v20 = vmul.bf16 %v6286_v50, %v1671_v1  ;;  %v1670_v38 = vmul.bf16 %v1622_v53, %v6262_v45  ;;  %v6031_v42 = vmul.bf16 1060454197, %v5114_v60  ;;  %v6292_v1 = vld [vmem:[#allocation13_spill] sm:$0xff] }
 0x1da   : > { %v1740_v62 = vmul.bf16 %v5065_v40, %v5065_v40  ;;  %v1582_v24 = vmul.bf16 %v1534_v4, %v4546_v44  ;;  %v1537_v16 = vadd.bf16 3197288082, %v1489_v56  ;;  %v1290_v35 = vmul.bf16 1065893768, %v6287_v41 }
 0x1db   : > { %v6289_v9 = vmul.bf16 1060454197, %v6288_v29  ;;  %v1164_v13 = vadd.bf16 1065369472, %v1116_v61  ;;  %v2007_v34 = vsub.bf16 1065369472, %v1959_v20  ;;  %v1958_v45 = vmul.bf16 %v6292_v1, %v1670_v38 }
 0x1dc   : > { %v1071_v53 = vand.u32 2147450879, %v6031_v42  ;;  %v1630_v50 = vadd.bf16 1048723074, %v1582_v24  ;;  %v1166_v4 = vadd.bf16 1065369472, %v1118_v52  ;;  %v1585_v56 = vmul.bf16 %v1537_v16, %v6269_v63 }
 0x1dd   : > { %vm5134_vm1 = vcmp.lt.bf16.partialorder %v6289_v9, 0  ;;  %v6294_v8 = vmul.bf16 1060454197, %v6293_v26  ;;  %v2103_v47 = vsub.bf16 0, %v2007_v34  ;;  %v2006_v61 = vsub.bf16 1065369472, %v1958_v45 }
 0x1de   : > { %v1742_v20 = vmul.bf16 %v1070_v22, %v1070_v22  ;;  %v1119_v49 = vmul.bf16 1051213480, %v1071_v53  ;;  %v5149_v38 = vsub.bf16 0, %v1740_v62  ;;  %v1678_v1 = vmul.bf16 %v1630_v50, %v4546_v44  ;;  %v6300_v45 = vld [vmem:[#allocation14_spill] sm:$0xff] }
 0x1df   : > { %vm5145_vm2 = vcmp.lt.bf16.partialorder %v6294_v8, 0  ;;  %v1633_v42 = vadd.bf16 1048723074, %v1585_v56  ;;  %v1338_v40 = vadd.bf16 3216687034, %v1290_v35  ;;  %3663 = vrcp.bf16 %v1164_v13  ;;  %v6298_v35 = vld [vmem:[#allocation57_spill] sm:$0xff] }
 0x1e0   : > { %v2151_v52 = vsel %vm5103_vm15, %v2103_v47, %v2007_v34  ;;  %v2102_v24 = vsub.bf16 0, %v2006_v61  ;;  %v1167_v16 = vadd.bf16 1065369472, %v1119_v49  ;;  %v1966_v17 = vmul.bf16 %v6297_v33, %v1678_v1 }
 0x1e1   : > { %v2199_v8 = vadd.bf16 1065369472, %v2151_v52  ;;  %v1681_v12 = vmul.bf16 %v1633_v42, %v6269_v63  ;;  %v1386_v22 = vmul.bf16 %v1338_v40, %v6287_v41  ;;  %3665 = vrcp.bf16 %v1166_v4  ;;  %v6303_v52 = vld [vmem:[#allocation16_spill] sm:$0xff] }
 0x1e2   : > { %v2150_v62 = vsel %vm5118_vm0, %v2102_v24, %v2006_v61  ;;  %v5159_v44 = vsub.bf16 0, %v1742_v20  ;;  %v1289_v13 = vmul.bf16 1065893768, %v6298_v35  ;;  %v6299_v30 = vmul.bf16 1056980736, %v6278_v31  ;;  %v6302_v20 = vld [vmem:[#allocation68_spill] sm:$0xff] }
 0x1e3   : > { %v2198_v34 = vadd.bf16 1065369472, %v2150_v62  ;;  %v2014_v49 = vsub.bf16 1065369472, %v1966_v17  ;;  %v1969_v50 = vmul.bf16 %v6300_v45, %v1681_v12  ;;  %3667 = vrcp.bf16 %v1167_v16  ;;  %v3662_v40 = vpop.eup %3661  ;;  %v6304_v16 = vld [vmem:[#allocation62_spill] sm:$0xff] }
 0x1e4   : > { %v2247_v47 = vmul.bf16 %v2199_v8, %v6299_v30  ;;  %v1743_v33 = vmul.bf16 %v1071_v53, %v1071_v53  ;;  %v1434_v63 = vadd.bf16 1068908470, %v1386_v22  ;;  %v1337_v42 = vadd.bf16 3216687034, %v1289_v13  ;;  %v6305_v22 = vld [vmem:[#allocation15_spill] sm:$0xff] }
 0x1e5   : > { %v6301_v51 = vmul.bf16 1056980736, %v6282_v21  ;;  %v2110_v56 = vsub.bf16 0, %v2014_v49  ;;  %v2017_v61 = vsub.bf16 1065369472, %v1969_v50  ;;  %v701_v1 = vadd.f32 %v6302_v20, %v3948_v0 }
 0x1e6   : > { %2545 = vmatprep.mubr.bf16.mxu1 %v2247_v47  ;;  %v1482_v31 = vmul.bf16 %v1434_v63, %v6287_v41  ;;  %v1385_v17 = vmul.bf16 %v1337_v42, %v6298_v35  ;;  %v1300_v12 = vmul.bf16 1065893768, %v6303_v52  ;;  %v705_v53 = vadd.f32 %v4692_v19, %v3948_v0  ;;  %v6307_v19 = vld [vmem:[#allocation2_spill] sm:$0xff] }
 0x1e7   : > { %v2246_v4 = vmul.bf16 %v2198_v34, %v6301_v51  ;;  %v2158_v24 = vsel %vm5134_vm1, %v2110_v56, %v2014_v49  ;;  %v2113_v21 = vsub.bf16 0, %v2017_v61  ;;  %v1303_v8 = vmul.bf16 1065893768, %v6304_v16 }
 0x1e8   : > { %v707_v62 = vadd.f32 %v6305_v22, %v3950_v2  ;;  %v2206_v13 = vadd.bf16 1065369472, %v2158_v24  ;;  %v1530_v30 = vadd.bf16 3197288082, %v1482_v31  ;;  %v1433_v47 = vadd.bf16 1068908470, %v1385_v17 }
 0x1e9   : > { %2546 = vmatmul.mubr.bf16.gmra.mrb[48].mxu1 %v2246_v4  ;;  %v5179_v34 = vpack.c.bf16 %v705_v53, %v701_v1  ;;  %v2161_v45 = vsel %vm5145_vm2, %v2113_v21, %v2017_v61  ;;  %v703_v50 = vadd.f32 %v6307_v19, %v3950_v2  ;;  %v1348_v63 = vadd.bf16 3216687034, %v1300_v12 }
 0x1ea   : > { %v1351_v36 = vadd.bf16 3216687034, %v1303_v8  ;;  %v6308_v49 = vmul.bf16 1056980736, %v6288_v29  ;;  %v2209_v51 = vadd.bf16 1065369472, %v2161_v45  ;;  %v1578_v4 = vmul.bf16 %v1530_v30, %v6287_v41  ;;  %v3664_v20 = vpop.eup %3663 }
 0x1eb   : > { %6306 = vst [vmem:[#allocation35_spill] sm:$0xff] %v5179_v34  ;;  %v1481_v56 = vmul.bf16 %v1433_v47, %v6298_v35  ;;  %v1791_v31 = vsub.bf16 0, %v1743_v33  ;;  %v1396_v1 = vmul.bf16 %v1348_v63, %v6303_v52  ;;  %v6033_v9 = vmul.bf16 1060454197, %v5179_v34  ;;  %v6310_v8 = vld [vmem:[#allocation34_spill] sm:$0xff] }
 0x1ec   : > { %v2254_v42 = vmul.bf16 %v2206_v13, %v6308_v49  ;;  %v1399_v61 = vmul.bf16 %v1351_v36, %v6304_v16  ;;  %v6309_v17 = vmul.bf16 1056980736, %v6293_v26  ;;  %v1626_v53 = vadd.bf16 1048723074, %v1578_v4  ;;  %v3666_v21 = vpop.eup %3665 }
 0x1ed   : > { %v1529_v29 = vadd.bf16 3197288082, %v1481_v56  ;;  %v5194_v24 = vpack.c.bf16 %v707_v62, %v703_v50  ;;  %v6311_v22 = vmul.bf16 1060454197, %v6310_v8  ;;  %v6314_v33 = vmul.bf16 1069105081, %v5122_v27 }
 0x1ee   : > { %3416 = vmatprep.mubr.bf16.mxu0 %v2254_v42  ;;  %v2257_v12 = vmul.bf16 %v2209_v51, %v6309_v17  ;;  %v1905_v47 = vmul.bf16 1069105081, %v5149_v38  ;;  %v1444_v26 = vadd.bf16 1068908470, %v1396_v1  ;;  %v1911_v45 = vmul.bf16 1069105081, %v5159_v44  ;;  %v3668_v63 = vpop.eup %3667 }
 0x1ef   : > { %vm5198_vm3 = vcmp.lt.bf16.partialorder %v6311_v22, 0  ;;  %3669 = vpow.bf16 %v6314_v33  ;;  %v1674_v62 = vmul.bf16 %v1626_v53, %v6287_v41  ;;  %v1577_v19 = vmul.bf16 %v1529_v29, %v6298_v35  ;;  %v6315_v51 = vld [vmem:[#allocation65_spill] sm:$0xff] }
 0x1f0   : > { %3417 = vmatmul.mubr.bf16.gmra.mrb[76].mxu0 %v2257_v12  ;;  %v1447_v50 = vadd.bf16 1068908470, %v1399_v61  ;;  %v5209_v36 = vmul.bf16 1065369472, %v3662_v40  ;;  %v1914_v49 = vmul.bf16 1069105081, %v1791_v31  ;;  %v1492_v27 = vmul.bf16 %v1444_v26, %v6303_v52 }
 0x1f1   : > { %v1073_v42 = vand.u32 2147450879, %v6033_v9  ;;  %v1962_v4 = vmul.bf16 %v6315_v51, %v1674_v62  ;;  %v1625_v44 = vadd.bf16 1048723074, %v1577_v19  ;;  %v6316_v41 = vld [vmem:[#allocation33_spill] sm:$0xff]  ;;  %3671 = vpow.bf16 %v1905_v47  ;;  %v6320_v62 = vld [vmem:[#allocation42_spill] sm:$0xff] }
 0x1f2   : > { %v1495_v56 = vmul.bf16 %v1447_v50, %v6304_v16  ;;  %v6317_v1 = vmul.bf16 1060454197, %v6316_v41  ;;  %v5223_v40 = vmul.bf16 1065369472, %v3664_v20  ;;  %v1540_v17 = vadd.bf16 3197288082, %v1492_v27 }
 0x1f3   : > { %3673 = vpow.bf16 %v1911_v45  ;;  %v2010_v12 = vsub.bf16 1065369472, %v1962_v4  ;;  %v1673_v53 = vmul.bf16 %v1625_v44, %v6298_v35  ;;  %v5227_v22 = vmul.bf16 1065369472, %v3666_v21  ;;  %v6324_v50 = vld [vmem:[#allocation19_spill] sm:$0xff] }
 0x1f4   : > { %vm5219_vm4 = vcmp.lt.bf16.partialorder %v6317_v1, 0  ;;  %v1543_v29 = vadd.bf16 3197288082, %v1495_v56  ;;  %3675 = vpow.bf16 %v1914_v49  ;;  %v1588_v33 = vmul.bf16 %v1540_v17, %v6303_v52  ;;  %v6325_v35 = vld [vmem:[#allocation39_spill] sm:$0xff]  ;;  %v6329_v56 = vld [vmem:[#allocation4_spill] sm:$0xff] }
 0x1f5   : > { %v1121_v26 = vmul.bf16 1051213480, %v1073_v42  ;;  %v6321_v19 = vmul.bf16 1060454197, %v6320_v62  ;;  %v2106_v47 = vsub.bf16 0, %v2010_v12  ;;  %v1961_v27 = vmul.bf16 %v6324_v50, %v1673_v53 }
 0x1f6   : > { %v1745_v45 = vmul.bf16 %v1073_v42, %v1073_v42  ;;  %v1591_v51 = vmul.bf16 %v1543_v29, %v6304_v16  ;;  %v6326_v4 = vmul.bf16 1060454197, %v6325_v35  ;;  %v1636_v49 = vadd.bf16 1048723074, %v1588_v33 }
 0x1f7   : > { %vm5232_vm5 = vcmp.lt.bf16.partialorder %v6321_v19, 0  ;;  %v1293_v1 = vmul.bf16 1065893768, %v6329_v56  ;;  %v711_v17 = vadd.f32 %v4783_v7, %v3948_v0  ;;  %v5248_v19 = vmul.bf16 1065369472, %v3668_v63  ;;  %v6330_v7 = vld [vmem:[#allocation3_spill] sm:$0xff] }
 0x1f8   : > { %vm5240_vm6 = vcmp.lt.bf16.partialorder %v6326_v4, 0  ;;  %v2154_v42 = vsel %vm5198_vm3, %v2106_v47, %v2010_v12  ;;  %v2009_v53 = vsub.bf16 1065369472, %v1961_v27  ;;  %v1639_v29 = vadd.bf16 1048723074, %v1591_v51  ;;  %v6333_v51 = vld [vmem:[#allocation67_spill] sm:$0xff] }
 0x1f9   : > { %v2202_v50 = vadd.bf16 1065369472, %v2154_v42  ;;  %v1684_v4 = vmul.bf16 %v1636_v49, %v6303_v52  ;;  %v1169_v38 = vadd.bf16 1065369472, %v1121_v26  ;;  %v1341_v31 = vadd.bf16 3216687034, %v1293_v1 }
 0x1fa   : > { %v5253_v33 = vpop.eup %3669  ;;  %v2105_v30 = vsub.bf16 0, %v2009_v53  ;;  %v5255_v9 = vsub.bf16 0, %v1745_v45  ;;  %v1687_v44 = vmul.bf16 %v1639_v29, %v6304_v16  ;;  %v1292_v63 = vmul.bf16 1065893768, %v6330_v7 }
 0x1fb   : > { %v6331_v34 = vmul.bf16 1056980736, %v6310_v8  ;;  %v1972_v12 = vmul.bf16 %v4710_v32, %v1684_v4  ;;  %v6332_v47 = vmul.bf16 1060454197, %v5194_v24  ;;  %v1389_v52 = vmul.bf16 %v1341_v31, %v6329_v56 }
 0x1fc   : > { %v2153_v26 = vsel %vm5219_vm4, %v2105_v30, %v2009_v53  ;;  %v1975_v45 = vmul.bf16 %v6333_v51, %v1687_v44  ;;  %v1340_v49 = vadd.bf16 3216687034, %v1292_v63  ;;  %v1306_v16 = vmul.bf16 1065893768, %v4752_v43  ;;  %v5269_v8 = vpop.eup %3671  ;;  %v6335_v63 = vld [vmem:[#allocation69_spill] sm:$0xff] }
 0x1fd   : > { %v2250_v13 = vmul.bf16 %v2202_v50, %v6331_v34  ;;  %v1074_v27 = vand.u32 2147450879, %v6332_v47  ;;  %v2201_v1 = vadd.bf16 1065369472, %v2153_v26  ;;  %v2020_v42 = vsub.bf16 1065369472, %v1972_v12 }
 0x1fe   : > { %3677 = vrcp.bf16 %v1169_v38  ;;  %v1437_v34 = vadd.bf16 1068908470, %v1389_v52  ;;  %v2023_v32 = vsub.bf16 1065369472, %v1975_v45  ;;  %v1388_v29 = vmul.bf16 %v1340_v49, %v6330_v7  ;;  %v5274_v30 = vpop.eup %3673 }
 0x1ff   : > { %2553 = vmatprep.mubr.bf16.mxu1 %v2250_v13  ;;  %v1354_v50 = vadd.bf16 3216687034, %v1306_v16  ;;  %v715_v61 = vadd.f32 %v4798_v6, %v3948_v0  ;;  %v6334_v31 = vmul.bf16 1056980736, %v6316_v41  ;;  %v2116_v53 = vsub.bf16 0, %v2020_v42  ;;  %v5280_v13 = vpop.eup %3675 }
 0x200   : > { %v1485_v4 = vmul.bf16 %v1437_v34, %v6329_v56  ;;  %v1309_v38 = vmul.bf16 1065893768, %v6335_v63  ;;  %v2119_v12 = vsub.bf16 0, %v2023_v32  ;;  %v1436_v47 = vadd.bf16 1068908470, %v1388_v29 }
 0x201   : > { %v2249_v44 = vmul.bf16 %v2201_v1, %v6334_v31  ;;  %v1402_v52 = vmul.bf16 %v1354_v50, %v4752_v43  ;;  %v5283_v26 = vpack.c.bf16 %v715_v61, %v711_v17  ;;  %v2164_v6 = vsel %vm5232_vm5, %v2116_v53, %v2020_v42 }
 0x202   : > { %v1122_v51 = vmul.bf16 1051213480, %v1074_v27  ;;  %v1533_v41 = vadd.bf16 3197288082, %v1485_v4  ;;  %v1357_v45 = vadd.bf16 3216687034, %v1309_v38  ;;  %v2167_v16 = vsel %vm5240_vm6, %v2119_v12, %v2023_v32 }
 0x203   : > { %2554 = vmatmul.mubr.bf16.gmra.mrb[52].mxu1 %v2249_v44  ;;  %v2212_v49 = vadd.bf16 1065369472, %v2164_v6  ;;  %v1484_v1 = vmul.bf16 %v1436_v47, %v6330_v7  ;;  %v1450_v34 = vadd.bf16 1068908470, %v1402_v52  ;;  %v2215_v31 = vadd.bf16 1065369472, %v2167_v16 }
 0x204   : > { %v1746_v29 = vmul.bf16 %v1074_v27, %v1074_v27  ;;  %v1581_v50 = vmul.bf16 %v1533_v41, %v6329_v56  ;;  %v6038_v17 = vmul.bf16 1060454197, %v5283_v26  ;;  %v6336_v61 = vmul.bf16 1056980736, %v6320_v62  ;;  %v6338_v12 = vld [vmem:[#allocation45_spill] sm:$0xff] }
 0x205   : > { %v1532_v42 = vadd.bf16 3197288082, %v1484_v1  ;;  %v1498_v44 = vmul.bf16 %v1450_v34, %v4752_v43  ;;  %v1405_v53 = vmul.bf16 %v1357_v45, %v6335_v63  ;;  %v1920_v21 = vmul.bf16 1069105081, %v5255_v9 }
 0x206   : > { %v2260_v20 = vmul.bf16 %v2212_v49, %v6336_v61  ;;  %v6337_v32 = vmul.bf16 1056980736, %v6325_v35  ;;  %v1629_v38 = vadd.bf16 1048723074, %v1581_v50  ;;  %v5301_v27 = vand.u32 2147450879, %v6038_v17 }
 0x207   : > { %v6339_v47 = vmul.bf16 1060454197, %v6338_v12  ;;  %v1580_v52 = vmul.bf16 %v1532_v42, %v6330_v7  ;;  %v713_v9 = vadd.f32 %v4789_v23, %v3950_v2  ;;  %v1546_v6 = vadd.bf16 3197288082, %v1498_v44 }
 0x208   : > { %v2263_v4 = vmul.bf16 %v2215_v31, %v6337_v32  ;;  %3420 = vmatprep.mubr.bf16.mxu0 %v2260_v20  ;;  %v1453_v35 = vadd.bf16 1068908470, %v1405_v53  ;;  %v1170_v41 = vadd.bf16 1065369472, %v1122_v51  ;;  %v1794_v45 = vsub.bf16 0, %v1746_v29  ;;  %v6342_v20 = vld [vmem:[#allocation43_spill] sm:$0xff] }
 0x209   : > { %vm5305_vm7 = vcmp.lt.bf16.partialorder %v6339_v47, 0  ;;  %v1677_v49 = vmul.bf16 %v1629_v38, %v6329_v56  ;;  %v717_v16 = vadd.f32 %v4810_v39, %v3950_v2  ;;  %v3678_v1 = vpop.eup %3677  ;;  %v1628_v34 = vadd.bf16 1048723074, %v1580_v52  ;;  %v6346_v51 = vld [vmem:[#allocation53_spill] sm:$0xff] }
 0x20a   : > { %3421 = vmatmul.mubr.bf16.gmra.mrb[80].mxu0 %v2263_v4  ;;  %v1594_v31 = vmul.bf16 %v1546_v6, %v4752_v43  ;;  %v1501_v50 = vmul.bf16 %v1453_v35, %v6335_v63  ;;  %v1296_v61 = vmul.bf16 1065893768, %v4764_v54  ;;  %v6343_v23 = vmul.bf16 1060454197, %v6342_v20 }
 0x20b   : > { %v6347_v29 = vmul.bf16 1060454197, %v6346_v51  ;;  %3679 = vpow.bf16 %v1920_v21  ;;  %v1965_v39 = vmul.bf16 %v4756_v58, %v1677_v49  ;;  %v1124_v44 = vmul.bf16 1051213480, %v5301_v27 }
 0x20c   : > { %vm5320_vm8 = vcmp.lt.bf16.partialorder %v6343_v23, 0  ;;  %v5332_v53 = vpack.c.bf16 %v717_v16, %v713_v9  ;;  %v1676_v32 = vmul.bf16 %v1628_v34, %v6330_v7  ;;  %v1642_v4 = vadd.bf16 1048723074, %v1594_v31  ;;  %v6350_v9 = vld [vmem:[#allocation49_spill] sm:$0xff] }
 0x20d   : > { %vm5326_vm9 = vcmp.lt.bf16.partialorder %v6347_v29, 0  ;;  %v1549_v38 = vadd.bf16 3197288082, %v1501_v50  ;;  %v1344_v47 = vadd.bf16 3216687034, %v1296_v61  ;;  %3681 = vrcp.bf16 %v1170_v41 }
 0x20e   : > { %v1923_v6 = vmul.bf16 1069105081, %v1794_v45  ;;  %v2013_v35 = vsub.bf16 1065369472, %v1965_v39  ;;  %v1964_v23 = vmul.bf16 %v4718_v48, %v1676_v32  ;;  %v1690_v21 = vmul.bf16 %v1642_v4, %v4752_v43 }
 0x20f   : > { %v1597_v58 = vmul.bf16 %v1549_v38, %v6335_v63  ;;  %v6039_v49 = vmul.bf16 1060454197, %v5332_v53  ;;  %v6351_v16 = vmul.bf16 1060454197, %v6350_v9  ;;  %v1172_v31 = vadd.bf16 1065369472, %v1124_v44 }
 0x210   : > { %v2109_v34 = vsub.bf16 0, %v2013_v35  ;;  %v1392_v41 = vmul.bf16 %v1344_v47, %v4764_v54  ;;  %v1295_v45 = vmul.bf16 1065893768, %v4754_v10  ;;  %v2012_v50 = vsub.bf16 1065369472, %v1964_v23 }
 0x211   : > { %vm5342_vm10 = vcmp.lt.bf16.partialorder %v6351_v16, 0  ;;  %v1978_v48 = vmul.bf16 %v4819_v28, %v1690_v21  ;;  %v1645_v43 = vadd.bf16 1048723074, %v1597_v58  ;;  %v1077_v61 = vand.u32 2147450879, %v6039_v49 }
 0x212   : > { %v2157_v29 = vsel %vm5305_vm7, %v2109_v34, %v2013_v35  ;;  %v1748_v39 = vmul.bf16 %v5301_v27, %v5301_v27  ;;  %v1440_v32 = vadd.bf16 1068908470, %v1392_v41  ;;  %v1343_v4 = vadd.bf16 3216687034, %v1295_v45 }
 0x213   : > { %v2205_v44 = vadd.bf16 1065369472, %v2157_v29  ;;  %v2108_v38 = vsub.bf16 0, %v2012_v50  ;;  %v2026_v47 = vsub.bf16 1065369472, %v1978_v48  ;;  %v1693_v16 = vmul.bf16 %v1645_v43, %v6335_v63 }
 0x214   : > { %3683 = vrcp.bf16 %v1172_v31  ;;  %v1125_v23 = vmul.bf16 1051213480, %v1077_v61  ;;  %v1488_v28 = vmul.bf16 %v1440_v32, %v4764_v54  ;;  %v1391_v21 = vmul.bf16 %v1343_v4, %v4754_v10 }
 0x215   : > { %v6354_v58 = vmul.bf16 1056980736, %v6338_v12  ;;  %v2156_v35 = vsel %vm5320_vm8, %v2108_v38, %v2012_v50  ;;  %v2122_v27 = vsub.bf16 0, %v2026_v47  ;;  %v1981_v34 = vmul.bf16 %v4812_v57, %v1693_v16 }
 0x216   : > { %v5363_v41 = vmul.bf16 1065369472, %v3678_v1  ;;  %3685 = vpow.bf16 %v1923_v6  ;;  %v2204_v45 = vadd.bf16 1065369472, %v2156_v35  ;;  %v1173_v63 = vadd.bf16 1065369472, %v1125_v23  ;;  %v5365_v31 = vpop.eup %3679 }
 0x217   : > { %v2253_v62 = vmul.bf16 %v2205_v44, %v6354_v58  ;;  %v2170_v48 = vsel %vm5326_vm9, %v2122_v27, %v2026_v47  ;;  %v2029_v43 = vsub.bf16 1065369472, %v1981_v34  ;;  %v1536_v12 = vadd.bf16 3197288082, %v1488_v28  ;;  %v6357_v58 = vld [vmem:[#allocation56_spill] sm:$0xff] }
 0x218   : > { %v1439_v29 = vadd.bf16 1068908470, %v1391_v21  ;;  %v6355_v42 = vmul.bf16 1056980736, %v6342_v20  ;;  %v2218_v32 = vadd.bf16 1065369472, %v2170_v48  ;;  %v1749_v57 = vmul.bf16 %v1077_v61, %v1077_v61  ;;  %v3682_v1 = vpop.eup %3681 }
 0x219   : > { %2561 = vmatprep.mubr.bf16.mxu1 %v2253_v62  ;;  %v5371_v4 = vsub.bf16 0, %v1748_v39  ;;  %v2125_v6 = vsub.bf16 0, %v2029_v43  ;;  %3687 = vrcp.bf16 %v1173_v63  ;;  %v1584_v44 = vmul.bf16 %v1536_v12, %v4764_v54  ;;  %v6362_v34 = vld [vmem:[#allocation8_spill] sm:$0xff] }
 0x21a   : > { %v2252_v50 = vmul.bf16 %v2204_v45, %v6355_v42  ;;  %v1487_v38 = vmul.bf16 %v1439_v29, %v4754_v10  ;;  %v6356_v56 = vmul.bf16 1056980736, %v6346_v51  ;;  %v721_v16 = vadd.f32 %v4871_v3, %v3948_v0 }
 0x21b   : > { %v723_v20 = vadd.f32 %v4888_v55, %v3950_v2  ;;  %v1312_v39 = vmul.bf16 1065893768, %v4800_v37  ;;  %v2173_v61 = vsel %vm5342_vm10, %v2125_v6, %v2029_v43  ;;  %v1632_v23 = vadd.bf16 1048723074, %v1584_v44  ;;  %v6361_v55 = vld [vmem:[#allocation5_spill] sm:$0xff]  ;;  %v6366_v44 = vld [vmem:[#allocation55_spill] sm:$0xff] }
 0x21c   : > { %2562 = vmatmul.mubr.bf16.gmra.mrb[56].mxu1 %v2252_v50  ;;  %v2266_v47 = vmul.bf16 %v2218_v32, %v6356_v56  ;;  %v1535_v28 = vadd.bf16 3197288082, %v1487_v38  ;;  %v725_v21 = vadd.f32 %v4935_v59, %v3948_v0  ;;  %v6358_v62 = vmul.bf16 1060454197, %v6357_v58 }
 0x21d   : > { %v2221_v3 = vadd.bf16 1065369472, %v2173_v61  ;;  %v1360_v35 = vadd.bf16 3216687034, %v1312_v39  ;;  %v1315_v27 = vmul.bf16 1065893768, %v6361_v55  ;;  %v727_v7 = vadd.f32 %v6362_v34, %v3950_v2 }
 0x21e   : > { %vm5388_vm11 = vcmp.lt.bf16.partialorder %v6358_v62, 0  ;;  %3424 = vmatprep.mubr.bf16.mxu0 %v2266_v47  ;;  %v5395_v45 = vsub.bf16 0, %v1749_v57  ;;  %v1680_v63 = vmul.bf16 %v1632_v23, %v4764_v54  ;;  %v1583_v0 = vmul.bf16 %v1535_v28, %v4754_v10  ;;  %v6365_v2 = vld [vmem:[#allocation26_spill] sm:$0xff] }
 0x21f   : > { %v5399_v59 = vpack.c.bf16 %v725_v21, %v721_v16  ;;  %v6363_v48 = vmul.bf16 1056980736, %v6350_v9  ;;  %v1408_v12 = vmul.bf16 %v1360_v35, %v4800_v37  ;;  %v1363_v29 = vadd.bf16 3216687034, %v1315_v27  ;;  %v3684_v50 = vpop.eup %3683  ;;  %v6370_v27 = vld [vmem:[#allocation27_spill] sm:$0xff] }
 0x220   : > { %v5404_v42 = vpack.c.bf16 %v727_v7, %v723_v20  ;;  %v5406_v32 = vmul.bf16 1065369472, %v3682_v1  ;;  %v1968_v57 = vmul.bf16 %v6365_v2, %v1680_v63  ;;  %v1631_v6 = vadd.bf16 1048723074, %v1583_v0 }
 0x221   : > { %v2269_v43 = vmul.bf16 %v2221_v3, %v6363_v48  ;;  %v6037_v54 = vmul.bf16 1060454197, %v5399_v59  ;;  %v6367_v38 = vmul.bf16 1060454197, %v6366_v44  ;;  %v1929_v9 = vmul.bf16 1069105081, %v5371_v4  ;;  %v5419_v20 = vpop.eup %3685 }
 0x222   : > { %6364 = vst [vmem:[#allocation47_spill] sm:$0xff] %v5404_v42  ;;  %v1456_v47 = vadd.bf16 1068908470, %v1408_v12  ;;  %v1411_v16 = vmul.bf16 %v1363_v29, %v6361_v55  ;;  %v6036_v1 = vmul.bf16 1060454197, %v5404_v42  ;;  %v1679_v23 = vmul.bf16 %v1631_v6, %v4754_v10  ;;  %v6371_v12 = vld [vmem:[#allocation76_spill] sm:$0xff] }
 0x223   : > { %vm5412_vm12 = vcmp.lt.bf16.partialorder %v6367_v38, 0  ;;  %3425 = vmatmul.mubr.bf16.gmra.mrb[84].mxu0 %v2269_v43  ;;  %v1932_v39 = vmul.bf16 1069105081, %v5395_v45  ;;  %v2016_v61 = vsub.bf16 1065369472, %v1968_v57 }
 0x224   : > { %v1079_v28 = vand.u32 2147450879, %v6037_v54  ;;  %v5425_v21 = vmul.bf16 1065369472, %v3684_v50  ;;  %v1504_v4 = vmul.bf16 %v1456_v47, %v4800_v37  ;;  %v1459_v62 = vadd.bf16 1068908470, %v1411_v16  ;;  %v3688_v0 = vpop.eup %3687 }
 0x225   : > { %v1080_v3 = vand.u32 2147450879, %v6036_v1  ;;  %v2112_v35 = vsub.bf16 0, %v2016_v61  ;;  %v1967_v34 = vmul.bf16 %v6370_v27, %v1679_v23  ;;  %v1299_v29 = vmul.bf16 1065893768, %v6371_v12  ;;  %v6372_v27 = vld [vmem:[#allocation63_spill] sm:$0xff] }
 0x226   : > { %v1127_v7 = vmul.bf16 1051213480, %v1079_v28  ;;  %v1751_v63 = vmul.bf16 %v1079_v28, %v1079_v28  ;;  %v1552_v48 = vadd.bf16 3197288082, %v1504_v4  ;;  %v1507_v10 = vmul.bf16 %v1459_v62, %v6361_v55 }
 0x227   : > { %v1128_v43 = vmul.bf16 1051213480, %v1080_v3  ;;  %v2160_v50 = vsel %vm5388_vm11, %v2112_v35, %v2016_v61  ;;  %v2015_v2 = vsub.bf16 1065369472, %v1967_v34  ;;  %v6373_v28 = vmul.bf16 1060454197, %v6372_v27 }
 0x228   : > { %v1175_v57 = vadd.bf16 1065369472, %v1127_v7  ;;  %v1799_v6 = vsub.bf16 0, %v1751_v63  ;;  %v2208_v38 = vadd.bf16 1065369472, %v2160_v50  ;;  %v1600_v47 = vmul.bf16 %v1552_v48, %v4800_v37  ;;  %v6377_v63 = vld [vmem:[#allocation21_spill] sm:$0xff] }
 0x229   : > { %v1555_v16 = vadd.bf16 3197288082, %v1507_v10  ;;  %v1176_v23 = vadd.bf16 1065369472, %v1128_v43  ;;  %vm5438_vm13 = vcmp.lt.bf16.partialorder %v6373_v28, 0  ;;  %v2111_v1 = vsub.bf16 0, %v2015_v2 }
 0x22a   : > { %v5442_v62 = vmul.bf16 1065369472, %v3688_v0  ;;  %3689 = vrcp.bf16 %v1175_v57  ;;  %v1752_v51 = vmul.bf16 %v1080_v3, %v1080_v3  ;;  %v6376_v61 = vmul.bf16 1056980736, %v6357_v58 }
 0x22b   : > { %v1648_v34 = vadd.bf16 1048723074, %v1600_v47  ;;  %v1603_v7 = vmul.bf16 %v1555_v16, %v6361_v55  ;;  %3691 = vrcp.bf16 %v1176_v23  ;;  %v6378_v48 = vmul.bf16 1060454197, %v6377_v63  ;;  %v6381_v47 = vld [vmem:[#allocation6_spill] sm:$0xff] }
 0x22c   : > { %v2256_v35 = vmul.bf16 %v2208_v38, %v6376_v61  ;;  %v2159_v0 = vsel %vm5412_vm12, %v2111_v1, %v2015_v2  ;;  %v1938_v43 = vmul.bf16 1069105081, %v1799_v6  ;;  %v5455_v50 = vsub.bf16 0, %v1752_v51  ;;  %v6383_v6 = vld [vmem:[#allocation32_spill] sm:$0xff] }
 0x22d   : > { %vm5449_vm14 = vcmp.lt.bf16.partialorder %v6378_v48, 0  ;;  %v1347_v3 = vadd.bf16 3216687034, %v1299_v29  ;;  %v2207_v58 = vadd.bf16 1065369472, %v2159_v0  ;;  %v1696_v57 = vmul.bf16 %v1648_v34, %v4800_v37  ;;  %v6384_v0 = vld [vmem:[#allocation72_spill] sm:$0xff] }
 0x22e   : > { %2569 = vmatprep.mubr.bf16.mxu1 %v2256_v35  ;;  %v1651_v38 = vadd.bf16 1048723074, %v1603_v7  ;;  %v1298_v16 = vmul.bf16 1065893768, %v6381_v47  ;;  %v1318_v61 = vmul.bf16 1065893768, %v4997_v5  ;;  %3693 = vpow.bf16 %v1929_v9 }
 0x22f   : > { %v1395_v28 = vmul.bf16 %v1347_v3, %v6371_v12  ;;  %v1321_v56 = vmul.bf16 1065893768, %v4986_v46  ;;  %v6382_v1 = vmul.bf16 1056980736, %v6366_v44  ;;  %v1984_v29 = vmul.bf16 %v6383_v6, %v1696_v57 }
 0x230   : > { %v1699_v51 = vmul.bf16 %v1651_v38, %v6361_v55  ;;  %v1346_v35 = vadd.bf16 3216687034, %v1298_v16  ;;  %v1366_v34 = vadd.bf16 3216687034, %v1318_v61  ;;  %v1302_v17 = vmul.bf16 1065893768, %v5024_v11 }
 0x231   : > { %v2255_v2 = vmul.bf16 %v2207_v58, %v6382_v1  ;;  %v1443_v37 = vadd.bf16 1068908470, %v1395_v28  ;;  %v1369_v7 = vadd.bf16 3216687034, %v1321_v56  ;;  %v2032_v48 = vsub.bf16 1065369472, %v1984_v29 }
 0x232   : > { %v1987_v3 = vmul.bf16 %v6384_v0, %v1699_v51  ;;  %v1394_v54 = vmul.bf16 %v1346_v35, %v6381_v47  ;;  %v1414_v58 = vmul.bf16 %v1366_v34, %v4997_v5  ;;  %v1301_v55 = vmul.bf16 1065893768, %v5004_v15 }
 0x233   : > { %2570 = vmatmul.mubr.bf16.gmra.mrb[60].mxu1 %v2255_v2  ;;  %v1491_v44 = vmul.bf16 %v1443_v37, %v6371_v12  ;;  %v1417_v57 = vmul.bf16 %v1369_v7, %v4986_v46  ;;  %3695 = vpow.bf16 %v1932_v39  ;;  %v2128_v9 = vsub.bf16 0, %v2032_v48 }
 0x234   : > { %v2035_v38 = vsub.bf16 1065369472, %v1987_v3  ;;  %v1442_v16 = vadd.bf16 1068908470, %v1394_v54  ;;  %3697 = vpow.bf16 %v1938_v43  ;;  %v1462_v61 = vadd.bf16 1068908470, %v1414_v58 }
 0x235   : > { %v1539_v28 = vadd.bf16 3197288082, %v1491_v44  ;;  %v1465_v56 = vadd.bf16 1068908470, %v1417_v57  ;;  %v3690_v1 = vpop.eup %3689  ;;  %v2176_v2 = vsel %vm5438_vm13, %v2128_v9, %v2032_v48  ;;  %v1350_v51 = vadd.bf16 3216687034, %v1302_v17 }
 0x236   : > { %v2131_v6 = vsub.bf16 0, %v2035_v38  ;;  %v1490_v29 = vmul.bf16 %v1442_v16, %v6381_v47  ;;  %v3692_v35 = vpop.eup %3691  ;;  %v2224_v37 = vadd.bf16 1065369472, %v2176_v2  ;;  %v5479_v34 = vmul.bf16 1065369472, %v3690_v1  ;;  %v6386_v58 = vld [vmem:[#allocation66_spill] sm:$0xff] }
 0x237   : > { %v1587_v45 = vmul.bf16 %v1539_v28, %v6371_v12  ;;  %v1510_v54 = vmul.bf16 %v1462_v61, %v4997_v5  ;;  %v5485_v43 = vmul.bf16 1065369472, %v3692_v35  ;;  %v1513_v4 = vmul.bf16 %v1465_v56, %v4986_v46 }
 0x238   : > { %v2179_v39 = vsel %vm5449_vm14, %v2131_v6, %v2035_v38  ;;  %v1538_v7 = vadd.bf16 3197288082, %v1490_v29  ;;  %v6385_v48 = vmul.bf16 1056980736, %v6372_v27  ;;  %v6387_v57 = vmul.bf16 1060454197, %v6386_v58 }
 0x239   : > { %v2227_v17 = vadd.bf16 1065369472, %v2179_v39  ;;  %v1635_v3 = vadd.bf16 1048723074, %v1587_v45  ;;  %v1558_v44 = vadd.bf16 3197288082, %v1510_v54  ;;  %v1398_v16 = vmul.bf16 %v1350_v51, %v5024_v11  ;;  %v5503_v6 = vpop.eup %3693 }
 0x23a   : > { %v2272_v0 = vmul.bf16 %v2224_v37, %v6385_v48  ;;  %vm5492_vm15 = vcmp.lt.bf16.partialorder %v6387_v57, 0  ;;  %v1586_v10 = vmul.bf16 %v1538_v7, %v6381_v47  ;;  %v1561_v38 = vadd.bf16 3197288082, %v1513_v4  ;;  %v6391_v29 = vld [vmem:[#allocation70_spill] sm:$0xff]  ;;  %v6395_v54 = vld [vmem:[#allocation64_spill] sm:$0xff]  ;;  %v6399_v7 = vld [vmem:[#allocation23_spill] sm:$0xff] }
 0x23b   : > { %v1349_v28 = vadd.bf16 3216687034, %v1301_v55  ;;  %v6390_v61 = vmul.bf16 1056980736, %v6377_v63  ;;  %v1683_v56 = vmul.bf16 %v1635_v3, %v6371_v12  ;;  %v1606_v1 = vmul.bf16 %v1558_v44, %v4997_v5  ;;  %v6404_v57 = vld [vmem:[#allocation37_spill] sm:$0xff] }
 0x23c   : > { %3428 = vmatprep.mubr.bf16.mxu0 %v2272_v0  ;;  %v1305_v2 = vmul.bf16 1065893768, %v5107_v25  ;;  %v6392_v35 = vmul.bf16 1060454197, %v6391_v29  ;;  %v1634_v51 = vadd.bf16 1048723074, %v1586_v10  ;;  %v1609_v55 = vmul.bf16 %v1561_v38, %v4986_v46 }
 0x23d   : > { %v2275_v27 = vmul.bf16 %v2227_v17, %v6390_v61  ;;  %v1446_v45 = vadd.bf16 1068908470, %v1398_v16  ;;  %v1397_v63 = vmul.bf16 %v1349_v28, %v5004_v15  ;;  %v6396_v12 = vmul.bf16 1060454197, %v6395_v54  ;;  %v6403_v0 = vld [vmem:[#allocation74_spill] sm:$0xff] }
 0x23e   : > { %vm5507_vm0 = vcmp.lt.bf16.partialorder %v6392_v35, 0  ;;  %v6400_v4 = vmul.bf16 1060454197, %v6399_v7  ;;  %v1971_v17 = vmul.bf16 %v6403_v0, %v1683_v56  ;;  %v1654_v3 = vadd.bf16 1048723074, %v1606_v1  ;;  %v5529_v35 = vpop.eup %3695  ;;  %v6405_v56 = vld [vmem:[#allocation28_spill] sm:$0xff] }
 0x23f   : > { %vm5515_vm1 = vcmp.lt.bf16.partialorder %v6396_v12, 0  ;;  %3429 = vmatmul.mubr.bf16.gmra.mrb[88].mxu0 %v2275_v27  ;;  %v1353_v44 = vadd.bf16 3216687034, %v1305_v2  ;;  %v1304_v10 = vmul.bf16 1065893768, %v6404_v57  ;;  %v1682_v38 = vmul.bf16 %v1634_v51, %v6381_v47  ;;  %v5533_v49 = vpop.eup %3697 }
 0x240   : > { %vm5521_vm2 = vcmp.lt.bf16.partialorder %v6400_v4, 0  ;;  %v1657_v16 = vadd.bf16 1048723074, %v1609_v55  ;;  %v1494_v28 = vmul.bf16 %v1446_v45, %v5024_v11  ;;  %v1445_v61 = vadd.bf16 1068908470, %v1397_v63  ;;  %v6406_v55 = vld [vmem:[#allocation10_spill] sm:$0xff] }
 0x241   : > { %v2019_v12 = vsub.bf16 1065369472, %v1971_v17  ;;  %v1702_v4 = vmul.bf16 %v1654_v3, %v4997_v5  ;;  %v1401_v52 = vmul.bf16 %v1353_v44, %v5107_v25  ;;  %v1352_v27 = vadd.bf16 3216687034, %v1304_v10  ;;  %v6407_v5 = vld [vmem:[#allocation7_spill] sm:$0xff] }
 0x242   : > { %v1970_v1 = vmul.bf16 %v6405_v56, %v1682_v38  ;;  %v1705_v2 = vmul.bf16 %v1657_v16, %v4986_v46  ;;  %v1542_v0 = vadd.bf16 3197288082, %v1494_v28  ;;  %v1493_v47 = vmul.bf16 %v1445_v61, %v5004_v15 }
 0x243   : > { %v2115_v51 = vsub.bf16 0, %v2019_v12  ;;  %v1990_v45 = vmul.bf16 %v6406_v55, %v1702_v4  ;;  %v1449_v63 = vadd.bf16 1068908470, %v1401_v52  ;;  %v1400_v17 = vmul.bf16 %v1352_v27, %v6404_v57  ;;  %v6408_v55 = vld [vmem:[#allocation31_spill] sm:$0xff] }
 0x244   : > { %v2018_v23 = vsub.bf16 1065369472, %v1970_v1  ;;  %v1993_v3 = vmul.bf16 %v6407_v5, %v1705_v2  ;;  %v1590_v44 = vmul.bf16 %v1542_v0, %v5024_v11  ;;  %v1541_v10 = vadd.bf16 3197288082, %v1493_v47 }
 0x245   : > { %v2163_v38 = vsel %vm5492_vm15, %v2115_v51, %v2019_v12  ;;  %v2038_v56 = vsub.bf16 1065369472, %v1990_v45  ;;  %v1497_v46 = vmul.bf16 %v1449_v63, %v5107_v25  ;;  %v1448_v16 = vadd.bf16 1068908470, %v1400_v17  ;;  %v6413_v17 = vld [vmem:[#allocation71_spill] sm:$0xff] }
 0x246   : > { %v2211_v28 = vadd.bf16 1065369472, %v2163_v38  ;;  %v2114_v61 = vsub.bf16 0, %v2018_v23  ;;  %v2041_v42 = vsub.bf16 1065369472, %v1993_v3  ;;  %v1589_v52 = vmul.bf16 %v1541_v10, %v5004_v15 }
 0x247   : > { %v2134_v4 = vsub.bf16 0, %v2038_v56  ;;  %v1638_v27 = vadd.bf16 1048723074, %v1590_v44  ;;  %v1545_v1 = vadd.bf16 3197288082, %v1497_v46  ;;  %v1496_v2 = vmul.bf16 %v1448_v16, %v6404_v57 }
 0x248   : > { %v6409_v0 = vmul.bf16 1060454197, %v6408_v55  ;;  %v6412_v9 = vmul.bf16 1056980736, %v6386_v58  ;;  %v2162_v51 = vsel %vm5515_vm1, %v2114_v61, %v2018_v23  ;;  %v2137_v45 = vsub.bf16 0, %v2041_v42 }
 0x249   : > { %v1637_v63 = vadd.bf16 1048723074, %v1589_v52  ;;  %v6414_v5 = vmul.bf16 1060454197, %v6413_v17  ;;  %v2210_v44 = vadd.bf16 1065369472, %v2162_v51  ;;  %v2182_v10 = vsel %vm5507_vm0, %v2134_v4, %v2038_v56 }
 0x24a   : > { %vm5549_vm3 = vcmp.lt.bf16.partialorder %v6409_v0, 0  ;;  %v2259_v12 = vmul.bf16 %v2211_v28, %v6412_v9  ;;  %v1686_v38 = vmul.bf16 %v1638_v27, %v5024_v11  ;;  %v1593_v58 = vmul.bf16 %v1545_v1, %v5107_v25  ;;  %v6418_v0 = vld [vmem:[#allocation36_spill] sm:$0xff]  ;;  %v6419_v56 = vld [vmem:[#allocation75_spill] sm:$0xff] }
 0x24b   : > { %vm5559_vm4 = vcmp.lt.bf16.partialorder %v6414_v5, 0  ;;  %v2230_v46 = vadd.bf16 1065369472, %v2182_v10  ;;  %v2185_v23 = vsel %vm5521_vm2, %v2137_v45, %v2041_v42  ;;  %v1685_v39 = vmul.bf16 %v1637_v63, %v5004_v15  ;;  %v6424_v42 = vld [vmem:[#allocation9_spill] sm:$0xff] }
 0x24c   : > { %2577 = vmatprep.mubr.bf16.mxu1 %v2259_v12  ;;  %v1544_v16 = vadd.bf16 3197288082, %v1496_v2  ;;  %v6417_v28 = vmul.bf16 1056980736, %v6395_v54  ;;  %v2233_v52 = vadd.bf16 1065369472, %v2185_v23  ;;  %v1974_v9 = vmul.bf16 %v6418_v0, %v1686_v38 }
 0x24d   : > { %v1641_v37 = vadd.bf16 1048723074, %v1593_v58  ;;  %v6420_v4 = vmul.bf16 1060454197, %v6419_v56  ;;  %v6423_v27 = vmul.bf16 1056980736, %v6391_v29  ;;  %v1973_v1 = vmul.bf16 %v6424_v42, %v1685_v39 }
 0x24e   : > { %v2258_v61 = vmul.bf16 %v2210_v44, %v6417_v28  ;;  %v1592_v15 = vmul.bf16 %v1544_v16, %v6404_v57  ;;  %v1308_v54 = vmul.bf16 1065893768, %v5223_v40  ;;  %v6425_v2 = vmul.bf16 1056980736, %v6399_v7  ;;  %v6427_v38 = vld [vmem:[#allocation73_spill] sm:$0xff]  ;;  %v6431_v23 = vld [vmem:[#allocation40_spill] sm:$0xff] }
 0x24f   : > { %vm5575_vm5 = vcmp.lt.bf16.partialorder %v6420_v4, 0  ;;  %v2278_v48 = vmul.bf16 %v2230_v46, %v6423_v27  ;;  %v2022_v51 = vsub.bf16 1065369472, %v1974_v9  ;;  %v1689_v45 = vmul.bf16 %v1641_v37, %v5107_v25  ;;  %v6432_v42 = vld [vmem:[#allocation41_spill] sm:$0xff] }
 0x250   : > { %2578 = vmatmul.mubr.bf16.gmra.mrb[64].mxu1 %v2258_v61  ;;  %v2281_v12 = vmul.bf16 %v2233_v52, %v6425_v2  ;;  %v1307_v63 = vmul.bf16 1065893768, %v5209_v36  ;;  %v6426_v5 = vmul.bf16 1069105081, %v5455_v50  ;;  %v2021_v29 = vsub.bf16 1065369472, %v1973_v1 }
 0x251   : > { %3432 = vmatprep.mubr.bf16.mxu0 %v2278_v48  ;;  %v1640_v44 = vadd.bf16 1048723074, %v1592_v15  ;;  %v1356_v10 = vadd.bf16 3216687034, %v1308_v54  ;;  %v6428_v58 = vmul.bf16 1060454197, %v6427_v38  ;;  %v1977_v39 = vmul.bf16 %v6431_v23, %v1689_v45 }
 0x252   : > { %3699 = vpow.bf16 %v6426_v5  ;;  %3433 = vmatmul.mubr.bf16.gmra.mrb[92].mxu0 %v2281_v12  ;;  %v2118_v7 = vsub.bf16 0, %v2022_v51  ;;  %v1355_v25 = vadd.bf16 3216687034, %v1307_v63  ;;  %v1311_v16 = vmul.bf16 1065893768, %v5248_v19 }
 0x253   : > { %vm5592_vm6 = vcmp.lt.bf16.partialorder %v6428_v58, 0  ;;  %v2117_v28 = vsub.bf16 0, %v2021_v29  ;;  %v1688_v50 = vmul.bf16 %v1640_v44, %v6404_v57  ;;  %v1404_v61 = vmul.bf16 %v1356_v10, %v5223_v40 }
 0x254   : > { %v1310_v52 = vmul.bf16 1065893768, %v5227_v22  ;;  %v2166_v0 = vsel %vm5549_vm3, %v2118_v7, %v2022_v51  ;;  %v2025_v9 = vsub.bf16 1065369472, %v1977_v39  ;;  %v1403_v37 = vmul.bf16 %v1355_v25, %v5209_v36 }
 0x255   : > { %v1359_v4 = vadd.bf16 3216687034, %v1311_v16  ;;  %v2214_v27 = vadd.bf16 1065369472, %v2166_v0  ;;  %v2165_v48 = vsel %vm5559_vm4, %v2117_v28, %v2021_v29  ;;  %v1976_v1 = vmul.bf16 %v6432_v42, %v1688_v50 }
 0x256   : > { %v1452_v15 = vadd.bf16 1068908470, %v1404_v61  ;;  %v2213_v54 = vadd.bf16 1065369472, %v2165_v48  ;;  %v2121_v57 = vsub.bf16 0, %v2025_v9  ;;  %vm2931_vm14 = vcmask 781312  }
 0x257   : > { %v1451_v2 = vadd.bf16 1068908470, %v1403_v37  ;;  %v1407_v12 = vmul.bf16 %v1359_v4, %v5248_v19  ;;  %v6433_v45 = vmul.bf16 1056980736, %v6408_v55  ;;  %v2024_v51 = vsub.bf16 1065369472, %v1976_v1 }
 0x258   : > { %v1500_v63 = vmul.bf16 %v1452_v15, %v5223_v40  ;;  %v1358_v5 = vadd.bf16 3216687034, %v1310_v52  ;;  %v6434_v44 = vmul.bf16 1056980736, %v6413_v17  ;;  %v2169_v3 = vsel %vm5575_vm5, %v2121_v57, %v2025_v9 }
 0x259   : > { %v2262_v47 = vmul.bf16 %v2214_v27, %v6433_v45  ;;  %v1499_v29 = vmul.bf16 %v1451_v2, %v5209_v36  ;;  %v1455_v58 = vadd.bf16 1068908470, %v1407_v12  ;;  %v2217_v7 = vadd.bf16 1065369472, %v2169_v3 }
 0x25a   : > { %v2261_v10 = vmul.bf16 %v2213_v54, %v6434_v44  ;;  %v2120_v23 = vsub.bf16 0, %v2024_v51  ;;  %v1548_v39 = vadd.bf16 3197288082, %v1500_v63  ;;  %v1406_v55 = vmul.bf16 %v1358_v5, %v5227_v22 }
 0x25b   : > { %2585 = vmatprep.mubr.bf16.mxu1 %v2262_v47  ;;  %v1547_v25 = vadd.bf16 3197288082, %v1499_v29  ;;  %v1503_v16 = vmul.bf16 %v1455_v58, %v5248_v19  ;;  %v1314_v28 = vmul.bf16 1065893768, %v5406_v32  ;;  %v1313_v17 = vmul.bf16 1065893768, %v5363_v41 }
 0x25c   : > { %2586 = vmatmul.mubr.bf16.gmra.mrb[68].mxu1 %v2261_v10  ;;  %v6435_v11 = vmul.bf16 1056980736, %v6419_v56  ;;  %v2168_v61 = vsel %vm5592_vm6, %v2120_v23, %v2024_v51  ;;  %v1596_v52 = vmul.bf16 %v1548_v39, %v5223_v40  ;;  %v1454_v0 = vadd.bf16 1068908470, %v1406_v55  ;;  %v6440_v51 = vld [vmem:[#allocation38_spill] sm:$0xff] }
 0x25d   : > { %v5625_v9 = vpop.eup %3699  ;;  %v2216_v37 = vadd.bf16 1065369472, %v2168_v61  ;;  %v1595_v4 = vmul.bf16 %v1547_v25, %v5209_v36  ;;  %v1551_v27 = vadd.bf16 3197288082, %v1503_v16  ;;  %v1362_v48 = vadd.bf16 3216687034, %v1314_v28 }
 0x25e   : > { %v2265_v50 = vmul.bf16 %v2217_v7, %v6435_v11  ;;  %v1644_v42 = vadd.bf16 1048723074, %v1596_v52  ;;  %v1502_v1 = vmul.bf16 %v1454_v0, %v5227_v22  ;;  %v1361_v15 = vadd.bf16 3216687034, %v1313_v17 }
 0x25f   : > { %v1317_v56 = vmul.bf16 1065893768, %v5442_v62  ;;  %v6436_v46 = vmul.bf16 1060454197, %v4988_v18  ;;  %v6439_v57 = vmul.bf16 1056980736, %v6427_v38  ;;  %v1599_v45 = vmul.bf16 %v1551_v27, %v5248_v19 }
 0x260   : > { %2593 = vmatprep.mubr.bf16.mxu1 %v2265_v50  ;;  %v1643_v12 = vadd.bf16 1048723074, %v1595_v4  ;;  %v1410_v47 = vmul.bf16 %v1362_v48, %v5406_v32  ;;  %v6441_v63 = vmul.bf16 1060454197, %v6440_v51  ;;  %v1692_v44 = vmul.bf16 %v1644_v42, %v5223_v40 }
 0x261   : > { %vm5632_vm7 = vcmp.lt.bf16.partialorder %v6436_v46, 0  ;;  %v2264_v2 = vmul.bf16 %v2216_v37, %v6439_v57  ;;  %v1550_v10 = vadd.bf16 3197288082, %v1502_v1  ;;  %v1409_v3 = vmul.bf16 %v1361_v15, %v5363_v41 }
 0x262   : > { %vm5642_vm8 = vcmp.lt.bf16.partialorder %v6441_v63, 0  ;;  %v1365_v29 = vadd.bf16 3216687034, %v1317_v56  ;;  %v1691_v38 = vmul.bf16 %v1643_v12, %v5209_v36  ;;  %v1647_v58 = vadd.bf16 1048723074, %v1599_v45 }
 0x263   : > { %v1458_v7 = vadd.bf16 1068908470, %v1410_v47  ;;  %v1316_v23 = vmul.bf16 1065893768, %v5425_v21  ;;  %v6444_v39 = vmul.bf16 1060454197, %v5114_v60  ;;  %v1980_v25 = vmul.bf16 %v5269_v8, %v1692_v44 }
 0x264   : > { %v1598_v40 = vmul.bf16 %v1550_v10, %v5227_v22  ;;  %v1457_v16 = vadd.bf16 1068908470, %v1409_v3  ;;  %v1413_v28 = vmul.bf16 %v1365_v29, %v5442_v62  ;;  %2594 = vmatmul.mubr.bf16.gmra.mrb[72].mxu1 %v2264_v2  ;;  %v1979_v36 = vmul.bf16 %v5253_v33, %v1691_v38 }
 0x265   : > { %vm5652_vm9 = vcmp.lt.bf16.partialorder %v6444_v39, 0  ;;  %v1695_v17 = vmul.bf16 %v1647_v58, %v5248_v19  ;;  %v1506_v11 = vmul.bf16 %v1458_v7, %v5406_v32  ;;  %v1364_v50 = vadd.bf16 3216687034, %v1316_v23  ;;  %v6453_v23 = vld [vmem:[#allocation35_spill] sm:$0xff] }
 0x266   : > { %v2028_v61 = vsub.bf16 1065369472, %v1980_v25  ;;  %v1646_v52 = vadd.bf16 1048723074, %v1598_v40  ;;  %v1505_v0 = vmul.bf16 %v1457_v16, %v5363_v41  ;;  %v1461_v37 = vadd.bf16 1068908470, %v1413_v28 }
 0x267   : > { %v6447_v8 = vmul.bf16 1060454197, %v5087_v14  ;;  %v2027_v27 = vsub.bf16 1065369472, %v1979_v36  ;;  %v1983_v48 = vmul.bf16 %v5280_v13, %v1695_v17  ;;  %v1554_v33 = vadd.bf16 3197288082, %v1506_v11 }
 0x268   : > { %v1412_v19 = vmul.bf16 %v1364_v50, %v5425_v21  ;;  %v2124_v42 = vsub.bf16 0, %v2028_v61  ;;  %v1694_v1 = vmul.bf16 %v1646_v52, %v5227_v22  ;;  %v1553_v15 = vadd.bf16 3197288082, %v1505_v0 }
 0x269   : > { %vm5665_vm10 = vcmp.lt.bf16.partialorder %v6447_v8, 0  ;;  %v1509_v56 = vmul.bf16 %v1461_v37, %v5442_v62  ;;  %v2123_v46 = vsub.bf16 0, %v2027_v27  ;;  %v2031_v57 = vsub.bf16 1065369472, %v1983_v48 }
 0x26a   : > { %v1602_v2 = vmul.bf16 %v1554_v33, %v5406_v32  ;;  %v1460_v12 = vadd.bf16 1068908470, %v1412_v19  ;;  %v2172_v45 = vsel %vm5632_vm7, %v2124_v42, %v2028_v61  ;;  %v1982_v47 = vmul.bf16 %v5274_v30, %v1694_v1  ;;  %v3224_v33 = vpop.f32.mrb[32].mxu1 }
 0x26b   : > { %v1601_v13 = vmul.bf16 %v1553_v15, %v5363_v41  ;;  %v1557_v63 = vadd.bf16 3197288082, %v1509_v56  ;;  %v2220_v44 = vadd.bf16 1065369472, %v2172_v45  ;;  %v2171_v22 = vsel %vm5642_vm8, %v2123_v46, %v2027_v27  ;;  %v3225_v1 = vpop.f32.mrb[33].mxu1 }
 0x26c   : > { %v2127_v10 = vsub.bf16 0, %v2031_v57  ;;  %v1650_v3 = vadd.bf16 1048723074, %v1602_v2  ;;  %v6450_v29 = vmul.bf16 1060454197, %v5194_v24  ;;  %v1508_v36 = vmul.bf16 %v1460_v12, %v5425_v21 }
 0x26d   : > { %v2219_v58 = vadd.bf16 1065369472, %v2171_v22  ;;  %v2030_v54 = vsub.bf16 1065369472, %v1982_v47  ;;  %v1649_v7 = vadd.bf16 1048723074, %v1601_v13  ;;  %v1605_v30 = vmul.bf16 %v1557_v63, %v5442_v62 }
 0x26e   : > { %vm5682_vm11 = vcmp.lt.bf16.partialorder %v6450_v29, 0  ;;  %v6454_v39 = vmul.bf16 1060454197, %v6453_v23  ;;  %v6457_v5 = vmul.bf16 1056980736, %v4988_v18  ;;  %v2175_v16 = vsel %vm5652_vm9, %v2127_v10, %v2031_v57  ;;  %v3227_v47 = vpop.f32.mrb[34].mxu1 }
 0x26f   : > { %v1698_v28 = vmul.bf16 %v1650_v3, %v5406_v32  ;;  %v6458_v17 = vmul.bf16 1056980736, %v6440_v51  ;;  %v2223_v50 = vadd.bf16 1065369472, %v2175_v16  ;;  %v2126_v61 = vsub.bf16 0, %v2030_v54 }
 0x270   : > { %vm5689_vm12 = vcmp.lt.bf16.partialorder %v6454_v39, 0  ;;  %v2268_v40 = vmul.bf16 %v2220_v44, %v6457_v5  ;;  %v1697_v52 = vmul.bf16 %v1649_v7, %v5363_v41  ;;  %v1653_v37 = vadd.bf16 1048723074, %v1605_v30  ;;  %v5713_v41 = vld [vmem:[%s5906_s4] ss:$0 sm:$0xff]  ;;  %v3228_v44 = vpop.f32.mrb[35].mxu1 }
 0x271   : > { %v2267_v11 = vmul.bf16 %v2219_v58, %v6458_v17  ;;  %v1986_v0 = vmul.bf16 %v5419_v20, %v1698_v28  ;;  %v1556_v18 = vadd.bf16 3197288082, %v1508_v36  ;;  %v1320_v8 = vmul.bf16 1065893768, %v5485_v43 }
 0x272   : > { %2601 = vmatprep.mubr.bf16.mxu1 %v2268_v40  ;;  %v6459_v55 = vmul.bf16 1056980736, %v5114_v60  ;;  %v2174_v27 = vsel %vm5665_vm10, %v2126_v61, %v2030_v54  ;;  %v1985_v51 = vmul.bf16 %v5365_v31, %v1697_v52  ;;  %v1319_v48 = vmul.bf16 1065893768, %v5479_v34  ;;  %v5731_v40 = vpop.f32.mrb[64].mxu0 }
 0x273   : > { %2602 = vmatmul.mubr.bf16.gmra.mrb[76].mxu1 %v2267_v11  ;;  %v2222_v20 = vadd.bf16 1065369472, %v2174_v27  ;;  %v2034_v19 = vsub.bf16 1065369472, %v1986_v0  ;;  %v1701_v42 = vmul.bf16 %v1653_v37, %v5442_v62  ;;  %v1604_v60 = vmul.bf16 %v1556_v18, %v5425_v21  ;;  %v2676_v28 = vpop.f32.mrb[65].mxu0 }
 0x274   : > { %v2271_v32 = vmul.bf16 %v2223_v50, %v6459_v55  ;;  %v2033_v4 = vsub.bf16 1065369472, %v1985_v51  ;;  %v1368_v15 = vadd.bf16 3216687034, %v1320_v8  ;;  %v1367_v56 = vadd.bf16 3216687034, %v1319_v48 }
 0x275   : > { %v3226_v31 = vadd.f32 %v3225_v1, %v3224_v33  ;;  %v6460_v46 = vmul.bf16 1056980736, %v5087_v14  ;;  %v2130_v2 = vsub.bf16 0, %v2034_v19  ;;  %v1989_v12 = vmul.bf16 %v5529_v35, %v1701_v42 }
 0x276   : > { %2609 = vmatprep.mubr.bf16.mxu1 %v2271_v32  ;;  %v1652_v45 = vadd.bf16 1048723074, %v1604_v60  ;;  %v2129_v13 = vsub.bf16 0, %v2033_v4  ;;  %v1416_v63 = vmul.bf16 %v1368_v15, %v5485_v43  ;;  %v1415_v62 = vmul.bf16 %v1367_v56, %v5479_v34 }
 0x277   : > { %v2270_v57 = vmul.bf16 %v2222_v20, %v6460_v46  ;;  %v2516_v22 = vadd.f32 %v3226_v31, %v5713_v41  ;;  %v2178_v10 = vsel %vm5682_vm11, %v2130_v2, %v2034_v19  ;;  %v2037_v3 = vsub.bf16 1065369472, %v1989_v12 }
 0x278   : > { %v1700_v14 = vmul.bf16 %v1652_v45, %v5425_v21  ;;  %v3229_v29 = vadd.f32 %v3228_v44, %v3227_v47  ;;  %v2226_v58 = vadd.bf16 1065369472, %v2178_v10  ;;  %v2177_v35 = vsel %vm5689_vm12, %v2129_v13, %v2033_v4  ;;  %v3230_v44 = vpop.f32.mrb[36].mxu1 }
 0x279   : > { %v1464_v54 = vadd.bf16 1068908470, %v1416_v63  ;;  %v1463_v7 = vadd.bf16 1068908470, %v1415_v62  ;;  %v6461_v30 = vmul.bf16 1060454197, %v5332_v53  ;;  %v2677_v61 = vadd.f32 %v2676_v28, %v2516_v22 }
 0x27a   : > { %v2133_v39 = vsub.bf16 0, %v2037_v3  ;;  %v1988_v5 = vmul.bf16 %v5503_v6, %v1700_v14  ;;  %v6462_v21 = vmul.bf16 1056980736, %v5194_v24  ;;  %v2519_v36 = vadd.f32 %v3229_v29, %v5713_v41  ;;  %v3407_v6 = vpop.f32.mrb[66].mxu0  ;;  %v3231_v22 = vpop.f32.mrb[37].mxu1 }
 0x27b   : > { %vm2085_vm13 = vcmp.lt.bf16.partialorder %v6461_v30, 0  ;;  %2610 = vmatmul.mubr.bf16.gmra.mrb[80].mxu1 %v2270_v57  ;;  %v1512_v16 = vmul.bf16 %v1464_v54, %v5485_v43  ;;  %v1511_v25 = vmul.bf16 %v1463_v7, %v5479_v34  ;;  %v2225_v17 = vadd.bf16 1065369472, %v2177_v35  ;;  %v2679_v55 = vpop.f32.mrb[67].mxu0 }
 0x27c   : > { %v2274_v38 = vmul.bf16 %v2226_v58, %v6462_v21  ;;  %v2181_v11 = vsel %vm2085_vm13, %v2133_v39, %v2037_v3  ;;  %v2036_v50 = vsub.bf16 1065369472, %v1988_v5  ;;  %v981_v24 = vmul.bf16 1056980736, %v5332_v53  ;;  %v3233_v3 = vpop.f32.mrb[38].mxu1 }
 0x27d   : > { %v2229_v52 = vadd.bf16 1065369472, %v2181_v11  ;;  %v1560_v0 = vadd.bf16 3197288082, %v1512_v16  ;;  %v1559_v37 = vadd.bf16 3197288082, %v1511_v25  ;;  %v3154_v8 = vpack.c.bf16 %v2677_v61, %v2677_v61 }
 0x27e   : > { %2617 = vmatprep.mubr.bf16.mxu1 %v2274_v38  ;;  %v2132_v18 = vsub.bf16 0, %v2036_v50  ;;  %v977_v32 = vmul.bf16 1056980736, %v6453_v23  ;;  %v2680_v48 = vadd.f32 %v2679_v55, %v2519_v36  ;;  %v6463_v33 = vmul.bf16 1060454197, %v5283_v26  ;;  %v3234_v29 = vpop.f32.mrb[39].mxu1 }
 0x27f   : > { %v1608_v27 = vmul.bf16 %v1560_v0, %v5485_v43  ;;  %v1607_v51 = vmul.bf16 %v1559_v37, %v5479_v34  ;;  %v2277_v20 = vmul.bf16 %v2229_v52, %v981_v24  ;;  %2932 = vst.msk [vmem:[%s5743_s26] sm:$0xf] %vm2931_vm14, %v3154_v8  ;;  %v980_v46 = vmul.bf16 1056980736, %v5283_v26 }
 0x280   : > { %vm2084_vm15 = vcmp.lt.bf16.partialorder %v6463_v33, 0  ;;  %v2273_v19 = vmul.bf16 %v2225_v17, %v977_v32  ;;  %v3155_v60 = vpack.c.bf16 %v2680_v48, %v2680_v48  ;;  %v6464_v13 = vmul.bf16 1060454197, %v5399_v59 }
 0x281   : > { %v1656_v42 = vadd.bf16 1048723074, %v1608_v27  ;;  %v1655_v53 = vadd.bf16 1048723074, %v1607_v51  ;;  %v2180_v1 = vsel %vm2084_vm15, %v2132_v18, %v2036_v50  ;;  %v3232_v10 = vadd.f32 %v3231_v22, %v3230_v44 }
 0x282   : > { %2933 = vst.msk [vmem:[%s5743_s26 + $0x4] sm:$0xf] %vm2931_vm14, %v3155_v60  ;;  %v2228_v15 = vadd.bf16 1065369472, %v2180_v1  ;;  %vm2087_vm0 = vcmp.lt.bf16.partialorder %v6464_v13, 0  ;;  %v3235_v54 = vadd.f32 %v3234_v29, %v3233_v3 }
 0x283   : > { %2618 = vmatmul.mubr.bf16.gmra.mrb[84].mxu1 %v2273_v19  ;;  %v1704_v4 = vmul.bf16 %v1656_v42, %v5485_v43  ;;  %v1703_v23 = vmul.bf16 %v1655_v53, %v5479_v34  ;;  %v6465_v43 = vld [vmem:[#allocation47_spill] sm:$0xff]  ;;  %v983_v58 = vmul.bf16 1056980736, %v5399_v59  ;;  %v2524_v35 = vadd.f32 %v3232_v10, %v5713_v41 }
 0x284   : > { %2625 = vmatprep.mubr.bf16.mxu1 %v2277_v20  ;;  %v2276_v12 = vmul.bf16 %v2228_v15, %v980_v46  ;;  %v6466_v34 = vmul.bf16 1060454197, %v6465_v43  ;;  %v2527_v39 = vadd.f32 %v3235_v54, %v5713_v41 }
 0x285   : > { %v1992_v56 = vmul.bf16 %v5625_v9, %v1704_v4  ;;  %v1991_v31 = vmul.bf16 %v5533_v49, %v1703_v23  ;;  %v984_v9 = vmul.bf16 1056980736, %v6465_v43  ;;  %v2685_v30 = vadd.f32 %v5731_v40, %v2524_v35 }
 0x286   : > { %vm2088_vm1 = vcmp.lt.bf16.partialorder %v6466_v34, 0  ;;  %v2688_v21 = vadd.f32 %v3407_v6, %v2527_v39 }
 0x287   : > { %v2040_v57 = vsub.bf16 1065369472, %v1992_v56  ;;  %v2039_v2 = vsub.bf16 1065369472, %v1991_v31  ;;  %v3156_v5 = vpack.c.bf16 %v2685_v30, %v2685_v30 }
 0x288   : > { %v3157_v38 = vpack.c.bf16 %v2688_v21, %v2688_v21 }
 0x289   : > { %v2136_v45 = vsub.bf16 0, %v2040_v57  ;;  %v2135_v47 = vsub.bf16 0, %v2039_v2  ;;  %2934 = vst.msk [vmem:[%s5743_s26 + $0x8] sm:$0xf] %vm2931_vm14, %v3156_v5 }
 0x28a   : > { %2935 = vst.msk [vmem:[%s5743_s26 + $0xc] sm:$0xf] %vm2931_vm14, %v3157_v38  ;;  %v3236_v16 = vpop.f32.mrb[40].mxu1 }
 0x28b   : > { %2626 = vmatmul.mubr.bf16.gmra.mrb[88].mxu1 %v2276_v12  ;;  %v2184_v63 = vsel %vm2088_vm1, %v2136_v45, %v2040_v57  ;;  %v2183_v62 = vsel %vm2087_vm0, %v2135_v47, %v2039_v2  ;;  %v3237_v59 = vpop.f32.mrb[41].mxu1 }
 0x28c   : > { %v2232_v49 = vadd.bf16 1065369472, %v2184_v63  ;;  %v2231_v26 = vadd.bf16 1065369472, %v2183_v62  ;;  %v3238_v25 = vadd.f32 %v3237_v59, %v3236_v16  ;;  %v3239_v28 = vpop.f32.mrb[42].mxu1 }
 0x28d   : > { %v3240_v36 = vpop.f32.mrb[43].mxu1 }
 0x28e   : > { %v2280_v14 = vmul.bf16 %v2232_v49, %v984_v9  ;;  %v2279_v7 = vmul.bf16 %v2231_v26, %v983_v58  ;;  %v3241_v17 = vadd.f32 %v3240_v36, %v3239_v28  ;;  %v2532_v40 = vadd.f32 %v3238_v25, %v5713_v41 }
 0x28f   : > { %v3410_v11 = vpop.f32.mrb[68].mxu0 }
 0x290   : > { %2633 = vmatprep.mubr.bf16.mxu1 %v2280_v14  ;;  %v2692_v50 = vpop.f32.mrb[69].mxu0  ;;  %v2535_v61 = vadd.f32 %v3241_v17, %v5713_v41 }
 0x291   : > { %v2693_v6 = vadd.f32 %v2692_v50, %v2532_v40  ;;  %v3411_v52 = vpop.f32.mrb[70].mxu0 }
 0x292   : > { %v2695_v0 = vpop.f32.mrb[71].mxu0 }
 0x293   : > { %2634 = vmatmul.mubr.bf16.gmra.mrb[92].mxu1 %v2279_v7  ;;  %v3158_v37 = vpack.c.bf16 %v2693_v6, %v2693_v6  ;;  %v2696_v24 = vadd.f32 %v2695_v0, %v2535_v61 }
 0x295   : > { %2936 = vst.msk [vmem:[%s5743_s26 + $0x10] sm:$0xf] %vm2931_vm14, %v3158_v37  ;;  %v3159_v18 = vpack.c.bf16 %v2696_v24, %v2696_v24 }
 0x297   : > { %2937 = vst.msk [vmem:[%s5743_s26 + $0x14] sm:$0xf] %vm2931_vm14, %v3159_v18 }
 0x2a5   : > { %v3242_v8 = vpop.f32.mrb[44].mxu1 }
 0x2a6   : > { %v3243_v55 = vpop.f32.mrb[45].mxu1 }
 0x2a7   : > { %v3244_v32 = vadd.f32 %v3243_v55, %v3242_v8  ;;  %v3245_v27 = vpop.f32.mrb[46].mxu1 }
 0x2a8   : > { %v3246_v51 = vpop.f32.mrb[47].mxu1 }
 0x2a9   : > { %v2540_v48 = vadd.f32 %v3244_v32, %v5713_v41  ;;  %v3247_v33 = vadd.f32 %v3246_v51, %v3245_v27 }
 0x2aa   : > { %v3414_v20 = vpop.f32.mrb[72].mxu0 }
 0x2ab   : > { %v2701_v19 = vadd.f32 %v3410_v11, %v2540_v48  ;;  %v2543_v42 = vadd.f32 %v3247_v33, %v5713_v41  ;;  %v2708_v53 = vpop.f32.mrb[73].mxu0 }
 0x2ac   : > { %v3415_v60 = vpop.f32.mrb[74].mxu0 }
 0x2ad   : > { %v3160_v1 = vpack.c.bf16 %v2701_v19, %v2701_v19  ;;  %v2704_v4 = vadd.f32 %v3411_v52, %v2543_v42  ;;  %v2711_v23 = vpop.f32.mrb[75].mxu0 }
 0x2af   : > { %2938 = vst.msk [vmem:[%s5743_s26 + $0x18] sm:$0xf] %vm2931_vm14, %v3160_v1  ;;  %v3161_v15 = vpack.c.bf16 %v2704_v4, %v2704_v4 }
 0x2b1   : > { %2939 = vst.msk [vmem:[%s5743_s26 + $0x1c] sm:$0xf] %vm2931_vm14, %v3161_v15 }
 0x2bc   : > { %v3248_v56 = vpop.f32.mrb[48].mxu1 }
 0x2bd   : > { %v3249_v31 = vpop.f32.mrb[49].mxu1 }
 0x2be   : > { %v3250_v46 = vadd.f32 %v3249_v31, %v3248_v56  ;;  %v3251_v57 = vpop.f32.mrb[50].mxu1 }
 0x2bf   : > { %v3252_v2 = vpop.f32.mrb[51].mxu1 }
 0x2c0   : > { %v2548_v12 = vadd.f32 %v3250_v46, %v5713_v41  ;;  %v3253_v45 = vadd.f32 %v3252_v2, %v3251_v57 }
 0x2c2   : > { %v2709_v47 = vadd.f32 %v2708_v53, %v2548_v12  ;;  %v2551_v13 = vadd.f32 %v3253_v45, %v5713_v41 }
 0x2c3   : > { %v3418_v43 = vpop.f32.mrb[76].mxu0 }
 0x2c4   : > { %v3162_v34 = vpack.c.bf16 %v2709_v47, %v2709_v47  ;;  %v2712_v63 = vadd.f32 %v2711_v23, %v2551_v13  ;;  %v2724_v62 = vpop.f32.mrb[77].mxu0 }
 0x2c5   : > { %v3419_v44 = vpop.f32.mrb[78].mxu0 }
 0x2c6   : > { %2940 = vst.msk [vmem:[%s5743_s26 + $0x20] sm:$0xf] %vm2931_vm14, %v3162_v34  ;;  %v3163_v9 = vpack.c.bf16 %v2712_v63, %v2712_v63  ;;  %v2727_v49 = vpop.f32.mrb[79].mxu0 }
 0x2c8   : > { %2941 = vst.msk [vmem:[%s5743_s26 + $0x24] sm:$0xf] %vm2931_vm14, %v3163_v9 }
 0x2d6   : > { %v3254_v22 = vpop.f32.mrb[52].mxu1 }
 0x2d7   : > { %v3255_v26 = vpop.f32.mrb[53].mxu1 }
 0x2d8   : > { %v3256_v10 = vadd.f32 %v3255_v26, %v3254_v22  ;;  %v3257_v3 = vpop.f32.mrb[54].mxu1 }
 0x2d9   : > { %v3258_v14 = vpop.f32.mrb[55].mxu1 }
 0x2da   : > { %v2556_v29 = vadd.f32 %v3256_v10, %v5713_v41  ;;  %v3259_v58 = vadd.f32 %v3258_v14, %v3257_v3 }
 0x2dc   : > { %v2717_v35 = vadd.f32 %v3414_v20, %v2556_v29  ;;  %v2559_v54 = vadd.f32 %v3259_v58, %v5713_v41 }
 0x2dd   : > { %v5793_v7 = vpop.f32.mrb[80].mxu0 }
 0x2de   : > { %v2740_v30 = vpop.f32.mrb[81].mxu0  ;;  %v3164_v39 = vpack.c.bf16 %v2717_v35, %v2717_v35  ;;  %v2720_v5 = vadd.f32 %v3415_v60, %v2559_v54 }
 0x2df   : > { %v5795_v21 = vpop.f32.mrb[82].mxu0 }
 0x2e0   : > { %v2743_v38 = vpop.f32.mrb[83].mxu0  ;;  %2942 = vst.msk [vmem:[%s5743_s26 + $0x28] sm:$0xf] %vm2931_vm14, %v3164_v39  ;;  %v3165_v16 = vpack.c.bf16 %v2720_v5, %v2720_v5 }
 0x2e2   : > { %2943 = vst.msk [vmem:[%s5743_s26 + $0x2c] sm:$0xf] %vm2931_vm14, %v3165_v16 }
 0x2ef   : > { %v3260_v59 = vpop.f32.mrb[56].mxu1 }
 0x2f0   : > { %v3261_v25 = vpop.f32.mrb[57].mxu1 }
 0x2f1   : > { %v3262_v28 = vadd.f32 %v3261_v25, %v3260_v59  ;;  %v3263_v36 = vpop.f32.mrb[58].mxu1 }
 0x2f2   : > { %v3264_v17 = vpop.f32.mrb[59].mxu1 }
 0x2f3   : > { %v2564_v40 = vadd.f32 %v3262_v28, %v5713_v41  ;;  %v3265_v11 = vadd.f32 %v3264_v17, %v3263_v36 }
 0x2f5   : > { %v2725_v50 = vadd.f32 %v2724_v62, %v2564_v40  ;;  %v2567_v61 = vadd.f32 %v3265_v11, %v5713_v41 }
 0x2f6   : > { %v5803_v6 = vpop.f32.mrb[84].mxu0 }
 0x2f7   : > { %v5805_v52 = vpop.f32.mrb[85].mxu0  ;;  %v3166_v0 = vpack.c.bf16 %v2725_v50, %v2725_v50  ;;  %v2728_v37 = vadd.f32 %v2727_v49, %v2567_v61 }
 0x2f8   : > { %v5807_v24 = vpop.f32.mrb[86].mxu0 }
 0x2f9   : > { %v5809_v18 = vpop.f32.mrb[87].mxu0  ;;  %2944 = vst.msk [vmem:[%s5743_s26 + $0x30] sm:$0xf] %vm2931_vm14, %v3166_v0  ;;  %v3167_v8 = vpack.c.bf16 %v2728_v37, %v2728_v37 }
 0x2fb   : > { %2945 = vst.msk [vmem:[%s5743_s26 + $0x34] sm:$0xf] %vm2931_vm14, %v3167_v8 }
 0x306   : > { %v3266_v55 = vpop.f32.mrb[60].mxu1 }
 0x307   : > { %v3267_v32 = vpop.f32.mrb[61].mxu1 }
 0x308   : > { %v3268_v27 = vadd.f32 %v3267_v32, %v3266_v55  ;;  %v3269_v51 = vpop.f32.mrb[62].mxu1 }
 0x309   : > { %v3270_v48 = vpop.f32.mrb[63].mxu1 }
 0x30a   : > { %v2572_v33 = vadd.f32 %v3268_v27, %v5713_v41  ;;  %v3271_v20 = vadd.f32 %v3270_v48, %v3269_v51 }
 0x30c   : > { %v2733_v19 = vadd.f32 %v3418_v43, %v2572_v33  ;;  %v2575_v42 = vadd.f32 %v3271_v20, %v5713_v41 }
 0x30e   : > { %v3168_v53 = vpack.c.bf16 %v2733_v19, %v2733_v19  ;;  %v2736_v60 = vadd.f32 %v3419_v44, %v2575_v42 }
 0x310   : > { %2946 = vst.msk [vmem:[%s5743_s26 + $0x38] sm:$0xf] %vm2931_vm14, %v3168_v53  ;;  %v3169_v1 = vpack.c.bf16 %v2736_v60, %v2736_v60 }
 0x312   : > { %v5819_v4 = vpop.f32.mrb[88].mxu0  ;;  %2947 = vst.msk [vmem:[%s5743_s26 + $0x3c] sm:$0xf] %vm2931_vm14, %v3169_v1 }
 0x313   : > { %v5823_v23 = vpop.f32.mrb[89].mxu0 }
 0x314   : > { %v5825_v15 = vpop.f32.mrb[90].mxu0 }
 0x315   : > { %v5827_v56 = vpop.f32.mrb[91].mxu0 }
 0x323   : > { %v3272_v31 = vpop.f32.mrb[64].mxu1 }
 0x324   : > { %v3273_v46 = vpop.f32.mrb[65].mxu1 }
 0x325   : > { %v3274_v57 = vadd.f32 %v3273_v46, %v3272_v31  ;;  %v3275_v2 = vpop.f32.mrb[66].mxu1  ;;  %v5829_v12 = vpop.f32.mrb[92].mxu0 }
 0x326   : > { %v3276_v45 = vpop.f32.mrb[67].mxu1  ;;  %v5831_v47 = vpop.f32.mrb[93].mxu0 }
 0x327   : > { %v2580_v13 = vadd.f32 %v3274_v57, %v5713_v41  ;;  %v3277_v43 = vadd.f32 %v3276_v45, %v3275_v2  ;;  %v5834_v34 = vpop.f32.mrb[94].mxu0 }
 0x328   : > { %v5836_v63 = vpop.f32.mrb[95].mxu0 }
 0x329   : > { %v2741_v62 = vadd.f32 %v2740_v30, %v2580_v13  ;;  %v2583_v44 = vadd.f32 %v3277_v43, %v5713_v41 }
 0x32b   : > { %v3170_v9 = vpack.c.bf16 %v2741_v62, %v2741_v62  ;;  %v2744_v49 = vadd.f32 %v2743_v38, %v2583_v44 }
 0x32d   : > { %2948 = vst.msk [vmem:[%s5743_s26 + $0x40] sm:$0xf] %vm2931_vm14, %v3170_v9  ;;  %v3171_v22 = vpack.c.bf16 %v2744_v49, %v2744_v49 }
 0x32f   : > { %v3278_v26 = vpop.f32.mrb[68].mxu1  ;;  %2949 = vst.msk [vmem:[%s5743_s26 + $0x44] sm:$0xf] %vm2931_vm14, %v3171_v22 }
 0x330   : > { %v3279_v10 = vpop.f32.mrb[69].mxu1 }
 0x331   : > { %v3280_v3 = vadd.f32 %v3279_v10, %v3278_v26  ;;  %v3281_v14 = vpop.f32.mrb[70].mxu1 }
 0x332   : > { %v3282_v29 = vpop.f32.mrb[71].mxu1 }
 0x333   : > { %v2588_v58 = vadd.f32 %v3280_v3, %v5713_v41  ;;  %v3283_v35 = vadd.f32 %v3282_v29, %v3281_v14 }
 0x335   : > { %v2749_v54 = vadd.f32 %v5793_v7, %v2588_v58  ;;  %v2591_v30 = vadd.f32 %v3283_v35, %v5713_v41 }
 0x337   : > { %v3172_v39 = vpack.c.bf16 %v2749_v54, %v2749_v54  ;;  %v2752_v5 = vadd.f32 %v5795_v21, %v2591_v30  ;;  %v3284_v38 = vpop.f32.mrb[72].mxu1 }
 0x338   : > { %v3285_v16 = vpop.f32.mrb[73].mxu1 }
 0x339   : > { %2950 = vst.msk [vmem:[%s5743_s26 + $0x48] sm:$0xf] %vm2931_vm14, %v3172_v39  ;;  %v3173_v59 = vpack.c.bf16 %v2752_v5, %v2752_v5  ;;  %v3286_v25 = vadd.f32 %v3285_v16, %v3284_v38  ;;  %v3287_v28 = vpop.f32.mrb[74].mxu1 }
 0x33a   : > { %v3288_v36 = vpop.f32.mrb[75].mxu1 }
 0x33b   : > { %2951 = vst.msk [vmem:[%s5743_s26 + $0x4c] sm:$0xf] %vm2931_vm14, %v3173_v59  ;;  %v2596_v17 = vadd.f32 %v3286_v25, %v5713_v41  ;;  %v3289_v7 = vadd.f32 %v3288_v36, %v3287_v28 }
 0x33d   : > { %v2757_v40 = vadd.f32 %v5805_v52, %v2596_v17  ;;  %v2599_v11 = vadd.f32 %v3289_v7, %v5713_v41 }
 0x33f   : > { %v3174_v50 = vpack.c.bf16 %v2757_v40, %v2757_v40  ;;  %v2760_v21 = vadd.f32 %v5809_v18, %v2599_v11 }
 0x341   : > { %2952 = vst.msk [vmem:[%s5743_s26 + $0x50] sm:$0xf] %vm2931_vm14, %v3174_v50  ;;  %v3175_v61 = vpack.c.bf16 %v2760_v21, %v2760_v21 }
 0x343   : > { %2953 = vst.msk [vmem:[%s5743_s26 + $0x54] sm:$0xf] %vm2931_vm14, %v3175_v61 }
 0x346   : > { %v3290_v0 = vpop.f32.mrb[76].mxu1 }
 0x347   : > { %v3291_v37 = vpop.f32.mrb[77].mxu1 }
 0x348   : > { %v3292_v8 = vadd.f32 %v3291_v37, %v3290_v0  ;;  %v3293_v55 = vpop.f32.mrb[78].mxu1 }
 0x349   : > { %v3294_v32 = vpop.f32.mrb[79].mxu1 }
 0x34a   : > { %v2604_v27 = vadd.f32 %v3292_v8, %v5713_v41  ;;  %v3295_v52 = vadd.f32 %v3294_v32, %v3293_v55 }
 0x34c   : > { %v2765_v51 = vadd.f32 %v5803_v6, %v2604_v27  ;;  %v2607_v48 = vadd.f32 %v3295_v52, %v5713_v41 }
 0x34e   : > { %v3176_v18 = vpack.c.bf16 %v2765_v51, %v2765_v51  ;;  %v2768_v33 = vadd.f32 %v5807_v24, %v2607_v48  ;;  %v3296_v20 = vpop.f32.mrb[80].mxu1 }
 0x34f   : > { %v3297_v19 = vpop.f32.mrb[81].mxu1 }
 0x350   : > { %2954 = vst.msk [vmem:[%s5743_s26 + $0x58] sm:$0xf] %vm2931_vm14, %v3176_v18  ;;  %v3177_v42 = vpack.c.bf16 %v2768_v33, %v2768_v33  ;;  %v3298_v53 = vadd.f32 %v3297_v19, %v3296_v20  ;;  %v3299_v60 = vpop.f32.mrb[82].mxu1 }
 0x351   : > { %v3300_v1 = vpop.f32.mrb[83].mxu1 }
 0x352   : > { %2955 = vst.msk [vmem:[%s5743_s26 + $0x5c] sm:$0xf] %vm2931_vm14, %v3177_v42  ;;  %v2612_v31 = vadd.f32 %v3298_v53, %v5713_v41  ;;  %v3301_v6 = vadd.f32 %v3300_v1, %v3299_v60 }
 0x354   : > { %v2773_v46 = vadd.f32 %v5823_v23, %v2612_v31  ;;  %v2615_v57 = vadd.f32 %v3301_v6, %v5713_v41 }
 0x356   : > { %v3178_v24 = vpack.c.bf16 %v2773_v46, %v2773_v46  ;;  %v2776_v2 = vadd.f32 %v5827_v56, %v2615_v57  ;;  %v3302_v45 = vpop.f32.mrb[84].mxu1 }
 0x357   : > { %v3303_v13 = vpop.f32.mrb[85].mxu1 }
 0x358   : > { %2956 = vst.msk [vmem:[%s5743_s26 + $0x60] sm:$0xf] %vm2931_vm14, %v3178_v24  ;;  %v3179_v43 = vpack.c.bf16 %v2776_v2, %v2776_v2  ;;  %v3304_v62 = vadd.f32 %v3303_v13, %v3302_v45  ;;  %v3305_v44 = vpop.f32.mrb[86].mxu1 }
 0x359   : > { %v3306_v9 = vpop.f32.mrb[87].mxu1 }
 0x35a   : > { %2957 = vst.msk [vmem:[%s5743_s26 + $0x64] sm:$0xf] %vm2931_vm14, %v3179_v43  ;;  %v2620_v49 = vadd.f32 %v3304_v62, %v5713_v41  ;;  %v3307_v23 = vadd.f32 %v3306_v9, %v3305_v44 }
 0x35c   : > { %v2781_v22 = vadd.f32 %v5819_v4, %v2620_v49  ;;  %v2623_v26 = vadd.f32 %v3307_v23, %v5713_v41 }
 0x35e   : > { %v3180_v56 = vpack.c.bf16 %v2781_v22, %v2781_v22  ;;  %v2784_v10 = vadd.f32 %v5825_v15, %v2623_v26  ;;  %v3308_v3 = vpop.f32.mrb[88].mxu1 }
 0x35f   : > { %v3309_v14 = vpop.f32.mrb[89].mxu1 }
 0x360   : > { %2958 = vst.msk [vmem:[%s5743_s26 + $0x68] sm:$0xf] %vm2931_vm14, %v3180_v56  ;;  %v3181_v29 = vpack.c.bf16 %v2784_v10, %v2784_v10  ;;  %v3310_v58 = vadd.f32 %v3309_v14, %v3308_v3  ;;  %v3311_v35 = vpop.f32.mrb[90].mxu1 }
 0x361   : > { %v3312_v54 = vpop.f32.mrb[91].mxu1 }
 0x362   : > { %2959 = vst.msk [vmem:[%s5743_s26 + $0x6c] sm:$0xf] %vm2931_vm14, %v3181_v29  ;;  %v2628_v30 = vadd.f32 %v3310_v58, %v5713_v41  ;;  %v3313_v4 = vadd.f32 %v3312_v54, %v3311_v35 }
 0x364   : > { %v2789_v39 = vadd.f32 %v5831_v47, %v2628_v30  ;;  %v2631_v5 = vadd.f32 %v3313_v4, %v5713_v41 }
 0x366   : > { %v3182_v15 = vpack.c.bf16 %v2789_v39, %v2789_v39  ;;  %v2792_v38 = vadd.f32 %v5836_v63, %v2631_v5  ;;  %v3314_v16 = vpop.f32.mrb[92].mxu1 }
 0x367   : > { %v3315_v59 = vpop.f32.mrb[93].mxu1 }
 0x368   : > { %2960 = vst.msk [vmem:[%s5743_s26 + $0x70] sm:$0xf] %vm2931_vm14, %v3182_v15  ;;  %v3183_v25 = vpack.c.bf16 %v2792_v38, %v2792_v38  ;;  %v3316_v28 = vadd.f32 %v3315_v59, %v3314_v16  ;;  %v3317_v36 = vpop.f32.mrb[94].mxu1 }
 0x369   : > { %v3318_v17 = vpop.f32.mrb[95].mxu1 }
 0x36a   : > { %2961 = vst.msk [vmem:[%s5743_s26 + $0x74] sm:$0xf] %vm2931_vm14, %v3183_v25  ;;  %v2636_v7 = vadd.f32 %v3316_v28, %v5713_v41  ;;  %v3319_v47 = vadd.f32 %v3318_v17, %v3317_v36 }
 0x36c   : > { %v2797_v40 = vadd.f32 %v5829_v12, %v2636_v7  ;;  %v2639_v11 = vadd.f32 %v3319_v47, %v5713_v41 }
 0x36e   : > { %v3184_v50 = vpack.c.bf16 %v2797_v40, %v2797_v40  ;;  %v2800_v63 = vadd.f32 %v5834_v34, %v2639_v11 }
 0x370   : > { %2962 = vst.msk [vmem:[%s5743_s26 + $0x78] sm:$0xf] %vm2931_vm14, %v3184_v50  ;;  %v3185_v21 = vpack.c.bf16 %v2800_v63, %v2800_v63 }
 0x372   : > { %2963 = vst.msk [vmem:[%s5743_s26 + $0x7c] sm:$0xf] %vm2931_vm14, %v3185_v21 }
 0x373 PF: > { %s15_s18 = sadd.s32 1, %s3707_s18  }
 0x374   : > { %p12_p4 = scmp.ge.s32.totalorder %s15_s18, 4  }
 0x376   :  { %14 = sbr.rel (!%p12_p4) target bundleno = 1 (0x1), region = 70 }

</bundles_post_ra>
